<compile_context>
chip_gen: v5e
topology: v5e:2x2
jax: 0.10.0
libtpu: 0.0.40
codegen_flags: <defaults>
</compile_context>

<pallas_src>
import functools
import math

import jax
import jax.numpy as jnp
from jax import lax
from jax.experimental import pallas as pl
from jax.experimental.pallas import tpu as pltpu

# ------------------------- small, TPU-friendly shapes ------------------------
BATCH = 2
SEQ = 128
D_MODEL = 256
NUM_HEADS = 2
D_K = D_MODEL // NUM_HEADS  # 128 == one lane tile (same per-head dim as the spec)


# ------------------------------ fused Pallas kernel --------------------------
def mha_fused_kernel(q_in, k_in, v_in,
                     wq_ref, wk_ref, wv_ref, wo_ref,
                     bq_ref, bk_ref, bv_ref, bo_ref,
                     o_ref, *, num_heads, scale):
    # One batch element per grid step; batch dim is squeezed so refs are (S, D).
    # Activations are cast to bf16 once; weights arrive already in bf16.
    xq = q_in[...].astype(jnp.bfloat16)
    xk = k_in[...].astype(jnp.bfloat16)
    xv = v_in[...].astype(jnp.bfloat16)

    S, D = xq.shape
    dk = D // num_heads

    out = jnp.zeros((S, D), jnp.float32)
    for h in range(num_heads):  # static unroll; heads are 128-lane aligned slabs
        sl = slice(h * dk, (h + 1) * dk)

        # Per-head projections: (S, D) @ (D, dk), bf16 operands, f32 accumulate.
        # 1/sqrt(d_k) folded into q (after the bias, equivalent to scaling scores).
        qh = (jnp.dot(xq, wq_ref[:, sl], preferred_element_type=jnp.float32)
              + bq_ref[:, sl]) * scale
        kh = (jnp.dot(xk, wk_ref[:, sl], preferred_element_type=jnp.float32)
              + bk_ref[:, sl])
        vh = (jnp.dot(xv, wv_ref[:, sl], preferred_element_type=jnp.float32)
              + bv_ref[:, sl]).astype(jnp.bfloat16)

        # scores = qh @ kh^T without materializing a transpose of kh.
        scores = lax.dot_general(
            qh.astype(jnp.bfloat16), kh.astype(jnp.bfloat16),
            (((1,), (1,)), ((), ())),
            preferred_element_type=jnp.float32)          # (S, S) f32

        m = jnp.max(scores, axis=-1, keepdims=True)
        p = jnp.exp(scores - m)
        denom = jnp.sum(p, axis=-1, keepdims=True)
        probs = (p * pl.reciprocal(denom, approx=True)).astype(jnp.bfloat16)

        ctx = jnp.dot(probs, vh, preferred_element_type=jnp.float32)  # (S, dk)

        # Accumulate the output projection per head: no (S, D) scratch round trip.
        out = out + jnp.dot(ctx.astype(jnp.bfloat16), wo_ref[sl, :],
                            preferred_element_type=jnp.float32)

    o_ref[...] = (out + bo_ref[...]).astype(o_ref.dtype)


def multi_head_attention(params, Q, K, V, *, num_heads=NUM_HEADS):
    B, S, D = Q.shape
    assert D % num_heads == 0, "d_model must be divisible by num_heads"
    dk = D // num_heads

    kernel = functools.partial(
        mha_fused_kernel, num_heads=num_heads, scale=1.0 / math.sqrt(dk))

    # Batch dim squeezed out of the kernel refs; head split handled in-kernel.
    x_spec = pl.BlockSpec((None, S, D), lambda b: (b, 0, 0))
    w_spec = pl.BlockSpec((D, D), lambda b: (0, 0))
    b_spec = pl.BlockSpec((1, D), lambda b: (0, 0))

    # Pre-cast weights to bf16 (halves weight HBM traffic, MXU-native dtype);
    # biases stay f32 for the f32 epilogue adds.
    wq = params["wq"].astype(jnp.bfloat16)
    wk = params["wk"].astype(jnp.bfloat16)
    wv = params["wv"].astype(jnp.bfloat16)
    wo = params["wo"].astype(jnp.bfloat16)

    return pl.pallas_call(
        kernel,
        out_shape=jax.ShapeDtypeStruct((B, S, D), Q.dtype),
        grid_spec=pltpu.PrefetchScalarGridSpec(
            num_scalar_prefetch=0,
            grid=(B,),
            in_specs=[x_spec, x_spec, x_spec,
                      w_spec, w_spec, w_spec, w_spec,
                      b_spec, b_spec, b_spec, b_spec],
            out_specs=x_spec,
        ),
        compiler_params=pltpu.CompilerParams(
            # batch axis parallel -> shards across v7x's 2 TensorCores.
            dimension_semantics=("parallel",),
        ),
    )(Q, K, V, wq, wk, wv, wo,
      params["bq"].reshape(1, D), params["bk"].reshape(1, D),
      params["bv"].reshape(1, D), params["bo"].reshape(1, D))


# ------------------------------ params & reference ---------------------------
def init_params(key, d_model):
    """Deterministic nn.Linear-style init; weights stored as (in, out)."""
    bound = 1.0 / math.sqrt(d_model)
    keys = jax.random.split(key, 8)
    params = {}
    for i, name in enumerate(("q", "k", "v", "o")):
        params[f"w{name}"] = jax.random.uniform(
            keys[2 * i], (d_model, d_model), jnp.float32, -bound, bound)
        params[f"b{name}"] = jax.random.uniform(
            keys[2 * i + 1], (d_model,), jnp.float32, -bound, bound)
    return params


def split_heads(x, num_heads):
    B, S, D = x.shape
    dk = D // num_heads
    return x.reshape(B, S, num_heads, dk).transpose(0, 2, 1, 3)


def combine_heads(x):
    B, H, S, dk = x.shape
    return x.transpose(0, 2, 1, 3).reshape(B, S, H * dk)


def reference(params, Q, K, V):
    def lin(x, w, b):
        return x @ w + b

    q = split_heads(lin(Q, params["wq"], params["bq"]), NUM_HEADS)
    k = split_heads(lin(K, params["wk"], params["bk"]), NUM_HEADS)
    v = split_heads(lin(V, params["wv"], params["bv"]), NUM_HEADS)
    scores = jnp.einsum("bhqd,bhkd->bhqk", q, k) / math.sqrt(D_K)
    probs = jax.nn.softmax(scores, axis=-1)
    out = jnp.einsum("bhqk,bhkd->bhqd", probs, v)
    return lin(combine_heads(out), params["wo"], params["bo"])


if __name__ == "__main__":
    key = jax.random.PRNGKey(0)
    kp, kq, kk, kv = jax.random.split(key, 4)

    params = init_params(kp, D_MODEL)
    Q = jax.random.normal(kq, (BATCH, SEQ, D_MODEL), jnp.float32)
    K = jax.random.normal(kk, (BATCH, SEQ, D_MODEL), jnp.float32)
    V = jax.random.normal(kv, (BATCH, SEQ, D_MODEL), jnp.float32)

    mha = jax.jit(multi_head_attention)
    out = jax.block_until_ready(mha(params, Q, K, V))

    ref = reference(params, Q, K, V)  # f32 reference (PyTorch-equivalent math)
    assert out.shape == (BATCH, SEQ, D_MODEL)
    # Tolerance accounts for bf16 matmul operands vs. the pure-f32 reference.
    assert jnp.allclose(out, ref, atol=2e-2, rtol=2e-2), "mismatch vs reference"

    print("KERNEL_OK")
</pallas_src>

<mosaic_0001>
module attributes {stable_mosaic.version = 11 : i64} {
  func.func @mha_fused_kernel(%arg0: i32, %arg1: memref<1x128x256xf32, #tpu.memory_space<vmem>>, %arg2: memref<1x128x256xf32, #tpu.memory_space<vmem>>, %arg3: memref<1x128x256xf32, #tpu.memory_space<vmem>>, %arg4: memref<256x256xbf16, #tpu.memory_space<vmem>>, %arg5: memref<256x256xbf16, #tpu.memory_space<vmem>>, %arg6: memref<256x256xbf16, #tpu.memory_space<vmem>>, %arg7: memref<256x256xbf16, #tpu.memory_space<vmem>>, %arg8: memref<1x256xf32, #tpu.memory_space<vmem>>, %arg9: memref<1x256xf32, #tpu.memory_space<vmem>>, %arg10: memref<1x256xf32, #tpu.memory_space<vmem>>, %arg11: memref<1x256xf32, #tpu.memory_space<vmem>>, %arg12: memref<1x128x256xf32, #tpu.memory_space<vmem>>) attributes {dimension_semantics = [#tpu.dimension_semantics<parallel>], iteration_bounds = array<i64: 2>, scalar_prefetch = 0 : i64, scratch_operands = 0 : i64, tpu.core_type = #tpu.core_type<tc>, window_params = [{transform_indices = @transform_0, window_bounds = array<i64: 1, 128, 256>}, {transform_indices = @transform_1, window_bounds = array<i64: 1, 128, 256>}, {transform_indices = @transform_2, window_bounds = array<i64: 1, 128, 256>}, {pipeline_mode = #tpu.pipeline_mode<synchronous>, transform_indices = @transform_3, window_bounds = array<i64: 256, 256>}, {pipeline_mode = #tpu.pipeline_mode<synchronous>, transform_indices = @transform_4, window_bounds = array<i64: 256, 256>}, {pipeline_mode = #tpu.pipeline_mode<synchronous>, transform_indices = @transform_5, window_bounds = array<i64: 256, 256>}, {pipeline_mode = #tpu.pipeline_mode<synchronous>, transform_indices = @transform_6, window_bounds = array<i64: 256, 256>}, {pipeline_mode = #tpu.pipeline_mode<synchronous>, transform_indices = @transform_7, window_bounds = array<i64: 1, 256>}, {pipeline_mode = #tpu.pipeline_mode<synchronous>, transform_indices = @transform_8, window_bounds = array<i64: 1, 256>}, {pipeline_mode = #tpu.pipeline_mode<synchronous>, transform_indices = @transform_9, window_bounds = array<i64: 1, 256>}, {pipeline_mode = #tpu.pipeline_mode<synchronous>, transform_indices = @transform_10, window_bounds = array<i64: 1, 256>}, {transform_indices = @transform_11, window_bounds = array<i64: 1, 128, 256>}]} {
    %c0 = arith.constant 0 : index
    %c0_0 = arith.constant 0 : index
    %c0_1 = arith.constant 0 : index
    %0 = vector.load %arg1[%c0, %c0_0, %c0_1] : memref<1x128x256xf32, #tpu.memory_space<vmem>>, vector<1x128x256xf32>
    %1 = vector.shape_cast %0 : vector<1x128x256xf32> to vector<128x256xf32>
    %2 = arith.truncf %1 : vector<128x256xf32> to vector<128x256xbf16>
    %c0_2 = arith.constant 0 : index
    %c0_3 = arith.constant 0 : index
    %c0_4 = arith.constant 0 : index
    %3 = vector.load %arg2[%c0_2, %c0_3, %c0_4] : memref<1x128x256xf32, #tpu.memory_space<vmem>>, vector<1x128x256xf32>
    %4 = vector.shape_cast %3 : vector<1x128x256xf32> to vector<128x256xf32>
    %5 = arith.truncf %4 : vector<128x256xf32> to vector<128x256xbf16>
    %c0_5 = arith.constant 0 : index
    %c0_6 = arith.constant 0 : index
    %c0_7 = arith.constant 0 : index
    %6 = vector.load %arg3[%c0_5, %c0_6, %c0_7] : memref<1x128x256xf32, #tpu.memory_space<vmem>>, vector<1x128x256xf32>
    %7 = vector.shape_cast %6 : vector<1x128x256xf32> to vector<128x256xf32>
    %8 = arith.truncf %7 : vector<128x256xf32> to vector<128x256xbf16>
    %cst = arith.constant 0.000000e+00 : f32
    %9 = vector.broadcast %cst : f32 to vector<128x256xf32>
    %c0_8 = arith.constant 0 : index
    %c0_9 = arith.constant 0 : index
    %10 = vector.load %arg4[%c0_8, %c0_9] : memref<256x256xbf16, #tpu.memory_space<vmem>>, vector<256x128xbf16>
    %cst_10 = arith.constant dense<0.000000e+00> : vector<128x128xf32>
    %11 = tpu.matmul %2, %10, %cst_10 {dimension_numbers = #tpu.dot_dimension_numbers<[1], [0], [0], [1], [0, 0, 1, 1], [], []>} : vector<128x256xbf16>, vector<256x128xbf16>, vector<128x128xf32> -> vector<128x128xf32>
    %c0_11 = arith.constant 0 : index
    %c0_12 = arith.constant 0 : index
    %12 = vector.load %arg8[%c0_11, %c0_12] : memref<1x256xf32, #tpu.memory_space<vmem>>, vector<1x128xf32>
    %13 = vector.broadcast %12 : vector<1x128xf32> to vector<128x128xf32>
    %14 = arith.addf %11, %13 : vector<128x128xf32>
    %cst_13 = arith.constant 0.0883883461 : f32
    %15 = vector.broadcast %cst_13 : f32 to vector<128x128xf32>
    %16 = arith.mulf %14, %15 : vector<128x128xf32>
    %c0_14 = arith.constant 0 : index
    %c0_15 = arith.constant 0 : index
    %17 = vector.load %arg5[%c0_14, %c0_15] : memref<256x256xbf16, #tpu.memory_space<vmem>>, vector<256x128xbf16>
    %cst_16 = arith.constant dense<0.000000e+00> : vector<128x128xf32>
    %18 = tpu.matmul %5, %17, %cst_16 {dimension_numbers = #tpu.dot_dimension_numbers<[1], [0], [0], [1], [0, 0, 1, 1], [], []>} : vector<128x256xbf16>, vector<256x128xbf16>, vector<128x128xf32> -> vector<128x128xf32>
    %c0_17 = arith.constant 0 : index
    %c0_18 = arith.constant 0 : index
    %19 = vector.load %arg9[%c0_17, %c0_18] : memref<1x256xf32, #tpu.memory_space<vmem>>, vector<1x128xf32>
    %20 = vector.broadcast %19 : vector<1x128xf32> to vector<128x128xf32>
    %21 = arith.addf %18, %20 : vector<128x128xf32>
    %c0_19 = arith.constant 0 : index
    %c0_20 = arith.constant 0 : index
    %22 = vector.load %arg6[%c0_19, %c0_20] : memref<256x256xbf16, #tpu.memory_space<vmem>>, vector<256x128xbf16>
    %cst_21 = arith.constant dense<0.000000e+00> : vector<128x128xf32>
    %23 = tpu.matmul %8, %22, %cst_21 {dimension_numbers = #tpu.dot_dimension_numbers<[1], [0], [0], [1], [0, 0, 1, 1], [], []>} : vector<128x256xbf16>, vector<256x128xbf16>, vector<128x128xf32> -> vector<128x128xf32>
    %c0_22 = arith.constant 0 : index
    %c0_23 = arith.constant 0 : index
    %24 = vector.load %arg10[%c0_22, %c0_23] : memref<1x256xf32, #tpu.memory_space<vmem>>, vector<1x128xf32>
    %25 = vector.broadcast %24 : vector<1x128xf32> to vector<128x128xf32>
    %26 = arith.addf %23, %25 : vector<128x128xf32>
    %27 = arith.truncf %26 : vector<128x128xf32> to vector<128x128xbf16>
    %28 = arith.truncf %16 : vector<128x128xf32> to vector<128x128xbf16>
    %29 = arith.truncf %21 : vector<128x128xf32> to vector<128x128xbf16>
    %cst_24 = arith.constant dense<0.000000e+00> : vector<128x128xf32>
    %30 = tpu.matmul %28, %29, %cst_24 {dimension_numbers = #tpu.dot_dimension_numbers<[1], [1], [0], [0], [0, 0, 1, 0], [], []>} : vector<128x128xbf16>, vector<128x128xbf16>, vector<128x128xf32> -> vector<128x128xf32>
    %cst_25 = arith.constant dense<0xFF800000> : vector<128xf32>
    %31 = vector.multi_reduction <maximumf>, %30, %cst_25 [1] : vector<128x128xf32> to vector<128xf32>
    %32 = vector.shape_cast %31 : vector<128xf32> to vector<128x1xf32>
    %33 = vector.broadcast %32 : vector<128x1xf32> to vector<128x128xf32>
    %34 = arith.subf %30, %33 : vector<128x128xf32>
    %35 = math.exp %34 : vector<128x128xf32>
    %cst_26 = arith.constant dense<0.000000e+00> : vector<128xf32>
    %36 = vector.multi_reduction <add>, %35, %cst_26 [1] : vector<128x128xf32> to vector<128xf32>
    %37 = vector.shape_cast %36 : vector<128xf32> to vector<128x1xf32>
    %38 = tpu.reciprocal %37 {approx = true} : vector<128x1xf32> -> vector<128x1xf32>
    %39 = vector.broadcast %38 : vector<128x1xf32> to vector<128x128xf32>
    %40 = arith.mulf %35, %39 : vector<128x128xf32>
    %41 = arith.truncf %40 : vector<128x128xf32> to vector<128x128xbf16>
    %cst_27 = arith.constant dense<0.000000e+00> : vector<128x128xf32>
    %42 = tpu.matmul %41, %27, %cst_27 {dimension_numbers = #tpu.dot_dimension_numbers<[1], [0], [0], [1], [0, 0, 1, 1], [], []>} : vector<128x128xbf16>, vector<128x128xbf16>, vector<128x128xf32> -> vector<128x128xf32>
    %43 = arith.truncf %42 : vector<128x128xf32> to vector<128x128xbf16>
    %c0_28 = arith.constant 0 : index
    %c0_29 = arith.constant 0 : index
    %44 = vector.load %arg7[%c0_28, %c0_29] : memref<256x256xbf16, #tpu.memory_space<vmem>>, vector<128x256xbf16>
    %cst_30 = arith.constant dense<0.000000e+00> : vector<128x256xf32>
    %45 = tpu.matmul %43, %44, %cst_30 {dimension_numbers = #tpu.dot_dimension_numbers<[1], [0], [0], [1], [0, 0, 1, 1], [], []>} : vector<128x128xbf16>, vector<128x256xbf16>, vector<128x256xf32> -> vector<128x256xf32>
    %46 = arith.addf %9, %45 : vector<128x256xf32>
    %c0_31 = arith.constant 0 : index
    %c128 = arith.constant 128 : index
    %47 = vector.load %arg4[%c0_31, %c128] : memref<256x256xbf16, #tpu.memory_space<vmem>>, vector<256x128xbf16>
    %cst_32 = arith.constant dense<0.000000e+00> : vector<128x128xf32>
    %48 = tpu.matmul %2, %47, %cst_32 {dimension_numbers = #tpu.dot_dimension_numbers<[1], [0], [0], [1], [0, 0, 1, 1], [], []>} : vector<128x256xbf16>, vector<256x128xbf16>, vector<128x128xf32> -> vector<128x128xf32>
    %c0_33 = arith.constant 0 : index
    %c128_34 = arith.constant 128 : index
    %49 = vector.load %arg8[%c0_33, %c128_34] : memref<1x256xf32, #tpu.memory_space<vmem>>, vector<1x128xf32>
    %50 = vector.broadcast %49 : vector<1x128xf32> to vector<128x128xf32>
    %51 = arith.addf %48, %50 : vector<128x128xf32>
    %cst_35 = arith.constant 0.0883883461 : f32
    %52 = vector.broadcast %cst_35 : f32 to vector<128x128xf32>
    %53 = arith.mulf %51, %52 : vector<128x128xf32>
    %c0_36 = arith.constant 0 : index
    %c128_37 = arith.constant 128 : index
    %54 = vector.load %arg5[%c0_36, %c128_37] : memref<256x256xbf16, #tpu.memory_space<vmem>>, vector<256x128xbf16>
    %cst_38 = arith.constant dense<0.000000e+00> : vector<128x128xf32>
    %55 = tpu.matmul %5, %54, %cst_38 {dimension_numbers = #tpu.dot_dimension_numbers<[1], [0], [0], [1], [0, 0, 1, 1], [], []>} : vector<128x256xbf16>, vector<256x128xbf16>, vector<128x128xf32> -> vector<128x128xf32>
    %c0_39 = arith.constant 0 : index
    %c128_40 = arith.constant 128 : index
    %56 = vector.load %arg9[%c0_39, %c128_40] : memref<1x256xf32, #tpu.memory_space<vmem>>, vector<1x128xf32>
    %57 = vector.broadcast %56 : vector<1x128xf32> to vector<128x128xf32>
    %58 = arith.addf %55, %57 : vector<128x128xf32>
    %c0_41 = arith.constant 0 : index
    %c128_42 = arith.constant 128 : index
    %59 = vector.load %arg6[%c0_41, %c128_42] : memref<256x256xbf16, #tpu.memory_space<vmem>>, vector<256x128xbf16>
    %cst_43 = arith.constant dense<0.000000e+00> : vector<128x128xf32>
    %60 = tpu.matmul %8, %59, %cst_43 {dimension_numbers = #tpu.dot_dimension_numbers<[1], [0], [0], [1], [0, 0, 1, 1], [], []>} : vector<128x256xbf16>, vector<256x128xbf16>, vector<128x128xf32> -> vector<128x128xf32>
    %c0_44 = arith.constant 0 : index
    %c128_45 = arith.constant 128 : index
    %61 = vector.load %arg10[%c0_44, %c128_45] : memref<1x256xf32, #tpu.memory_space<vmem>>, vector<1x128xf32>
    %62 = vector.broadcast %61 : vector<1x128xf32> to vector<128x128xf32>
    %63 = arith.addf %60, %62 : vector<128x128xf32>
    %64 = arith.truncf %63 : vector<128x128xf32> to vector<128x128xbf16>
    %65 = arith.truncf %53 : vector<128x128xf32> to vector<128x128xbf16>
    %66 = arith.truncf %58 : vector<128x128xf32> to vector<128x128xbf16>
    %cst_46 = arith.constant dense<0.000000e+00> : vector<128x128xf32>
    %67 = tpu.matmul %65, %66, %cst_46 {dimension_numbers = #tpu.dot_dimension_numbers<[1], [1], [0], [0], [0, 0, 1, 0], [], []>} : vector<128x128xbf16>, vector<128x128xbf16>, vector<128x128xf32> -> vector<128x128xf32>
    %cst_47 = arith.constant dense<0xFF800000> : vector<128xf32>
    %68 = vector.multi_reduction <maximumf>, %67, %cst_47 [1] : vector<128x128xf32> to vector<128xf32>
    %69 = vector.shape_cast %68 : vector<128xf32> to vector<128x1xf32>
    %70 = vector.broadcast %69 : vector<128x1xf32> to vector<128x128xf32>
    %71 = arith.subf %67, %70 : vector<128x128xf32>
    %72 = math.exp %71 : vector<128x128xf32>
    %cst_48 = arith.constant dense<0.000000e+00> : vector<128xf32>
    %73 = vector.multi_reduction <add>, %72, %cst_48 [1] : vector<128x128xf32> to vector<128xf32>
    %74 = vector.shape_cast %73 : vector<128xf32> to vector<128x1xf32>
    %75 = tpu.reciprocal %74 {approx = true} : vector<128x1xf32> -> vector<128x1xf32>
    %76 = vector.broadcast %75 : vector<128x1xf32> to vector<128x128xf32>
    %77 = arith.mulf %72, %76 : vector<128x128xf32>
    %78 = arith.truncf %77 : vector<128x128xf32> to vector<128x128xbf16>
    %cst_49 = arith.constant dense<0.000000e+00> : vector<128x128xf32>
    %79 = tpu.matmul %78, %64, %cst_49 {dimension_numbers = #tpu.dot_dimension_numbers<[1], [0], [0], [1], [0, 0, 1, 1], [], []>} : vector<128x128xbf16>, vector<128x128xbf16>, vector<128x128xf32> -> vector<128x128xf32>
    %80 = arith.truncf %79 : vector<128x128xf32> to vector<128x128xbf16>
    %c128_50 = arith.constant 128 : index
    %c0_51 = arith.constant 0 : index
    %81 = vector.load %arg7[%c128_50, %c0_51] : memref<256x256xbf16, #tpu.memory_space<vmem>>, vector<128x256xbf16>
    %cst_52 = arith.constant dense<0.000000e+00> : vector<128x256xf32>
    %82 = tpu.matmul %80, %81, %cst_52 {dimension_numbers = #tpu.dot_dimension_numbers<[1], [0], [0], [1], [0, 0, 1, 1], [], []>} : vector<128x128xbf16>, vector<128x256xbf16>, vector<128x256xf32> -> vector<128x256xf32>
    %83 = arith.addf %46, %82 : vector<128x256xf32>
    %c0_53 = arith.constant 0 : index
    %c0_54 = arith.constant 0 : index
    %84 = vector.load %arg11[%c0_53, %c0_54] : memref<1x256xf32, #tpu.memory_space<vmem>>, vector<1x256xf32>
    %85 = vector.broadcast %84 : vector<1x256xf32> to vector<128x256xf32>
    %86 = arith.addf %83, %85 : vector<128x256xf32>
    %c0_55 = arith.constant 0 : index
    %c0_56 = arith.constant 0 : index
    %c0_57 = arith.constant 0 : index
    %87 = vector.load %arg12[%c0_55, %c0_56, %c0_57] : memref<1x128x256xf32, #tpu.memory_space<vmem>>, vector<1x128x256xf32>
    %88 = vector.shape_cast %87 : vector<1x128x256xf32> to vector<128x256xf32>
    %89 = vector.shape_cast %86 : vector<128x256xf32> to vector<1x128x256xf32>
    tpu.vector_store %arg12[%c0_55, %c0_56, %c0_57], %89 {strides = array<i32>} : memref<1x128x256xf32, #tpu.memory_space<vmem>>, vector<1x128x256xf32>,
    return
  }
  func.func @transform_0(%arg0: i32) -> (i32, i32, i32) {
    %c0_i32 = arith.constant 0 : i32
    %c0_i32_0 = arith.constant 0 : i32
    %c0_i32_1 = arith.constant 0 : i32
    return %arg0, %c0_i32, %c0_i32_0 : i32, i32, i32
  }
  func.func @transform_1(%arg0: i32) -> (i32, i32, i32) {
    %c0_i32 = arith.constant 0 : i32
    %c0_i32_0 = arith.constant 0 : i32
    %c0_i32_1 = arith.constant 0 : i32
    return %arg0, %c0_i32, %c0_i32_0 : i32, i32, i32
  }
  func.func @transform_2(%arg0: i32) -> (i32, i32, i32) {
    %c0_i32 = arith.constant 0 : i32
    %c0_i32_0 = arith.constant 0 : i32
    %c0_i32_1 = arith.constant 0 : i32
    return %arg0, %c0_i32, %c0_i32_0 : i32, i32, i32
  }
  func.func @transform_3(%arg0: i32) -> (i32, i32) {
    %c0_i32 = arith.constant 0 : i32
    %c0_i32_0 = arith.constant 0 : i32
    %c0_i32_1 = arith.constant 0 : i32
    return %c0_i32, %c0_i32_0 : i32, i32
  }
  func.func @transform_4(%arg0: i32) -> (i32, i32) {
    %c0_i32 = arith.constant 0 : i32
    %c0_i32_0 = arith.constant 0 : i32
    %c0_i32_1 = arith.constant 0 : i32
    return %c0_i32, %c0_i32_0 : i32, i32
  }
  func.func @transform_5(%arg0: i32) -> (i32, i32) {
    %c0_i32 = arith.constant 0 : i32
    %c0_i32_0 = arith.constant 0 : i32
    %c0_i32_1 = arith.constant 0 : i32
    return %c0_i32, %c0_i32_0 : i32, i32
  }
  func.func @transform_6(%arg0: i32) -> (i32, i32) {
    %c0_i32 = arith.constant 0 : i32
    %c0_i32_0 = arith.constant 0 : i32
    %c0_i32_1 = arith.constant 0 : i32
    return %c0_i32, %c0_i32_0 : i32, i32
  }
  func.func @transform_7(%arg0: i32) -> (i32, i32) {
    %c0_i32 = arith.constant 0 : i32
    %c0_i32_0 = arith.constant 0 : i32
    %c0_i32_1 = arith.constant 0 : i32
    return %c0_i32, %c0_i32_0 : i32, i32
  }
  func.func @transform_8(%arg0: i32) -> (i32, i32) {
    %c0_i32 = arith.constant 0 : i32
    %c0_i32_0 = arith.constant 0 : i32
    %c0_i32_1 = arith.constant 0 : i32
    return %c0_i32, %c0_i32_0 : i32, i32
  }
  func.func @transform_9(%arg0: i32) -> (i32, i32) {
    %c0_i32 = arith.constant 0 : i32
    %c0_i32_0 = arith.constant 0 : i32
    %c0_i32_1 = arith.constant 0 : i32
    return %c0_i32, %c0_i32_0 : i32, i32
  }
  func.func @transform_10(%arg0: i32) -> (i32, i32) {
    %c0_i32 = arith.constant 0 : i32
    %c0_i32_0 = arith.constant 0 : i32
    %c0_i32_1 = arith.constant 0 : i32
    return %c0_i32, %c0_i32_0 : i32, i32
  }
  func.func @transform_11(%arg0: i32) -> (i32, i32, i32) {
    %c0_i32 = arith.constant 0 : i32
    %c0_i32_0 = arith.constant 0 : i32
    %c0_i32_1 = arith.constant 0 : i32
    return %arg0, %c0_i32, %c0_i32_0 : i32, i32, i32
  }
}

</mosaic_0001>

<bundles_post_ra>
// kernel: multi_head_attention.1
= control target key start
LH: loop header
LB: loop body
LE: loop exit
PB: predicated region body
PF: predicated region fallthrough
CT: control target
= control target key end

     0   :  { %16 = vsyncpa [#allocation3], 0  ;;  %s5953_s0 = inlined_call_operand.vmem [shape: f32[2,128,256], index: 0, kind: input, shape index: {}]   ;;  %s5954_s1 = inlined_call_operand.vmem [shape: f32[2,128,256], index: 1, kind: input, shape index: {}]   ;;  %s5955_s2 = inlined_call_operand.vmem [shape: f32[2,128,256], index: 2, kind: input, shape index: {}]   ;;  %s5956_s3 = inlined_call_operand.vmem [shape: bf16[256,256], index: 3, kind: input, shape index: {}]   ;;  %s5957_s4 = inlined_call_operand.vmem [shape: bf16[256,256], index: 4, kind: input, shape index: {}]   ;;  %s5958_s5 = inlined_call_operand.vmem [shape: bf16[256,256], index: 5, kind: input, shape index: {}]   ;;  %s5959_s6 = inlined_call_operand.vmem [shape: bf16[256,256], index: 6, kind: input, shape index: {}]   ;;  %s5960_s7 = inlined_call_operand.vmem [shape: f32[1,256], index: 7, kind: input, shape index: {}]   ;;  %s5961_s8 = inlined_call_operand.vmem [shape: f32[1,256], index: 8, kind: input, shape index: {}]   ;;  %s5962_s9 = inlined_call_operand.vmem [shape: f32[1,256], index: 9, kind: input, shape index: {}]   ;;  %s5963_s10 = inlined_call_operand.vmem [shape: f32[1,256], index: 10, kind: input, shape index: {}]   ;;  %s5964_s11 = inlined_call_operand.hbm [shape: f32[2,128,256], index: 11, kind: output, shape index: {}]  }
   0x1   :  { %18 = vsyncpa [#allocation3 + $0x1], 0  ;;  %s4066_s17 = smov 0   ;;  %s4068_s18 = smov 0  }
   0x2   :  { %s4070_s19 = smov 0   ;;  %s4072_s20 = smov 0  }
   0x3 LB: > { %6000 = sst [smem:[#allocation5_spill]] %s3998_s19  ;;  %s4087_s21 = sadd.s32 4294967295, %s4002_s20   ;;  %s4002_s20 = sphi %s4072_s20, %s6076_s20   ;;  %s3998_s19 = sphi %s4070_s19, %s6073_s19   ;;  %s3994_s18 = sphi %s4068_s18, %s6075_s18   ;;  %s3990_s17 = sphi %s4066_s17, %s6074_s17  }
   0x4   : > { %s3105_s22 = sadd.s32 4294967294, %s4002_s20   ;;  %s4091_s23 = sadd.s32 1, %s4002_s20  }
   0x5   : > { %s277_s24 = sadd.s32 1, %s3998_s19  ;;  %s274_s25 = ssub.s32 %s4002_s20, %s4091_s23 }
   0x6   : > { %p287_p0 = scmp.ne.s32.totalorder %s3998_s19, %s3994_s18  ;;  %p275_p1 = scmp.eq.s32.totalorder %s274_s25, 0 }
   0x7   : > { %p288_p2 = scmp.eq.s32.totalorder %s4087_s21, 1  ;;  %p293_p3 = scmp.ne.s32.totalorder %s3994_s18, %s3990_s17 }
   0x8   : > { %p294_p4 = scmp.eq.s32.totalorder %s3105_s22, 1  ;;  %p3108_p7 = scmp.ge.s32.totalorder %s4002_s20, 1 }
   0x9   : > { %s4102_s26 = scalar_select %p275_p1, %s3998_s19, %s277_s24  }
   0xa   : > { %p4104_p5 = por %p288_p2, %p287_p0  ;;  %p4108_p6 = por %p294_p4, %p293_p3 }
   0xb   : > { %6001 = sst [smem:[#allocation6_spill]] %s4102_s26  ;;  %p360_p8 = scmp.lt.s32.totalorder %s4002_s20, 3 }
   0xd   : > { %p361_p9 = pnand %p3108_p7, %p360_p8 }
   0xf   : > { %364 = sbr.rel (%p361_p9) target bundleno = 2133 (0x855), region = 64 }
  0x14   : > { %v3210_v0 = vld [vmem:[%s5957_s4 + $0x70] sm:$0xf]  ;;  %v3659_v1 = vld [vmem:[%s5957_s4 + $0x74] sm:$0xf0]  ;;  %v3206_v5 = vld [vmem:[%s5957_s4 + $0x60] sm:$0xf] }
  0x15   : > { %v3242_v2 = vld [vmem:[%s5957_s4 + $0xf0] sm:$0xf]  ;;  %v3211_v3 = vor.u32 %v3659_v1, %v3210_v0  ;;  %v3667_v4 = vld [vmem:[%s5957_s4 + $0xf4] sm:$0xf0]  ;;  %v3658_v6 = vld [vmem:[%s5957_s4 + $0x64] sm:$0xf0] }
  0x16   : > { %v3243_v7 = vor.u32 %v3667_v4, %v3242_v2  ;;  %v3238_v8 = vld [vmem:[%s5957_s4 + $0xe0] sm:$0xf]  ;;  %v3666_v9 = vld [vmem:[%s5957_s4 + $0xe4] sm:$0xf0]  ;;  %v3207_v10 = vor.u32 %v3658_v6, %v3206_v5  ;;  %v3202_v12 = vld [vmem:[%s5957_s4 + $0x50] sm:$0xf] }
  0x17   : > { %947 = vmatpush.bf16.msra.mxu2 %v3211_v3  ;;  %v3239_v11 = vor.u32 %v3666_v9, %v3238_v8  ;;  %v3657_v13 = vld [vmem:[%s5957_s4 + $0x54] sm:$0xf0]  ;;  %v3234_v14 = vld [vmem:[%s5957_s4 + $0xd0] sm:$0xf]  ;;  %v3198_v18 = vld [vmem:[%s5957_s4 + $0x40] sm:$0xf] }
  0x18   : > { %996 = vmatpush.bf16.msra.mxu3 %v3243_v7  ;;  %v3665_v15 = vld [vmem:[%s5957_s4 + $0xd4] sm:$0xf0]  ;;  %v3203_v16 = vor.u32 %v3657_v13, %v3202_v12  ;;  %v3656_v19 = vld [vmem:[%s5957_s4 + $0x44] sm:$0xf0]  ;;  %v3230_v20 = vld [vmem:[%s5957_s4 + $0xc0] sm:$0xf] }
  0x19   : > { %v3235_v17 = vor.u32 %v3665_v15, %v3234_v14  ;;  %v3664_v21 = vld [vmem:[%s5957_s4 + $0xc4] sm:$0xf0]  ;;  %v3194_v22 = vld [vmem:[%s5957_s4 + $0x30] sm:$0xf]  ;;  %v3655_v23 = vld [vmem:[%s5957_s4 + $0x34] sm:$0xf0]  ;;  %v3199_v24 = vor.u32 %v3656_v19, %v3198_v18 }
  0x1a   : > { %v3231_v25 = vor.u32 %v3664_v21, %v3230_v20  ;;  %v3226_v26 = vld [vmem:[%s5957_s4 + $0xb0] sm:$0xf]  ;;  %v3663_v27 = vld [vmem:[%s5957_s4 + $0xb4] sm:$0xf0]  ;;  %p410_p10 = scmp.lt.s32.totalorder %s4087_s21, 1  ;;  %v3195_v28 = vor.u32 %v3655_v23, %v3194_v22  ;;  %s407_s13 = sand.u32 1, %s3994_s18  }
  0x1b   : > { %948 = vmatpush.bf16.msra.mxu2 %v3207_v10  ;;  %v3227_v29 = vor.u32 %v3663_v27, %v3226_v26  ;;  %v3190_v30 = vld [vmem:[%s5957_s4 + $0x20] sm:$0xf]  ;;  %v3654_v31 = vld [vmem:[%s5957_s4 + $0x24] sm:$0xf0]  ;;  %v3186_v36 = vld [vmem:[%s5957_s4 + $0x10] sm:$0xf] }
  0x1c   : > { %997 = vmatpush.bf16.msra.mxu3 %v3239_v11  ;;  %v3222_v32 = vld [vmem:[%s5957_s4 + $0xa0] sm:$0xf]  ;;  %v3662_v33 = vld [vmem:[%s5957_s4 + $0xa4] sm:$0xf0]  ;;  %s411_s12 = scalar_select %p410_p10, %s4087_s21, 1  ;;  %v3191_v34 = vor.u32 %v3654_v31, %v3190_v30 }
  0x1d   : > { %v3223_v35 = vor.u32 %v3662_v33, %v3222_v32  ;;  %v3653_v37 = vld [vmem:[%s5957_s4 + $0x14] sm:$0xf0]  ;;  %v3218_v38 = vld [vmem:[%s5957_s4 + $0x90] sm:$0xf]  ;;  %v3182_v42 = vld [vmem:[%s5957_s4] sm:$0xf] }
  0x1e   : > { %v3661_v39 = vld [vmem:[%s5957_s4 + $0x94] sm:$0xf0]  ;;  %s4200_s25 = sshll.u32 %s411_s12, 8  ;;  %v3187_v40 = vor.u32 %v3653_v37, %v3186_v36  ;;  %v3652_v43 = vld [vmem:[%s5957_s4 + $0x4] sm:$0xf0]  ;;  %s3004_s29 = scalar_lea.sflag [#allocation3], %s407_s13 }
  0x1f   : > { %949 = vmatpush.bf16.msra.mxu2 %v3203_v16  ;;  %v3219_v41 = vor.u32 %v3661_v39, %v3218_v38  ;;  %s4212_s16 = scalar_lea.vmem %s5954_s1, %s4200_s25  ;;  %v3214_v44 = vld [vmem:[%s5957_s4 + $0x80] sm:$0xf]  ;;  %v3660_v45 = vld [vmem:[%s5957_s4 + $0x84] sm:$0xf0]  ;;  %v3183_v46 = vor.u32 %v3652_v43, %v3182_v42  ;;  %v3146_v30 = vld [vmem:[%s5956_s3 + $0x70] sm:$0xf]  ;;  %s4394_s19 = scalar_lea.vmem %s5953_s0, %s4200_s25 }
  0x20   : > { %998 = vmatpush.bf16.msra.mxu3 %v3235_v17  ;;  %v473_v47 = vld [vmem:[%s4212_s16] sm:$0xff]  ;;  %v475_v48 = vld [vmem:[%s4212_s16 + $0x10] sm:$0xff]  ;;  %v3215_v49 = vor.u32 %v3660_v45, %v3214_v44  ;;  %v474_v50 = vld [vmem:[%s4212_s16 + $0x8] sm:$0xff]  ;;  %s4647_s22 = scalar_lea.vmem %s5955_s2, %s4200_s25 }
  0x21   : > { %v476_v51 = vld [vmem:[%s4212_s16 + $0x18] sm:$0xff]  ;;  %v4224_v52 = vpack.c.bf16 %v475_v48, %v473_v47  ;;  %v477_v54 = vld [vmem:[%s4212_s16 + $0x20] sm:$0xff]  ;;  %v479_v55 = vld [vmem:[%s4212_s16 + $0x30] sm:$0xff] }
  0x22   : > { %v4226_v53 = vpack.c.bf16 %v476_v51, %v474_v50  ;;  %v478_v56 = vld [vmem:[%s4212_s16 + $0x28] sm:$0xff]  ;;  %v480_v57 = vld [vmem:[%s4212_s16 + $0x38] sm:$0xff]  ;;  %v4234_v58 = vpack.c.bf16 %v479_v55, %v477_v54  ;;  %v481_v60 = vld [vmem:[%s4212_s16 + $0x40] sm:$0xff] }
  0x23   : > { %950 = vmatpush.bf16.msra.mxu2 %v3199_v24  ;;  %v4236_v59 = vpack.c.bf16 %v480_v57, %v478_v56  ;;  %v483_v61 = vld [vmem:[%s4212_s16 + $0x50] sm:$0xff]  ;;  %v482_v62 = vld [vmem:[%s4212_s16 + $0x48] sm:$0xff]  ;;  %v484_v63 = vld [vmem:[%s4212_s16 + $0x58] sm:$0xff] }
  0x24   : > { %999 = vmatpush.bf16.msra.mxu3 %v3231_v25  ;;  %v4244_v0 = vpack.c.bf16 %v483_v61, %v481_v60  ;;  %v4246_v1 = vpack.c.bf16 %v484_v63, %v482_v62  ;;  %v485_v2 = vld [vmem:[%s4212_s16 + $0x60] sm:$0xff]  ;;  %v487_v3 = vld [vmem:[%s4212_s16 + $0x70] sm:$0xff]  ;;  %v486_v4 = vld [vmem:[%s4212_s16 + $0x68] sm:$0xff] }
  0x25   : > { %v488_v5 = vld [vmem:[%s4212_s16 + $0x78] sm:$0xff]  ;;  %v4254_v6 = vpack.c.bf16 %v487_v3, %v485_v2  ;;  %v489_v8 = vld [vmem:[%s4212_s16 + $0x80] sm:$0xff]  ;;  %v491_v9 = vld [vmem:[%s4212_s16 + $0x90] sm:$0xff] }
  0x26   : > { %v4256_v7 = vpack.c.bf16 %v488_v5, %v486_v4  ;;  %v490_v10 = vld [vmem:[%s4212_s16 + $0x88] sm:$0xff]  ;;  %v492_v11 = vld [vmem:[%s4212_s16 + $0x98] sm:$0xff]  ;;  %v4264_v12 = vpack.c.bf16 %v491_v9, %v489_v8  ;;  %v493_v14 = vld [vmem:[%s4212_s16 + $0xa0] sm:$0xff] }
  0x27   : > { %951 = vmatpush.bf16.msra.mxu2 %v3195_v28  ;;  %v4266_v13 = vpack.c.bf16 %v492_v11, %v490_v10  ;;  %v495_v15 = vld [vmem:[%s4212_s16 + $0xb0] sm:$0xff]  ;;  %v494_v16 = vld [vmem:[%s4212_s16 + $0xa8] sm:$0xff]  ;;  %v496_v17 = vld [vmem:[%s4212_s16 + $0xb8] sm:$0xff] }
  0x28   : > { %1000 = vmatpush.bf16.msra.mxu3 %v3227_v29  ;;  %v4274_v18 = vpack.c.bf16 %v495_v15, %v493_v14  ;;  %v4276_v19 = vpack.c.bf16 %v496_v17, %v494_v16  ;;  %v497_v20 = vld [vmem:[%s4212_s16 + $0xc0] sm:$0xff]  ;;  %v499_v21 = vld [vmem:[%s4212_s16 + $0xd0] sm:$0xff]  ;;  %v498_v22 = vld [vmem:[%s4212_s16 + $0xc8] sm:$0xff] }
  0x29   : > { %v500_v23 = vld [vmem:[%s4212_s16 + $0xd8] sm:$0xff]  ;;  %v4284_v24 = vpack.c.bf16 %v499_v21, %v497_v20  ;;  %v501_v26 = vld [vmem:[%s4212_s16 + $0xe0] sm:$0xff]  ;;  %v503_v27 = vld [vmem:[%s4212_s16 + $0xf0] sm:$0xff] }
  0x2a   : > { %v4286_v25 = vpack.c.bf16 %v500_v23, %v498_v22  ;;  %v502_v28 = vld [vmem:[%s4212_s16 + $0xe8] sm:$0xff]  ;;  %v504_v29 = vld [vmem:[%s4212_s16 + $0xf8] sm:$0xff]  ;;  %v4300_v33 = vpack.c.bf16 %v503_v27, %v501_v26  ;;  %v3142_v38 = vld [vmem:[%s5956_s3 + $0x60] sm:$0xf] }
  0x2b   : > { %952 = vmatpush.bf16.msra.mxu2 %v3191_v34  ;;  %v3643_v31 = vld [vmem:[%s5956_s3 + $0x74] sm:$0xf0]  ;;  %v3178_v34 = vld [vmem:[%s5956_s3 + $0xf0] sm:$0xf]  ;;  %v4308_v36 = vpack.c.bf16 %v504_v29, %v502_v28  ;;  %v3642_v39 = vld [vmem:[%s5956_s3 + $0x64] sm:$0xf0] }
  0x2c   : > { %1001 = vmatpush.bf16.msra.mxu3 %v3223_v35  ;;  %6004 = vst [vmem:[#allocation7_spill] sm:$0xff] %v4286_v25  ;;  %v3147_v32 = vor.u32 %v3643_v31, %v3146_v30  ;;  %v3651_v35 = vld [vmem:[%s5956_s3 + $0xf4] sm:$0xf0]  ;;  %v3650_v42 = vld [vmem:[%s5956_s3 + $0xe4] sm:$0xf0] }
  0x2d   : > { %6005 = vst [vmem:[#allocation8_spill] sm:$0xff] %v4308_v36  ;;  %v3179_v37 = vor.u32 %v3651_v35, %v3178_v34  ;;  %v3138_v44 = vld [vmem:[%s5956_s3 + $0x50] sm:$0xf]  ;;  %v3641_v45 = vld [vmem:[%s5956_s3 + $0x54] sm:$0xf0]  ;;  %v425_v35 = vld [vmem:[%s4394_s19] sm:$0xff] }
  0x2e   : > { %701 = vmatpush.bf16.msra.mxu0 %v3147_v32  ;;  %v3170_v47 = vld [vmem:[%s5956_s3 + $0xd0] sm:$0xf]  ;;  %v3649_v48 = vld [vmem:[%s5956_s3 + $0xd4] sm:$0xf0]  ;;  %v3134_v50 = vld [vmem:[%s5956_s3 + $0x40] sm:$0xf] }
  0x2f   : > { %953 = vmatpush.bf16.msra.mxu2 %v3187_v40  ;;  %v3174_v40 = vld [vmem:[%s5956_s3 + $0xe0] sm:$0xf]  ;;  %750 = vmatpush.bf16.msra.mxu1 %v3179_v37  ;;  %v3640_v51 = vld [vmem:[%s5956_s3 + $0x44] sm:$0xf0]  ;;  %v3130_v60 = vld [vmem:[%s5956_s3 + $0x30] sm:$0xf] }
  0x30   : > { %1002 = vmatpush.bf16.msra.mxu3 %v3219_v41  ;;  %v3143_v41 = vor.u32 %v3642_v39, %v3142_v38  ;;  %v3175_v43 = vor.u32 %v3650_v42, %v3174_v40  ;;  %v3166_v54 = vld [vmem:[%s5956_s3 + $0xc0] sm:$0xf]  ;;  %v3135_v55 = vor.u32 %v3640_v51, %v3134_v50  ;;  %v3648_v56 = vld [vmem:[%s5956_s3 + $0xc4] sm:$0xf0]  ;;  %v3639_v61 = vld [vmem:[%s5956_s3 + $0x34] sm:$0xf0] }
  0x31   : > { %v3167_v57 = vor.u32 %v3648_v56, %v3166_v54  ;;  %v3131_v62 = vor.u32 %v3639_v61, %v3130_v60  ;;  %v3162_v63 = vld [vmem:[%s5956_s3 + $0xb0] sm:$0xf]  ;;  %v3647_v2 = vld [vmem:[%s5956_s3 + $0xb4] sm:$0xf0]  ;;  %v3126_v4 = vld [vmem:[%s5956_s3 + $0x20] sm:$0xf] }
  0x32   : > { %702 = vmatpush.bf16.msra.mxu0 %v3143_v41  ;;  %v3163_v3 = vor.u32 %v3647_v2, %v3162_v63  ;;  %v3638_v5 = vld [vmem:[%s5956_s3 + $0x24] sm:$0xf0]  ;;  %v3158_v8 = vld [vmem:[%s5956_s3 + $0xa0] sm:$0xf]  ;;  %v3122_v15 = vld [vmem:[%s5956_s3 + $0x10] sm:$0xf] }
  0x33   : > { %954 = vmatpush.bf16.msra.mxu2 %v3183_v46  ;;  %751 = vmatpush.bf16.msra.mxu1 %v3175_v43  ;;  %v3139_v46 = vor.u32 %v3641_v45, %v3138_v44  ;;  %v3127_v9 = vor.u32 %v3638_v5, %v3126_v4  ;;  %v3646_v10 = vld [vmem:[%s5956_s3 + $0xa4] sm:$0xf0]  ;;  %v4375_v11 = vld [vmem:[%s5961_s8] ss:$0 sm:$0xff]  ;;  %v3637_v16 = vld [vmem:[%s5956_s3 + $0x14] sm:$0xf0] }
  0x34   : > { %1003 = vmatpush.bf16.msra.mxu3 %v3215_v49  ;;  %v3171_v49 = vor.u32 %v3649_v48, %v3170_v47  ;;  %v3159_v14 = vor.u32 %v3646_v10, %v3158_v8  ;;  %v3123_v20 = vor.u32 %v3637_v16, %v3122_v15  ;;  %v3154_v23 = vld [vmem:[%s5956_s3 + $0x90] sm:$0xf]  ;;  %v3645_v26 = vld [vmem:[%s5956_s3 + $0x94] sm:$0xf0]  ;;  %v3118_v29 = vld [vmem:[%s5956_s3] sm:$0xf] }
  0x35   : > { %v3155_v27 = vor.u32 %v3645_v26, %v3154_v23  ;;  %v3636_v30 = vld [vmem:[%s5956_s3 + $0x4] sm:$0xf0]  ;;  %v3150_v31 = vld [vmem:[%s5956_s3 + $0x80] sm:$0xf]  ;;  %v427_v37 = vld [vmem:[%s4394_s19 + $0x10] sm:$0xff] }
  0x36   : > { %955 = vmatmul.bf16.vlgmr.msra.gmra.mxu2 %v4224_v52  ;;  %703 = vmatpush.bf16.msra.mxu0 %v3139_v46  ;;  %v3119_v32 = vor.u32 %v3636_v30, %v3118_v29  ;;  %v3644_v34 = vld [vmem:[%s5956_s3 + $0x84] sm:$0xf0]  ;;  %v4412_v39 = vpack.c.bf16 %v427_v37, %v425_v35  ;;  %v428_v42 = vld [vmem:[%s4394_s19 + $0x18] sm:$0xff]  ;;  %v431_v50 = vld [vmem:[%s4394_s19 + $0x30] sm:$0xff] }
  0x37   : > { %1004 = vmatmul.bf16.vlgmr.msra.gmra.mxu3 %v4226_v53  ;;  %752 = vmatpush.bf16.msra.mxu1 %v3171_v49  ;;  %v3151_v38 = vor.u32 %v3644_v34, %v3150_v31  ;;  %v426_v41 = vld [vmem:[%s4394_s19 + $0x8] sm:$0xff]  ;;  %v429_v49 = vld [vmem:[%s4394_s19 + $0x20] sm:$0xff]  ;;  %v432_v56 = vld [vmem:[%s4394_s19 + $0x38] sm:$0xff] }
  0x38   : > { %6006 = vst [vmem:[#allocation9_spill] sm:$0xff] %v4412_v39  ;;  %v4421_v44 = vpack.c.bf16 %v428_v42, %v426_v41  ;;  %v4429_v51 = vpack.c.bf16 %v431_v50, %v429_v49  ;;  %v435_v4 = vld [vmem:[%s4394_s19 + $0x50] sm:$0xff]  ;;  %v436_v10 = vld [vmem:[%s4394_s19 + $0x58] sm:$0xff]  ;;  %v438_v29 = vld [vmem:[%s4394_s19 + $0x68] sm:$0xff] }
  0x39   : > { %v439_v23 = vld [vmem:[%s4394_s19 + $0x70] sm:$0xff]  ;;  %v440_v30 = vld [vmem:[%s4394_s19 + $0x78] sm:$0xff]  ;;  %v442_v50 = vld [vmem:[%s4394_s19 + $0x88] sm:$0xff] }
  0x3a   : > { %704 = vmatpush.bf16.msra.mxu0 %v3135_v55  ;;  %6007 = vst [vmem:[#allocation10_spill] sm:$0xff] %v4421_v44  ;;  %v430_v55 = vld [vmem:[%s4394_s19 + $0x28] sm:$0xff] }
  0x3b   : > { %753 = vmatpush.bf16.msra.mxu1 %v3167_v57  ;;  %6008 = vst [vmem:[#allocation11_spill] sm:$0xff] %v4429_v51  ;;  %v4438_v60 = vpack.c.bf16 %v432_v56, %v430_v55  ;;  %v444_v55 = vld [vmem:[%s4394_s19 + $0x98] sm:$0xff] }
  0x3d   : > { %6009 = vst [vmem:[#allocation12_spill] sm:$0xff] %v4438_v60 }
  0x3e   : > { %705 = vmatpush.bf16.msra.mxu0 %v3131_v62 }
  0x3f   : > { %754 = vmatpush.bf16.msra.mxu1 %v3163_v3  ;;  %v433_v3 = vld [vmem:[%s4394_s19 + $0x40] sm:$0xff] }
  0x40   : > { %v4446_v5 = vpack.c.bf16 %v435_v4, %v433_v3 }
  0x42   : > { %706 = vmatpush.bf16.msra.mxu0 %v3127_v9  ;;  %6010 = vst [vmem:[#allocation13_spill] sm:$0xff] %v4446_v5  ;;  %v434_v9 = vld [vmem:[%s4394_s19 + $0x48] sm:$0xff] }
  0x43   : > { %755 = vmatpush.bf16.msra.mxu1 %v3159_v14  ;;  %v4455_v15 = vpack.c.bf16 %v436_v10, %v434_v9  ;;  %v445_v9 = vld [vmem:[%s4394_s19 + $0xa0] sm:$0xff]  ;;  %v447_v10 = vld [vmem:[%s4394_s19 + $0xb0] sm:$0xff] }
  0x45   : > { %6011 = vst [vmem:[#allocation14_spill] sm:$0xff] %v4455_v15 }
  0x46   : > { %960 = vmatmul.bf16.gmra.mxu2 %v4234_v58  ;;  %707 = vmatpush.bf16.msra.mxu0 %v3123_v20 }
  0x47   : > { %1009 = vmatmul.bf16.gmra.mxu3 %v4236_v59  ;;  %756 = vmatpush.bf16.msra.mxu1 %v3155_v27 }
  0x4a   : > { %708 = vmatpush.bf16.msra.mxu0 %v3119_v32  ;;  %v4472_v32 = vpack.c.bf16 %v440_v30, %v438_v29 }
  0x4b   : > { %757 = vmatpush.bf16.msra.mxu1 %v3151_v38 }
  0x4c   : > { %6013 = vst [vmem:[#allocation16_spill] sm:$0xff] %v4472_v32 }
  0x4d   : > { %709 = vmatmul.bf16.vlgmr.msra.gmra.mxu0 %v4412_v39 }
  0x4e   : > { %758 = vmatmul.bf16.vlgmr.msra.gmra.mxu1 %v4421_v44 }
  0x56   : > { %965 = vmatmul.bf16.gmra.mxu2 %v4244_v0 }
  0x57   : > { %1014 = vmatmul.bf16.gmra.mxu3 %v4246_v1 }
  0x5d   : > { %714 = vmatmul.bf16.gmra.mxu0 %v4429_v51 }
  0x5e   : > { %763 = vmatmul.bf16.gmra.mxu1 %v4438_v60 }
  0x66   : > { %970 = vmatmul.bf16.gmra.mxu2 %v4254_v6 }
  0x67   : > { %1019 = vmatmul.bf16.gmra.mxu3 %v4256_v7 }
  0x6d   : > { %719 = vmatmul.bf16.gmra.mxu0 %v4446_v5 }
  0x6e   : > { %768 = vmatmul.bf16.gmra.mxu1 %v4455_v15  ;;  %v3266_v15 = vld [vmem:[%s5958_s5 + $0x50] sm:$0xf] }
  0x76   : > { %975 = vmatmul.bf16.gmra.mxu2 %v4264_v12 }
  0x77   : > { %1024 = vmatmul.bf16.gmra.mxu3 %v4266_v13 }
  0x7e   : > { %773 = vmatmul.bf16.gmra.mxu1 %v4472_v32 }
  0x86   : > { %980 = vmatmul.bf16.gmra.mxu2 %v4274_v18 }
  0x87   : > { %1029 = vmatmul.bf16.gmra.mxu3 %v4276_v19 }
  0x96   : > { %985 = vmatmul.bf16.gmra.mxu2 %v4284_v24 }
  0x97   : > { %1034 = vmatmul.bf16.gmra.mxu3 %v4286_v25 }
  0xa6   : > { %990 = vmatmul.bf16.gmra.mxu2 %v4300_v33 }
  0xa7   : > { %1039 = vmatmul.bf16.gmra.mxu3 %v4308_v36 }
  0xb9   : > { %v956_v17 = vpop.f32.mrf.mxu2 }
  0xba   : > { %v957_v21 = vadd.f32 %v4375_v11, %v956_v17  ;;  %v1005_v22 = vpop.f32.mrf.mxu3 }
  0xbc   : > { %v4396_v28 = vadd.f32 %v1005_v22, %v957_v21  ;;  %v437_v22 = vld [vmem:[%s4394_s19 + $0x60] sm:$0xff] }
  0xbd   : > { %v4463_v26 = vpack.c.bf16 %v439_v23, %v437_v22  ;;  %v448_v22 = vld [vmem:[%s4394_s19 + $0xb8] sm:$0xff] }
  0xbf   : > { %6012 = vst [vmem:[#allocation15_spill] sm:$0xff] %v4463_v26  ;;  %724 = vmatmul.bf16.gmra.mxu0 %v4463_v26 }
  0xc1   : > { %v4414_v40 = vpop.f32.mrf.mxu2 }
  0xc2   : > { %v4418_v43 = vpop.f32.mrf.mxu3 }
  0xc9   : > { %v961_v45 = vpop.f32.mrf.mxu2 }
  0xca   : > { %v962_v46 = vadd.f32 %v4375_v11, %v961_v45  ;;  %v1010_v47 = vpop.f32.mrf.mxu3  ;;  %v441_v45 = vld [vmem:[%s4394_s19 + $0x80] sm:$0xff] }
  0xcc   : > { %v4425_v48 = vadd.f32 %v1010_v47, %v962_v46  ;;  %v443_v46 = vld [vmem:[%s4394_s19 + $0x90] sm:$0xff] }
  0xcd   : > { %v4484_v47 = vpack.c.bf16 %v443_v46, %v441_v45  ;;  %v451_v45 = vld [vmem:[%s4394_s19 + $0xd0] sm:$0xff] }
  0xce   : > { %v3274_v46 = vld [vmem:[%s5958_s5 + $0x70] sm:$0xf] }
  0xcf   : > { %6014 = vst [vmem:[#allocation17_spill] sm:$0xff] %v4484_v47  ;;  %729 = vmatmul.bf16.gmra.mxu0 %v4484_v47 }
  0xd1   : > { %v4431_v54 = vpop.f32.mrf.mxu2 }
  0xd2   : > { %v4435_v57 = vpop.f32.mrf.mxu3 }
  0xd9   : > { %v966_v61 = vpop.f32.mrf.mxu2 }
  0xda   : > { %v967_v62 = vadd.f32 %v4375_v11, %v966_v61  ;;  %v1015_v63 = vpop.f32.mrf.mxu3  ;;  %v4493_v61 = vpack.c.bf16 %v444_v55, %v442_v50 }
  0xdc   : > { %v4442_v2 = vadd.f32 %v1015_v63, %v967_v62  ;;  %6015 = vst [vmem:[#allocation18_spill] sm:$0xff] %v4493_v61  ;;  %778 = vmatmul.bf16.gmra.mxu1 %v4493_v61 }
  0xe1   : > { %v4448_v8 = vpop.f32.mrf.mxu2 }
  0xe2   : > { %v4452_v14 = vpop.f32.mrf.mxu3 }
  0xe9   : > { %v971_v16 = vpop.f32.mrf.mxu2 }
  0xea   : > { %v972_v17 = vadd.f32 %v4375_v11, %v971_v16  ;;  %v1020_v20 = vpop.f32.mrf.mxu3  ;;  %v446_v16 = vld [vmem:[%s4394_s19 + $0xa8] sm:$0xff] }
  0xeb   : > { %v4506_v29 = vpack.c.bf16 %v448_v22, %v446_v16  ;;  %v452_v16 = vld [vmem:[%s4394_s19 + $0xd8] sm:$0xff] }
  0xec   : > { %v4459_v21 = vadd.f32 %v1020_v20, %v972_v17  ;;  %v4503_v20 = vpack.c.bf16 %v447_v10, %v445_v9  ;;  %v3675_v9 = vld [vmem:[%s5958_s5 + $0x74] sm:$0xf0]  ;;  %v450_v10 = vld [vmem:[%s4394_s19 + $0xc8] sm:$0xff] }
  0xed   : > { %6017 = vst [vmem:[#allocation20_spill] sm:$0xff] %v4506_v29  ;;  %783 = vmatmul.bf16.gmra.mxu1 %v4506_v29  ;;  %v3275_v29 = vor.u32 %v3675_v9, %v3274_v46  ;;  %v3674_v46 = vld [vmem:[%s5958_s5 + $0x64] sm:$0xf0] }
  0xee   : > { %6016 = vst [vmem:[#allocation19_spill] sm:$0xff] %v4503_v20  ;;  %734 = vmatmul.bf16.gmra.mxu0 %v4503_v20  ;;  %v4524_v20 = vpack.c.bf16 %v452_v16, %v450_v10  ;;  %v3682_v9 = vld [vmem:[%s5958_s5 + $0xe4] sm:$0xf0] }
  0xef   : > { %1177 = vmatpush.bf16.msrb.mxu0 %v3275_v29 }
  0xf0   : > { %6019 = vst [vmem:[#allocation22_spill] sm:$0xff] %v4524_v20 }
  0xf1   : > { %v4465_v27 = vpop.f32.mrf.mxu2 }
  0xf2   : > { %v4469_v31 = vpop.f32.mrf.mxu3 }
  0xf9   : > { %v976_v34 = vpop.f32.mrf.mxu2 }
  0xfa   : > { %v977_v35 = vadd.f32 %v4375_v11, %v976_v34  ;;  %v1025_v37 = vpop.f32.mrf.mxu3 }
  0xfc   : > { %v4476_v38 = vadd.f32 %v1025_v37, %v977_v35  ;;  %v449_v37 = vld [vmem:[%s4394_s19 + $0xc0] sm:$0xff] }
  0xfd   : > { %v4516_v55 = vpack.c.bf16 %v451_v45, %v449_v37  ;;  %v3683_v37 = vld [vmem:[%s5958_s5 + $0xf4] sm:$0xf0]  ;;  %v3270_v45 = vld [vmem:[%s5958_s5 + $0x60] sm:$0xf]  ;;  %788 = vmatmul.bf16.gmra.mxu1 %v4524_v20 }
  0xfe   : > { %v3271_v32 = vor.u32 %v3674_v46, %v3270_v45 }
  0xff   : > { %6018 = vst [vmem:[#allocation21_spill] sm:$0xff] %v4516_v55  ;;  %739 = vmatmul.bf16.gmra.mxu0 %v4516_v55 }
 0x100   : > { %1178 = vmatpush.bf16.msrb.mxu0 %v3271_v32  ;;  %v3262_v32 = vld [vmem:[%s5958_s5 + $0x40] sm:$0xf] }
 0x101   : > { %v4478_v41 = vpop.f32.mrf.mxu2 }
 0x102   : > { %v4480_v42 = vpop.f32.mrf.mxu3 }
 0x109   : > { %v4487_v49 = vpop.f32.mrf.mxu2 }
 0x10a   : > { %v4491_v56 = vpop.f32.mrf.mxu3 }
 0x111   : > { %v4496_v62 = vpop.f32.mrf.mxu2 }
 0x112   : > { %v4498_v63 = vpop.f32.mrf.mxu3  ;;  %v984_v46 = vadd.f32 %v4375_v11, %v4496_v62  ;;  %v3671_v62 = vld [vmem:[%s5958_s5 + $0x34] sm:$0xf0] }
 0x119   : > { %v986_v3 = vpop.f32.mrf.mxu2 }
 0x11a   : > { %v1035_v4 = vpop.f32.mrf.mxu3  ;;  %v987_v26 = vadd.f32 %v4375_v11, %v986_v3  ;;  %v3681_v3 = vld [vmem:[%s5958_s5 + $0xd4] sm:$0xf0] }
 0x121   : > { %v988_v17 = vpop.f32.mrf.mxu2 }
 0x122   : > { %v1037_v23 = vpop.f32.mrf.mxu3 }
 0x129   : > { %v991_v30 = vpop.f32.mrf.mxu2 }
 0x12a   : > { %v1040_v34 = vpop.f32.mrf.mxu3  ;;  %v992_v35 = vadd.f32 %v4375_v11, %v991_v30  ;;  %v3306_v30 = vld [vmem:[%s5958_s5 + $0xf0] sm:$0xf] }
 0x12b   : > { %v3307_v47 = vor.u32 %v3683_v37, %v3306_v30  ;;  %v989_v37 = vadd.f32 %v4375_v11, %v988_v17 }
 0x12c   : > { %v1041_v10 = vadd.f32 %v1040_v34, %v992_v35  ;;  %v3672_v35 = vld [vmem:[%s5958_s5 + $0x44] sm:$0xf0] }
 0x12d   : > { %1226 = vmatpush.bf16.msrb.mxu1 %v3307_v47  ;;  %v3298_v47 = vld [vmem:[%s5958_s5 + $0xd0] sm:$0xf]  ;;  %v1038_v17 = vadd.f32 %v1037_v23, %v989_v37  ;;  %v3263_v45 = vor.u32 %v3672_v35, %v3262_v32 }
 0x12e   : > { %v3299_v34 = vor.u32 %v3681_v3, %v3298_v47  ;;  %v1033_v47 = vadd.f32 %v4498_v63, %v984_v46  ;;  %v3290_v32 = vld [vmem:[%s5958_s5 + $0xb0] sm:$0xf]  ;;  %v3670_v63 = vld [vmem:[%s5958_s5 + $0x24] sm:$0xf0]  ;;  %v979_v46 = vadd.f32 %v4375_v11, %v4478_v41  ;;  %v3677_v41 = vld [vmem:[%s5958_s5 + $0x94] sm:$0xf0] }
 0x131   : > { %v993_v50 = vpop.f32.mrf.mxu2 }
 0x132   : > { %v994_v22 = vadd.f32 %v4375_v11, %v993_v50  ;;  %v1042_v61 = vpop.f32.mrf.mxu3  ;;  %v3302_v50 = vld [vmem:[%s5958_s5 + $0xe0] sm:$0xf] }
 0x133   : > { %v3303_v30 = vor.u32 %v3682_v9, %v3302_v50  ;;  %v982_v9 = vadd.f32 %v4375_v11, %v4487_v49  ;;  %v454_v49 = vld [vmem:[%s4394_s19 + $0xe8] sm:$0xff] }
 0x134   : > { %v1043_v16 = vadd.f32 %v1042_v61, %v994_v22  ;;  %v3673_v61 = vld [vmem:[%s5958_s5 + $0x54] sm:$0xf0]  ;;  %v1036_v22 = vadd.f32 %v1035_v4, %v987_v26  ;;  %v3258_v26 = vld [vmem:[%s5958_s5 + $0x30] sm:$0xf]  ;;  %v4583_v4 = vpop.f32.mrf.mxu1 }
 0x135   : > { %1227 = vmatpush.bf16.msrb.mxu1 %v3303_v30  ;;  %v3267_v29 = vor.u32 %v3673_v61, %v3266_v15  ;;  %v3294_v15 = vld [vmem:[%s5958_s5 + $0xc0] sm:$0xf]  ;;  %v455_v30 = vld [vmem:[%s4394_s19 + $0xf0] sm:$0xff]  ;;  %v456_v61 = vld [vmem:[%s4394_s19 + $0xf8] sm:$0xff] }
 0x136   : > { %v1298_v55 = vpack.c.bf16 %v1043_v16, %v1041_v10  ;;  %v1297_v50 = vpack.c.bf16 %v1038_v17, %v1036_v22  ;;  %v4576_v10 = vpop.f32.mrf.mxu0  ;;  %v453_v16 = vld [vmem:[%s4394_s19 + $0xe0] sm:$0xff]  ;;  %v4593_v3 = vpack.c.bf16 %v456_v61, %v454_v49  ;;  %v3679_v17 = vld [vmem:[%s5958_s5 + $0xb4] sm:$0xf0]  ;;  %v1031_v22 = vadd.f32 %v4491_v56, %v982_v9  ;;  %v3282_v9 = vld [vmem:[%s5958_s5 + $0x90] sm:$0xf]  ;;  %s3109_s19 = sshll.u32 %s407_s13, 8 }
 0x137   : > { %1179 = vmatpush.bf16.msrb.mxu0 %v3267_v29  ;;  %v4585_v37 = vpack.c.bf16 %v455_v30, %v453_v16  ;;  %v3259_v29 = vor.u32 %v3671_v62, %v3258_v26  ;;  %v3291_v35 = vor.u32 %v3679_v17, %v3290_v32  ;;  %v3250_v16 = vld [vmem:[%s5958_s5 + $0x10] sm:$0xf]  ;;  %v3669_v56 = vld [vmem:[%s5958_s5 + $0x14] sm:$0xf0]  ;;  %v3246_v26 = vld [vmem:[%s5958_s5] sm:$0xf]  ;;  %v1028_v49 = vadd.f32 %v4480_v42, %v979_v46 }
 0x138   : > { %1299 = vmatpush.bf16.xpose.msrb.mxu2 %v1298_v55  ;;  %v3680_v55 = vld [vmem:[%s5958_s5 + $0xc4] sm:$0xf0]  ;;  %6021 = vst [vmem:[#allocation24_spill] sm:$0xff] %v4593_v3  ;;  %793 = vmatmul.bf16.gmra.mxu1 %v4593_v3  ;;  %v3251_v30 = vor.u32 %v3669_v56, %v3250_v16  ;;  %v974_v42 = vadd.f32 %v4375_v11, %v4465_v27  ;;  %s5850_s12 = scalar_lea.vmem [#allocation2], %s3109_s19 }
 0x139   : > { %1228 = vmatpush.bf16.msrb.mxu1 %v3299_v34  ;;  %v3295_v23 = vor.u32 %v3680_v55, %v3294_v15  ;;  %6020 = vst [vmem:[#allocation23_spill] sm:$0xff] %v4585_v37  ;;  %v3254_v34 = vld [vmem:[%s5958_s5 + $0x20] sm:$0xf]  ;;  %744 = vmatmul.bf16.gmra.mxu0 %v4585_v37  ;;  %v3678_v55 = vld [vmem:[%s5958_s5 + $0xa4] sm:$0xf0]  ;;  %v969_v16 = vadd.f32 %v4375_v11, %v4448_v8  ;;  %s3016_s24 = sshll.u32 %s5850_s12, 4  ;;  %s3017_s24 = int_to_ptr.vmem [resolvable:$true] %s3016_s24 }
 0x13a   : > { %v3286_v15 = vld [vmem:[%s5958_s5 + $0xa0] sm:$0xf]  ;;  %v3668_v62 = vld [vmem:[%s5958_s5 + $0x4] sm:$0xf0]  ;;  %v1023_v46 = vadd.f32 %v4469_v31, %v974_v42  ;;  %v528_v31 = vld [vmem:[%s4647_s22 + $0x38] sm:$0xff] }
 0x13b   : > { %1180 = vmatpush.bf16.msrb.mxu0 %v3263_v45  ;;  %v3255_v45 = vor.u32 %v3670_v63, %v3254_v34  ;;  %v3676_v32 = vld [vmem:[%s5958_s5 + $0x84] sm:$0xf0]  ;;  %v3247_v34 = vor.u32 %v3668_v62, %v3246_v26  ;;  %v1295_v63 = vpack.c.bf16 %v1028_v49, %v4476_v38  ;;  %v964_v62 = vadd.f32 %v4375_v11, %v4431_v54  ;;  %v4684_v54 = vld [vmem:[%s5960_s7] ss:$0 sm:$0xff] }
 0x13c   : > { %v761_v17 = vpop.f32.mrf.mxu1  ;;  %v1294_v56 = vpack.c.bf16 %v1023_v46, %v4459_v21  ;;  %v526_v26 = vld [vmem:[%s4647_s22 + $0x28] sm:$0xff] }
 0x13d   : > { %1229 = vmatpush.bf16.msrb.mxu1 %v3295_v23  ;;  %v3287_v23 = vor.u32 %v3678_v55, %v3286_v15  ;;  %v521_v15 = vld [vmem:[%s4647_s22] sm:$0xff]  ;;  %v523_v55 = vld [vmem:[%s4647_s22 + $0x10] sm:$0xff]  ;;  %v4676_v8 = vpack.c.bf16 %v528_v31, %v526_v26  ;;  %v530_v46 = vld [vmem:[%s4647_s22 + $0x48] sm:$0xff] }
 0x13e   : > { %v712_v61 = vpop.f32.mrf.mxu0 }
 0x13f   : > { %1181 = vmatpush.bf16.msrb.mxu0 %v3259_v29  ;;  %v3278_v29 = vld [vmem:[%s5958_s5 + $0x80] sm:$0xf]  ;;  %6025 = vst [vmem:[#allocation28_spill] sm:$0xff] %v4676_v8 }
 0x140   : > { %1300 = vmatpush.bf16.xpose.msrb.mxu2 %v1297_v50  ;;  %v1296_v50 = vpack.c.bf16 %v1033_v47, %v1031_v22  ;;  %v3283_v47 = vor.u32 %v3677_v41, %v3282_v9  ;;  %v522_v22 = vld [vmem:[%s4647_s22 + $0x8] sm:$0xff]  ;;  %v1018_v9 = vadd.f32 %v4452_v14, %v969_v16  ;;  %v527_v41 = vld [vmem:[%s4647_s22 + $0x30] sm:$0xff]  ;;  %v1013_v14 = vadd.f32 %v4435_v57, %v964_v62  ;;  %v532_v16 = vld [vmem:[%s4647_s22 + $0x58] sm:$0xff] }
 0x141   : > { %1230 = vmatpush.bf16.msrb.mxu1 %v3291_v35  ;;  %v3279_v35 = vor.u32 %v3676_v32, %v3278_v29  ;;  %v711_v57 = vadd.f32 %v4684_v54, %v4576_v10 }
 0x142   : > { %v1293_v49 = vpack.c.bf16 %v1018_v9, %v4442_v2  ;;  %v959_v2 = vadd.f32 %v4375_v11, %v4414_v40  ;;  %v1292_v21 = vpack.c.bf16 %v1013_v14, %v4425_v48  ;;  %v4701_v48 = vpack.c.bf16 %v532_v16, %v530_v46  ;;  %v536_v14 = vld [vmem:[%s4647_s22 + $0x78] sm:$0xff]  ;;  %v538_v46 = vld [vmem:[%s4647_s22 + $0x88] sm:$0xff] }
 0x143   : > { %1182 = vmatpush.bf16.msrb.mxu0 %v3255_v45  ;;  %v4655_v45 = vpack.c.bf16 %v523_v55, %v521_v15  ;;  %v529_v15 = vld [vmem:[%s4647_s22 + $0x40] sm:$0xff]  ;;  %v531_v55 = vld [vmem:[%s4647_s22 + $0x50] sm:$0xff]  ;;  %v540_v16 = vld [vmem:[%s4647_s22 + $0x98] sm:$0xff] }
 0x144   : > { %v764_v38 = vpop.f32.mrf.mxu1  ;;  %v4699_v40 = vpack.c.bf16 %v531_v55, %v529_v15  ;;  %6027 = vst [vmem:[#allocation30_spill] sm:$0xff] %v4701_v48  ;;  %v537_v15 = vld [vmem:[%s4647_s22 + $0x80] sm:$0xff]  ;;  %v539_v55 = vld [vmem:[%s4647_s22 + $0x90] sm:$0xff] }
 0x145   : > { %1231 = vmatpush.bf16.msrb.mxu1 %v3287_v23  ;;  %6022 = vst [vmem:[#allocation25_spill] sm:$0xff] %v4655_v45  ;;  %v524_v23 = vld [vmem:[%s4647_s22 + $0x18] sm:$0xff] }
 0x146   : > { %v715_v27 = vpop.f32.mrf.mxu0  ;;  %6026 = vst [vmem:[#allocation29_spill] sm:$0xff] %v4699_v40 }
 0x147   : > { %1183 = vmatpush.bf16.msrb.mxu0 %v3251_v30  ;;  %v525_v30 = vld [vmem:[%s4647_s22 + $0x20] sm:$0xff] }
 0x148   : > { %1301 = vmatpush.bf16.xpose.msrb.mxu2 %v1296_v50  ;;  %v4659_v50 = vpack.c.bf16 %v524_v23, %v522_v22  ;;  %v4674_v32 = vpack.c.bf16 %v527_v41, %v525_v30  ;;  %v760_v22 = vadd.f32 %v4583_v4, %v711_v57  ;;  %v533_v30 = vld [vmem:[%s4647_s22 + $0x60] sm:$0xff]  ;;  %v535_v41 = vld [vmem:[%s4647_s22 + $0x70] sm:$0xff] }
 0x149   : > { %1232 = vmatpush.bf16.msrb.mxu1 %v3283_v47 }
 0x14a   : > { %6023 = vst [vmem:[#allocation26_spill] sm:$0xff] %v4659_v50  ;;  %v799_v10 = vmul.f32 0.088388346, %v760_v22 }
 0x14b   : > { %1184 = vmatpush.bf16.msrb.mxu0 %v3247_v34  ;;  %6024 = vst [vmem:[#allocation27_spill] sm:$0xff] %v4674_v32 }
 0x14c   : > { %v766_v29 = vpop.f32.mrf.mxu1 }
 0x14d   : > { %1233 = vmatpush.bf16.msrb.mxu1 %v3279_v35  ;;  %v713_v35 = vadd.f32 %v4684_v54, %v712_v61 }
 0x14e   : > { %1185 = vmatmul.bf16.vlgmr.msrb.gmra.mxu0 %v4655_v45  ;;  %v717_v47 = vpop.f32.mrf.mxu0 }
 0x14f   : > { %v762_v23 = vadd.f32 %v761_v17, %v713_v35  ;;  %v718_v17 = vadd.f32 %v4684_v54, %v717_v47 }
 0x150   : > { %1302 = vmatpush.bf16.xpose.msrb.mxu2 %v1295_v63  ;;  %1234 = vmatmul.bf16.vlgmr.msrb.gmra.mxu1 %v4659_v50  ;;  %v1008_v63 = vadd.f32 %v4418_v43, %v959_v2  ;;  %v4711_v2 = vpack.c.bf16 %v535_v41, %v533_v30  ;;  %v541_v41 = vld [vmem:[%s4647_s22 + $0xa0] sm:$0xff] }
 0x151   : > { %v800_v61 = vmul.f32 0.088388346, %v762_v23  ;;  %v767_v31 = vadd.f32 %v766_v29, %v718_v17 }
 0x152   : > { %v1291_v11 = vpack.c.bf16 %v1008_v63, %v4396_v28  ;;  %v716_v28 = vadd.f32 %v4684_v54, %v715_v27  ;;  %6028 = vst [vmem:[#allocation31_spill] sm:$0xff] %v4711_v2 }
 0x153   : > { %v1283_v4 = vpack.c.bf16 %v800_v61, %v799_v10  ;;  %v802_v27 = vmul.f32 0.088388346, %v767_v31  ;;  %v4723_v61 = vpack.c.bf16 %v539_v55, %v537_v15 }
 0x154   : > { %v769_v42 = vpop.f32.mrf.mxu1  ;;  %v765_v26 = vadd.f32 %v764_v38, %v716_v28 }
 0x155   : > { %6030 = vst [vmem:[#allocation33_spill] sm:$0xff] %v4723_v61 }
 0x156   : > { %v720_v34 = vpop.f32.mrf.mxu0  ;;  %v801_v57 = vmul.f32 0.088388346, %v765_v26  ;;  %v543_v26 = vld [vmem:[%s4647_s22 + $0xb0] sm:$0xff] }
 0x157   : > { %v721_v35 = vadd.f32 %v4684_v54, %v720_v34 }
 0x158   : > { %1303 = vmatpush.bf16.xpose.msrb.mxu2 %v1294_v56  ;;  %v1284_v47 = vpack.c.bf16 %v802_v27, %v801_v57  ;;  %v544_v57 = vld [vmem:[%s4647_s22 + $0xb8] sm:$0xff]  ;;  %v4735_v27 = vpack.c.bf16 %v543_v26, %v541_v41 }
 0x159   : > { %v770_v22 = vadd.f32 %v769_v42, %v721_v35 }
 0x15a   : > { %6032 = vst [vmem:[#allocation35_spill] sm:$0xff] %v4735_v27 }
 0x15b   : > { %v803_v28 = vmul.f32 0.088388346, %v770_v22 }
 0x15c   : > { %v771_v56 = vpop.f32.mrf.mxu1 }
 0x15e   : > { %1190 = vmatmul.bf16.gmra.mxu0 %v4674_v32  ;;  %v722_v43 = vpop.f32.mrf.mxu0 }
 0x15f   : > { %v723_v63 = vadd.f32 %v4684_v54, %v722_v43 }
 0x160   : > { %1304 = vmatpush.bf16.xpose.msrb.mxu2 %v1293_v49  ;;  %1239 = vmatmul.bf16.gmra.mxu1 %v4676_v8  ;;  %v534_v49 = vld [vmem:[%s4647_s22 + $0x68] sm:$0xff] }
 0x161   : > { %v772_v23 = vadd.f32 %v771_v56, %v723_v63 }
 0x163   : > { %v804_v34 = vmul.f32 0.088388346, %v772_v23 }
 0x164   : > { %v774_v62 = vpop.f32.mrf.mxu1 }
 0x165   : > { %v1285_v42 = vpack.c.bf16 %v804_v34, %v803_v28  ;;  %v547_v28 = vld [vmem:[%s4647_s22 + $0xd0] sm:$0xff]  ;;  %v546_v34 = vld [vmem:[%s4647_s22 + $0xc8] sm:$0xff] }
 0x166   : > { %v725_v9 = vpop.f32.mrf.mxu0 }
 0x167   : > { %v726_v56 = vadd.f32 %v4684_v54, %v725_v9 }
 0x168   : > { %1305 = vmatpush.bf16.xpose.msrb.mxu2 %v1292_v21  ;;  %v4713_v21 = vpack.c.bf16 %v536_v14, %v534_v49  ;;  %v542_v14 = vld [vmem:[%s4647_s22 + $0xa8] sm:$0xff] }
 0x169   : > { %v775_v31 = vadd.f32 %v774_v62, %v726_v56  ;;  %v4737_v35 = vpack.c.bf16 %v544_v57, %v542_v14 }
 0x16a   : > { %6029 = vst [vmem:[#allocation32_spill] sm:$0xff] %v4713_v21 }
 0x16b   : > { %6033 = vst [vmem:[#allocation36_spill] sm:$0xff] %v4737_v35  ;;  %v805_v63 = vmul.f32 0.088388346, %v775_v31 }
 0x16c   : > { %v776_v29 = vpop.f32.mrf.mxu1 }
 0x16e   : > { %1195 = vmatmul.bf16.gmra.mxu0 %v4699_v40  ;;  %v727_v38 = vpop.f32.mrf.mxu0 }
 0x16f   : > { %v728_v17 = vadd.f32 %v4684_v54, %v727_v38 }
 0x170   : > { %1306 = vmatpush.bf16.xpose.msrb.mxu2 %v1291_v11  ;;  %1244 = vmatmul.bf16.gmra.mxu1 %v4701_v48 }
 0x171   : > { %v777_v49 = vadd.f32 %v776_v29, %v728_v17 }
 0x173   : > { %v806_v9 = vmul.f32 0.088388346, %v777_v49 }
 0x174   : > { %v779_v10 = vpop.f32.mrf.mxu1 }
 0x175   : > { %v1286_v62 = vpack.c.bf16 %v806_v9, %v805_v63  ;;  %v549_v9 = vld [vmem:[%s4647_s22 + $0xe0] sm:$0xff] }
 0x176   : > { %v730_v11 = vpop.f32.mrf.mxu0 }
 0x177   : > { %1307 = vmatmul.bf16.vlgmr.msrb.gmra.mxu2 %v1283_v4  ;;  %v4725_v4 = vpack.c.bf16 %v540_v16, %v538_v46  ;;  %v731_v38 = vadd.f32 %v4684_v54, %v730_v11  ;;  %v545_v16 = vld [vmem:[%s4647_s22 + $0xc0] sm:$0xff] }
 0x178   : > { %v4747_v41 = vpack.c.bf16 %v547_v28, %v545_v16 }
 0x179   : > { %6031 = vst [vmem:[#allocation34_spill] sm:$0xff] %v4725_v4  ;;  %v780_v23 = vadd.f32 %v779_v10, %v731_v38  ;;  %v550_v38 = vld [vmem:[%s4647_s22 + $0xe8] sm:$0xff] }
 0x17a   : > { %6034 = vst [vmem:[#allocation37_spill] sm:$0xff] %v4747_v41 }
 0x17b   : > { %v807_v56 = vmul.f32 0.088388346, %v780_v23 }
 0x17c   : > { %v781_v30 = vpop.f32.mrf.mxu1 }
 0x17e   : > { %1200 = vmatmul.bf16.gmra.mxu0 %v4711_v2  ;;  %v732_v43 = vpop.f32.mrf.mxu0 }
 0x17f   : > { %v733_v29 = vadd.f32 %v4684_v54, %v732_v43 }
 0x180   : > { %1249 = vmatmul.bf16.gmra.mxu1 %v4713_v21 }
 0x181   : > { %v782_v46 = vadd.f32 %v781_v30, %v733_v29  ;;  %v552_v29 = vld [vmem:[%s4647_s22 + $0xf8] sm:$0xff] }
 0x183   : > { %v808_v17 = vmul.f32 0.088388346, %v782_v46 }
 0x184   : > { %v784_v15 = vpop.f32.mrf.mxu1 }
 0x185   : > { %v1287_v31 = vpack.c.bf16 %v808_v17, %v807_v56 }
 0x187   : > { %1312 = vmatmul.bf16.gmra.mxu2 %v1284_v47  ;;  %v735_v47 = vpop.f32.mrf.mxu0 }
 0x188   : > { %v736_v10 = vadd.f32 %v4684_v54, %v735_v47 }
 0x18a   : > { %v785_v57 = vadd.f32 %v784_v15, %v736_v10 }
 0x18c   : > { %v786_v22 = vpop.f32.mrf.mxu1  ;;  %v809_v23 = vmul.f32 0.088388346, %v785_v57 }
 0x18e   : > { %1205 = vmatmul.bf16.gmra.mxu0 %v4723_v61 }
 0x18f   : > { %v737_v55 = vpop.f32.mrf.mxu0 }
 0x190   : > { %1254 = vmatmul.bf16.gmra.mxu1 %v4725_v4  ;;  %v738_v30 = vadd.f32 %v4684_v54, %v737_v55 }
 0x192   : > { %v787_v63 = vadd.f32 %v786_v22, %v738_v30  ;;  %v4768_v22 = vld [vmem:[%s5962_s9] ss:$0 sm:$0xff] }
 0x194   : > { %v789_v43 = vpop.f32.mrf.mxu1  ;;  %v810_v46 = vmul.f32 0.088388346, %v787_v63 }
 0x196   : > { %v1288_v47 = vpack.c.bf16 %v810_v46, %v809_v23 }
 0x197   : > { %1317 = vmatmul.bf16.gmra.mxu2 %v1285_v42  ;;  %v548_v42 = vld [vmem:[%s4647_s22 + $0xd8] sm:$0xff]  ;;  %v740_v26 = vpop.f32.mrf.mxu0 }
 0x198   : > { %v4749_v11 = vpack.c.bf16 %v548_v42, %v546_v34  ;;  %v4761_v34 = vpack.c.bf16 %v552_v29, %v550_v38  ;;  %v741_v30 = vadd.f32 %v4684_v54, %v740_v26 }
 0x19a   : > { %6035 = vst [vmem:[#allocation38_spill] sm:$0xff] %v4749_v11 }
 0x19b   : > { %6037 = vst [vmem:[#allocation40_spill] sm:$0xff] %v4761_v34 }
 0x19c   : > { %v791_v14 = vpop.f32.mrf.mxu1 }
 0x19e   : > { %1210 = vmatmul.bf16.gmra.mxu0 %v4735_v27 }
 0x19f   : > { %v742_v49 = vpop.f32.mrf.mxu0 }
 0x1a0   : > { %1259 = vmatmul.bf16.gmra.mxu1 %v4737_v35  ;;  %v743_v57 = vadd.f32 %v4684_v54, %v742_v49 }
 0x1a2   : > { %v792_v38 = vadd.f32 %v791_v14, %v743_v57 }
 0x1a4   : > { %v812_v23 = vmul.f32 0.088388346, %v792_v38 }
 0x1a7   : > { %1322 = vmatmul.bf16.gmra.mxu2 %v1286_v62  ;;  %v551_v62 = vld [vmem:[%s4647_s22 + $0xf0] sm:$0xff]  ;;  %s3764_s22 = sshll.u32 %s4087_s21, 8 }
 0x1a8   : > { %v4759_v16 = vpack.c.bf16 %v551_v62, %v549_v9  ;;  %v790_v62 = vadd.f32 %v789_v43, %v741_v30  ;;  %s3015_s26 = scalar_lea.hbm %s5964_s11, %s3764_s22  ;;  %s3960_s22 = scalar_lea.hbm %s5964_s11, 512 }
 0x1a9   : > { %s3018_s21 = sshll.u32 %s3015_s26, 4  ;;  %s3019_s21 = int_to_ptr.hbm [resolvable:$true] %s3018_s21 }
 0x1aa   : > { %6036 = vst [vmem:[#allocation39_spill] sm:$0xff] %v4759_v16  ;;  %v811_v29 = vmul.f32 0.088388346, %v790_v62  ;;  %s3954_s30 = sshra.s32 %s3019_s21, 4  ;;  %s3955_s30 = int_to_ptr.hbm [resolvable:$true] %s3954_s30 }
 0x1ab   : > { %s3956_s14 = scalar_lea.hbm %s3955_s30, 256  ;;  %p3961_p0 = scmp.lt.s32.totalorder %s3955_s30, %s5964_s11 }
 0x1ac   : > { %p3957_p11 = scmp.ne.s32.totalorder %s3955_s30, %s3956_s14  ;;  %p3962_p1 = scmp.lt.s32.totalorder %s3960_s22, %s3956_s14 }
 0x1ae   : > { %1215 = vmatmul.bf16.gmra.mxu0 %v4747_v41  ;;  %p3958_p12 = pnand %p3957_p11, %p4104_p5  ;;  %p3963_p2 = por %p3962_p1, %p3961_p0 }
 0x1b0   : > { %1264 = vmatmul.bf16.gmra.mxu1 %v4749_v11  ;;  %p3959_p13 = pneg %p3958_p12 }
 0x1b2   : > { %p3964_p3 = pnand %p3963_p2, %p3959_p13 }
 0x1b5   : > { %v794_v42 = vpop.f32.mrf.mxu1 }
 0x1b6   : > { %v745_v28 = vpop.f32.mrf.mxu0 }
 0x1b7   : > { %1327 = vmatmul.bf16.gmra.mxu2 %v1287_v31  ;;  %v746_v26 = vadd.f32 %v4684_v54, %v745_v28 }
 0x1b9   : > { %v795_v43 = vadd.f32 %v794_v42, %v746_v26 }
 0x1bb   : > { %v813_v30 = vmul.f32 0.088388346, %v795_v43 }
 0x1bd   : > { %v796_v55 = vpop.f32.mrf.mxu1 }
 0x1be   : > { %1220 = vmatmul.bf16.gmra.mxu0 %v4759_v16  ;;  %v747_v15 = vpop.f32.mrf.mxu0 }
 0x1bf   : > { %v748_v49 = vadd.f32 %v4684_v54, %v747_v15 }
 0x1c0   : > { %1269 = vmatmul.bf16.gmra.mxu1 %v4761_v34 }
 0x1c1   : > { %v797_v14 = vadd.f32 %v796_v55, %v748_v49 }
 0x1c3   : > { %v814_v57 = vmul.f32 0.088388346, %v797_v14 }
 0x1c7   : > { %1332 = vmatmul.bf16.gmra.mxu2 %v1288_v47 }
 0x1cb   : > { %v1186_v56 = vpop.f32.mrf.mxu0 }
 0x1cc   : > { %v1187_v17 = vadd.f32 %v4768_v22, %v1186_v56 }
 0x1cd   : > { %v1235_v31 = vpop.f32.mrf.mxu1 }
 0x1ce   : > { %v4771_v10 = vadd.f32 %v1235_v31, %v1187_v17  ;;  %v1289_v17 = vpack.c.bf16 %v812_v23, %v811_v29  ;;  %v1290_v29 = vpack.c.bf16 %v814_v57, %v813_v30 }
 0x1d3   : > { %v4775_v63 = vpop.f32.mrf.mxu0 }
 0x1d5   : > { %v4777_v9 = vpop.f32.mrf.mxu1 }
 0x1d7   : > { %1337 = vmatmul.bf16.gmra.mxu2 %v1289_v17 }
 0x1db   : > { %v1191_v46 = vpop.f32.mrf.mxu0 }
 0x1dc   : > { %v1192_v47 = vadd.f32 %v4768_v22, %v1191_v46 }
 0x1dd   : > { %v1240_v34 = vpop.f32.mrf.mxu1 }
 0x1de   : > { %v4780_v56 = vadd.f32 %v1240_v34, %v1192_v47 }
 0x1e3   : > { %v4784_v31 = vpop.f32.mrf.mxu0 }
 0x1e5   : > { %v4786_v16 = vpop.f32.mrf.mxu1 }
 0x1e7   : > { %1342 = vmatmul.bf16.gmra.mxu2 %v1290_v29 }
 0x1eb   : > { %v1196_v62 = vpop.f32.mrf.mxu0 }
 0x1ec   : > { %v1197_v38 = vadd.f32 %v4768_v22, %v1196_v62 }
 0x1ed   : > { %v1245_v46 = vpop.f32.mrf.mxu1 }
 0x1ee   : > { %v4789_v34 = vadd.f32 %v1245_v46, %v1197_v38 }
 0x1f3   : > { %v4791_v23 = vpop.f32.mrf.mxu0 }
 0x1f5   : > { %v4793_v28 = vpop.f32.mrf.mxu1 }
 0x1fa   : > { %v4795_v54 = vpop.f32.mrf.mxu2 }
 0x1fb   : > { %1348 = vmax.xlane.f32.xlu0 %v4795_v54  ;;  %v1201_v42 = vpop.f32.mrf.mxu0 }
 0x1fc   : > { %v1202_v15 = vadd.f32 %v4768_v22, %v1201_v42 }
 0x1fd   : > { %v1250_v55 = vpop.f32.mrf.mxu1 }
 0x1fe   : > { %v4802_v17 = vadd.f32 %v1250_v55, %v1202_v15 }
 0x202   : > { %v4799_v47 = vpop.f32.mrf.mxu2 }
 0x203   : > { %1350 = vmax.xlane.f32.xlu0 %v4799_v47  ;;  %v1203_v26 = vpop.f32.mrf.mxu0 }
 0x205   : > { %v1252_v49 = vpop.f32.mrf.mxu1 }
 0x20a   : > { %v4804_v43 = vpop.f32.mrf.mxu2 }
 0x20b   : > { %1352 = vmax.xlane.f32.xlu1 %v4804_v43  ;;  %v1206_v14 = vpop.f32.mrf.mxu0 }
 0x20c   : > { %v1207_v30 = vadd.f32 %v4768_v22, %v1206_v14 }
 0x20d   : > { %v1255_v57 = vpop.f32.mrf.mxu1 }
 0x20e   : > { %v1256_v38 = vadd.f32 %v1255_v57, %v1207_v30 }
 0x212   : > { %v4808_v62 = vpop.f32.mrf.mxu2 }
 0x213   : > { %1354 = vmax.xlane.f32.xlu1 %v4808_v62  ;;  %v1208_v46 = vpop.f32.mrf.mxu0 }
 0x215   : > { %v1257_v29 = vpop.f32.mrf.mxu1 }
 0x21a   : > { %v4811_v42 = vpop.f32.mrf.mxu2 }
 0x21b   : > { %1356 = vmax.xlane.f32.xlu2 %v4811_v42  ;;  %v1211_v15 = vpop.f32.mrf.mxu0 }
 0x21c   : > { %v1212_v5 = vadd.f32 %v4768_v22, %v1211_v15 }
 0x21d   : > { %v1260_v55 = vpop.f32.mrf.mxu1 }
 0x21e   : > { %v1261_v36 = vadd.f32 %v1260_v55, %v1212_v5 }
 0x222   : > { %v4814_v11 = vpop.f32.mrf.mxu2 }
 0x223   : > { %1358 = vmax.xlane.f32.xlu2 %v4814_v11  ;;  %v1213_v41 = vpop.f32.mrf.mxu0 }
 0x224   : > { %v1214_v60 = vadd.f32 %v4768_v22, %v1213_v41 }
 0x225   : > { %v1262_v14 = vpop.f32.mrf.mxu1 }
 0x22a   : > { %v4817_v35 = vpop.f32.mrf.mxu2 }
 0x22b   : > { %1360 = vmax.xlane.f32.xlu0 %v4817_v35  ;;  %v1216_v27 = vpop.f32.mrf.mxu0 }
 0x22c   : > { %v1217_v3 = vadd.f32 %v4768_v22, %v1216_v27 }
 0x22d   : > { %v1265_v30 = vpop.f32.mrf.mxu1 }
 0x22e   : > { %v1266_v44 = vadd.f32 %v1265_v30, %v1217_v3 }
 0x232   : > { %v4820_v57 = vpop.f32.mrf.mxu2 }
 0x233   : > { %1362 = vmax.xlane.f32.xlu1 %v4820_v57  ;;  %v1218_v4 = vpop.f32.mrf.mxu0 }
 0x234   : > { %v1219_v37 = vadd.f32 %v4768_v22, %v1218_v4 }
 0x235   : > { %v1267_v61 = vpop.f32.mrf.mxu1 }
 0x236   : > { %v1268_v39 = vadd.f32 %v1267_v61, %v1219_v37 }
 0x23a   : > { %v4823_v21 = vpop.f32.mrf.mxu2 }
 0x23b   : > { %1364 = vmax.xlane.f32.xlu1 %v4823_v21  ;;  %v1221_v2 = vpop.f32.mrf.mxu0 }
 0x23c   : > { %v1222_v40 = vadd.f32 %v4768_v22, %v1221_v2  ;;  %v1263_v2 = vadd.f32 %v1262_v14, %v1214_v60 }
 0x23d   : > { %v1270_v48 = vpop.f32.mrf.mxu1 }
 0x23e   : > { %v1271_v32 = vadd.f32 %v1270_v48, %v1222_v40  ;;  %v1209_v40 = vadd.f32 %v4768_v22, %v1208_v46  ;;  %v1281_v48 = vpack.c.bf16 %v1268_v39, %v1266_v44  ;;  %v1280_v27 = vpack.c.bf16 %v1263_v2, %v1261_v36 }
 0x23f   : > { %v1189_v36 = vadd.f32 %v4768_v22, %v4775_v63 }
 0x240   : > { %v1258_v25 = vadd.f32 %v1257_v29, %v1209_v40 }
 0x242   : > { %v4848_v41 = vpop.f32.mrf.mxu2 }
 0x243   : > { %v1223_v8 = vpop.f32.mrf.mxu0 }
 0x244   : > { %v1224_v50 = vadd.f32 %v4768_v22, %v1223_v8  ;;  %v1204_v8 = vadd.f32 %v4768_v22, %v1203_v26 }
 0x245   : > { %v1272_v45 = vpop.f32.mrf.mxu1 }
 0x246   : > { %v1273_v20 = vadd.f32 %v1272_v45, %v1224_v50  ;;  %v1253_v4 = vadd.f32 %v1252_v49, %v1204_v8  ;;  %v1199_v45 = vadd.f32 %v4768_v22, %v4791_v23  ;;  %v1279_v50 = vpack.c.bf16 %v1258_v25, %v1256_v38 }
 0x247   : > { %v1238_v25 = vadd.f32 %v4777_v9, %v1189_v36 }
 0x248   : > { %v1282_v51 = vpack.c.bf16 %v1273_v20, %v1271_v32  ;;  %v1194_v20 = vadd.f32 %v4768_v22, %v4784_v31  ;;  %v1248_v60 = vadd.f32 %v4793_v28, %v1199_v45 }
 0x249   : > { %v1275_v37 = vpack.c.bf16 %v1238_v25, %v4771_v10 }
 0x24a   : > { %1500 = vmatpush.bf16.msrb.mxu3 %v1282_v51  ;;  %v1278_v51 = vpack.c.bf16 %v1253_v4, %v4802_v17  ;;  %v1243_v39 = vadd.f32 %v4786_v16, %v1194_v20  ;;  %v1277_v44 = vpack.c.bf16 %v1248_v60, %v4789_v34 }
 0x24c   : > { %v1276_v5 = vpack.c.bf16 %v1243_v39, %v4780_v56  ;;  %v4854_v56 = vpop.f32.mrf.mxu2 }
 0x24e   : > { %1501 = vmatpush.bf16.msrb.mxu3 %v1281_v48 }
 0x252   : > { %1502 = vmatpush.bf16.msrb.mxu3 %v1280_v27 }
 0x254   : > { %v4864_v17 = vpop.f32.mrf.mxu2 }
 0x256   : > { %1503 = vmatpush.bf16.msrb.mxu3 %v1279_v50 }
 0x25a   : > { %1504 = vmatpush.bf16.msrb.mxu3 %v1278_v51 }
 0x25e   : > { %1505 = vmatpush.bf16.msrb.mxu3 %v1277_v44 }
 0x262   : > { %1506 = vmatpush.bf16.msrb.mxu3 %v1276_v5 }
 0x266   : > { %1507 = vmatpush.bf16.msrb.mxu3 %v1275_v37 }
 0x26e   : > { %v1349_v3 = vpop.xlane.xlu0 %1348 }
 0x26f   : > { %v1380_v32 = vsub.f32 %v4795_v54, %v1349_v3 }
 0x271   : > { %v1396_v61 = vmul.f32 1.442695, %v1380_v32 }
 0x273   : > { %3812 = vpow2.f32 %v1396_v61 }
 0x276   : > { %v1351_v16 = vpop.xlane.xlu0 %1350 }
 0x277   : > { %v1381_v22 = vsub.f32 %v4799_v47, %v1351_v16 }
 0x279   : > { %v4851_v63 = vpop.eup %3812  ;;  %v1398_v31 = vmul.f32 1.442695, %v1381_v22 }
 0x27a   : > { %1428 = vadd.xlane.f32.xlu2 %v4851_v63 }
 0x27b   : > { %3814 = vpow2.f32 %v1398_v31 }
 0x27e   : > { %v1353_v9 = vpop.xlane.xlu1 %1352 }
 0x27f   : > { %v1382_v10 = vsub.f32 %v4804_v43, %v1353_v9 }
 0x281   : > { %v4857_v34 = vpop.eup %3814  ;;  %v1400_v23 = vmul.f32 1.442695, %v1382_v10 }
 0x282   : > { %1430 = vadd.xlane.f32.xlu0 %v4857_v34  ;;  %1366 = vmax.xlane.f32.xlu2 %v4848_v41 }
 0x283   : > { %3816 = vpow2.f32 %v1400_v23 }
 0x286   : > { %v1355_v28 = vpop.xlane.xlu1 %1354 }
 0x287   : > { %v1383_v54 = vsub.f32 %v4808_v62, %v1355_v28  ;;  %v4873_v62 = vpop.f32.mrf.mxu2 }
 0x289   : > { %v4862_v47 = vpop.eup %3816  ;;  %v1402_v26 = vmul.f32 1.442695, %v1383_v54 }
 0x28a   : > { %1432 = vadd.xlane.f32.xlu0 %v4862_v47  ;;  %1368 = vmax.xlane.f32.xlu2 %v4854_v56 }
 0x28b   : > { %3818 = vpow2.f32 %v1402_v26 }
 0x28e   : > { %v1357_v49 = vpop.xlane.xlu2 %1356 }
 0x28f   : > { %v1384_v43 = vsub.f32 %v4811_v42, %v1357_v49  ;;  %v4880_v42 = vpop.f32.mrf.mxu2 }
 0x291   : > { %v4869_v38 = vpop.eup %3818  ;;  %v1404_v46 = vmul.f32 1.442695, %v1384_v43 }
 0x292   : > { %1434 = vadd.xlane.f32.xlu1 %v4869_v38  ;;  %1370 = vmax.xlane.f32.xlu0 %v4864_v17 }
 0x293   : > { %3820 = vpow2.f32 %v1404_v46 }
 0x296   : > { %v1359_v29 = vpop.xlane.xlu2 %1358 }
 0x297   : > { %v1385_v15 = vsub.f32 %v4814_v11, %v1359_v29  ;;  %v4887_v8 = vpop.f32.mrf.mxu2 }
 0x299   : > { %v4876_v55 = vpop.eup %3820  ;;  %v1406_v14 = vmul.f32 1.442695, %v1385_v15 }
 0x29a   : > { %1436 = vadd.xlane.f32.xlu1 %v4876_v55  ;;  %1372 = vmax.xlane.f32.xlu0 %v4873_v62 }
 0x29b   : > { %3822 = vpow2.f32 %v1406_v14 }
 0x29e   : > { %v1361_v30 = vpop.xlane.xlu0 %1360 }
 0x29f   : > { %v1386_v2 = vsub.f32 %v4817_v35, %v1361_v30  ;;  %v4897_v51 = vpop.f32.mrf.mxu2 }
 0x2a1   : > { %v4883_v40 = vpop.eup %3822  ;;  %v1408_v48 = vmul.f32 1.442695, %v1386_v2 }
 0x2a2   : > { %1438 = vadd.xlane.f32.xlu2 %v4883_v40  ;;  %1374 = vmax.xlane.f32.xlu1 %v4880_v42 }
 0x2a3   : > { %3824 = vpow2.f32 %v1408_v48 }
 0x2a6   : > { %v1363_v11 = vpop.xlane.xlu1 %1362 }
 0x2a7   : > { %v1387_v27 = vsub.f32 %v4820_v57, %v1363_v11 }
 0x2a9   : > { %v4890_v4 = vpop.eup %3824  ;;  %v1410_v45 = vmul.f32 1.442695, %v1387_v27 }
 0x2aa   : > { %1440 = vadd.xlane.f32.xlu2 %v4890_v4  ;;  %1376 = vmax.xlane.f32.xlu1 %v4887_v8 }
 0x2ab   : > { %3826 = vpow2.f32 %v1410_v45 }
 0x2ae   : > { %v1365_v35 = vpop.xlane.xlu1 %1364 }
 0x2af   : > { %v1388_v50 = vsub.f32 %v4823_v21, %v1365_v35 }
 0x2b1   : > { %v4895_v20 = vpop.eup %3826  ;;  %v1412_v60 = vmul.f32 1.442695, %v1388_v50 }
 0x2b2   : > { %1442 = vadd.xlane.f32.xlu0 %v4895_v20  ;;  %1378 = vmax.xlane.f32.xlu2 %v4897_v51 }
 0x2b3   : > { %3828 = vpow2.f32 %v1412_v60 }
 0x2b9   : > { %v4901_v57 = vpop.eup %3828 }
 0x2ba   : > { %1444 = vadd.xlane.f32.xlu0 %v4901_v57 }
 0x2ed   : > { %v1429_v39 = vpop.xlane.xlu2 %1428 }
 0x2ee   : > { %3830 = vrcp.f32 %v1429_v39 }
 0x2f4   : > { %v3831_v25 = vpop.eup %3830 }
 0x2f5   : > { %v1431_v36 = vpop.xlane.xlu0 %1430  ;;  %v1367_v44 = vpop.xlane.xlu2 %1366  ;;  %v1476_v61 = vmul.f32 %v3831_v25, %v4851_v63 }
 0x2f6   : > { %3832 = vrcp.f32 %v1431_v36  ;;  %v1389_v21 = vsub.f32 %v4848_v41, %v1367_v44 }
 0x2f8   : > { %v1414_v5 = vmul.f32 1.442695, %v1389_v21 }
 0x2fa   : > { %3834 = vpow2.f32 %v1414_v5 }
 0x2fc   : > { %v3833_v37 = vpop.eup %3832 }
 0x2fd   : > { %v1433_v3 = vpop.xlane.xlu0 %1432  ;;  %v1369_v32 = vpop.xlane.xlu2 %1368  ;;  %v1477_v16 = vmul.f32 %v3833_v37, %v4857_v34 }
 0x2fe   : > { %v1390_v22 = vsub.f32 %v4854_v56, %v1369_v32 }
 0x2ff   : > { %v1492_v31 = vpack.c.bf16 %v1477_v16, %v1476_v61  ;;  %v3723_v16 = vld [vmem:[%s5957_s4 + $0x78] sm:$0xf0] }
 0x300   : > { %v4908_v9 = vpop.eup %3834  ;;  %v1416_v10 = vmul.f32 1.442695, %v1390_v22 }
 0x301   : > { %1508 = vmatmul.bf16.vlgmr.msrb.gmra.mxu3 %v1492_v31  ;;  %1446 = vadd.xlane.f32.xlu1 %v4908_v9 }
 0x302   : > { %3836 = vpow2.f32 %v1416_v10  ;;  %v3398_v10 = vld [vmem:[%s5957_s4 + $0x64] sm:$0xf] }
 0x303   : > { %3838 = vrcp.f32 %v1433_v3 }
 0x305   : > { %v1435_v41 = vpop.xlane.xlu1 %1434  ;;  %v1371_v23 = vpop.xlane.xlu0 %1370 }
 0x306   : > { %3840 = vrcp.f32 %v1435_v41  ;;  %v1391_v28 = vsub.f32 %v4864_v17, %v1371_v23  ;;  %v3722_v41 = vld [vmem:[%s5957_s4 + $0x68] sm:$0xf0] }
 0x307   : > { %v3399_v23 = vor.u32 %v3722_v41, %v3398_v10  ;;  %v3716_v10 = vld [vmem:[%s5957_s4 + $0x8] sm:$0xf0] }
 0x308   : > { %v4912_v54 = vpop.eup %3836  ;;  %v1418_v63 = vmul.f32 1.442695, %v1391_v28 }
 0x309   : > { %1448 = vadd.xlane.f32.xlu2 %v4912_v54  ;;  %v3839_v56 = vpop.eup %3838 }
 0x30a   : > { %3842 = vpow2.f32 %v1418_v63  ;;  %v1478_v43 = vmul.f32 %v3839_v56, %v4862_v47  ;;  %v3430_v63 = vld [vmem:[%s5957_s4 + $0xe4] sm:$0xf]  ;;  %v3730_v56 = vld [vmem:[%s5957_s4 + $0xe8] sm:$0xf0] }
 0x30c   : > { %v3841_v34 = vpop.eup %3840 }
 0x30d   : > { %v1437_v26 = vpop.xlane.xlu1 %1436  ;;  %v1373_v49 = vpop.xlane.xlu0 %1372  ;;  %v1479_v46 = vmul.f32 %v3841_v34, %v4869_v38  ;;  %v3431_v34 = vor.u32 %v3730_v56, %v3430_v63 }
 0x30e   : > { %v1392_v29 = vsub.f32 %v4873_v62, %v1373_v49 }
 0x30f   : > { %v1493_v15 = vpack.c.bf16 %v1479_v46, %v1478_v43 }
 0x310   : > { %v4918_v14 = vpop.eup %3842  ;;  %v1420_v17 = vmul.f32 1.442695, %v1392_v29 }
 0x311   : > { %1513 = vmatmul.bf16.gmra.mxu3 %v1493_v15  ;;  %1450 = vadd.xlane.f32.xlu0 %v4918_v14  ;;  %v3394_v15 = vld [vmem:[%s5957_s4 + $0x54] sm:$0xf] }
 0x312   : > { %3844 = vpow2.f32 %v1420_v17  ;;  %v3721_v17 = vld [vmem:[%s5957_s4 + $0x58] sm:$0xf0] }
 0x313   : > { %3846 = vrcp.f32 %v1437_v26 }
 0x315   : > { %v1439_v30 = vpop.xlane.xlu2 %1438  ;;  %v1375_v2 = vpop.xlane.xlu1 %1374 }
 0x316   : > { %3848 = vrcp.f32 %v1439_v30  ;;  %v1393_v48 = vsub.f32 %v4880_v42, %v1375_v2  ;;  %v3395_v2 = vor.u32 %v3721_v17, %v3394_v15  ;;  %v3724_v15 = vld [vmem:[%s5957_s4 + $0x88] sm:$0xf0] }
 0x318   : > { %v4922_v11 = vpop.eup %3844  ;;  %v1422_v47 = vmul.f32 1.442695, %v1393_v48 }
 0x319   : > { %1452 = vadd.xlane.f32.xlu1 %v4922_v11  ;;  %v3847_v38 = vpop.eup %3846 }
 0x31a   : > { %3850 = vpow2.f32 %v1422_v47  ;;  %v1480_v35 = vmul.f32 %v3847_v38, %v4876_v55  ;;  %v3426_v47 = vld [vmem:[%s5957_s4 + $0xd4] sm:$0xf] }
 0x31c   : > { %v3849_v62 = vpop.eup %3848 }
 0x31d   : > { %v1441_v27 = vpop.xlane.xlu2 %1440  ;;  %v1377_v45 = vpop.xlane.xlu1 %1376  ;;  %v1481_v50 = vmul.f32 %v3849_v62, %v4883_v40  ;;  %v3720_v62 = vld [vmem:[%s5957_s4 + $0x48] sm:$0xf0] }
 0x31e   : > { %v1394_v60 = vsub.f32 %v4887_v8, %v1377_v45 }
 0x31f   : > { %v1494_v39 = vpack.c.bf16 %v1481_v50, %v1480_v35  ;;  %v3386_v35 = vld [vmem:[%s5957_s4 + $0x34] sm:$0xf]  ;;  %v3719_v50 = vld [vmem:[%s5957_s4 + $0x38] sm:$0xf0] }
 0x320   : > { %v4928_v36 = vpop.eup %3850  ;;  %v1424_v42 = vmul.f32 1.442695, %v1394_v60  ;;  %v3382_v60 = vld [vmem:[%s5957_s4 + $0x24] sm:$0xf] }
 0x321   : > { %1518 = vmatmul.bf16.gmra.mxu3 %v1494_v39  ;;  %1454 = vadd.xlane.f32.xlu2 %v4928_v36  ;;  %v3387_v39 = vor.u32 %v3719_v50, %v3386_v35  ;;  %v3334_v35 = vld [vmem:[%s5956_s3 + $0x64] sm:$0xf]  ;;  %v3706_v50 = vld [vmem:[%s5956_s3 + $0x68] sm:$0xf0] }
 0x322   : > { %3852 = vpow2.f32 %v1424_v42  ;;  %v3718_v42 = vld [vmem:[%s5957_s4 + $0x28] sm:$0xf0] }
 0x323   : > { %3854 = vrcp.f32 %v1441_v27 }
 0x325   : > { %v1443_v44 = vpop.xlane.xlu0 %1442  ;;  %v1379_v21 = vpop.xlane.xlu2 %1378 }
 0x326   : > { %3856 = vrcp.f32 %v1443_v44  ;;  %v1395_v5 = vsub.f32 %v4897_v51, %v1379_v21  ;;  %v3402_v51 = vld [vmem:[%s5957_s4 + $0x74] sm:$0xf]  ;;  %v3383_v44 = vor.u32 %v3718_v42, %v3382_v60  ;;  %v3335_v60 = vor.u32 %v3706_v50, %v3334_v35  ;;  %v3342_v50 = vld [vmem:[%s5956_s3 + $0x84] sm:$0xf] }
 0x327   : > { %v3403_v22 = vor.u32 %v3723_v16, %v3402_v51  ;;  %v3717_v51 = vld [vmem:[%s5957_s4 + $0x18] sm:$0xf0] }
 0x328   : > { %v4932_v25 = vpop.eup %3852  ;;  %v1426_v55 = vmul.f32 1.442695, %v1395_v5 }
 0x329   : > { %1456 = vadd.xlane.f32.xlu0 %v4932_v25  ;;  %v3855_v40 = vpop.eup %3854  ;;  %1951 = vmatpush.bf16.msra.mxu2 %v3403_v22 }
 0x32a   : > { %3858 = vpow2.f32 %v1426_v55  ;;  %v1482_v37 = vmul.f32 %v3855_v40, %v4890_v4  ;;  %v3434_v4 = vld [vmem:[%s5957_s4 + $0xf4] sm:$0xf]  ;;  %v3422_v55 = vld [vmem:[%s5957_s4 + $0xc4] sm:$0xf]  ;;  %v3728_v40 = vld [vmem:[%s5957_s4 + $0xc8] sm:$0xf0] }
 0x32c   : > { %v3857_v8 = vpop.eup %3856 }
 0x32d   : > { %v1483_v3 = vmul.f32 %v3857_v8, %v4895_v20  ;;  %v3731_v20 = vld [vmem:[%s5957_s4 + $0xf8] sm:$0xf0]  ;;  %v1445_v28 = vpop.xlane.xlu0 %1444  ;;  %1952 = vmatpush.bf16.msra.mxu2 %v3399_v23  ;;  %v3414_v23 = vld [vmem:[%s5957_s4 + $0xa4] sm:$0xf] }
 0x32e   : > { %v3435_v31 = vor.u32 %v3731_v20, %v3434_v4  ;;  %3860 = vrcp.f32 %v1445_v28  ;;  %v3418_v4 = vld [vmem:[%s5957_s4 + $0xb4] sm:$0xf]  ;;  %v3726_v28 = vld [vmem:[%s5957_s4 + $0xa8] sm:$0xf0] }
 0x32f   : > { %v1495_v32 = vpack.c.bf16 %v1483_v3, %v1482_v37  ;;  %v3423_v3 = vor.u32 %v3728_v40, %v3422_v55  ;;  %v3415_v56 = vor.u32 %v3726_v28, %v3414_v23  ;;  %v3712_v23 = vld [vmem:[%s5956_s3 + $0xc8] sm:$0xf0] }
 0x330   : > { %v4937_v61 = vpop.eup %3858  ;;  %2000 = vmatpush.bf16.msra.mxu3 %v3435_v31  ;;  %v3374_v31 = vld [vmem:[%s5957_s4 + $0x4] sm:$0xf] }
 0x331   : > { %1523 = vmatmul.bf16.gmra.mxu3 %v1495_v32  ;;  %1458 = vadd.xlane.f32.xlu1 %v4937_v61  ;;  %v3378_v32 = vld [vmem:[%s5957_s4 + $0x14] sm:$0xf]  ;;  %v3375_v41 = vor.u32 %v3716_v10, %v3374_v31 }
 0x332   : > { %1953 = vmatpush.bf16.msra.mxu2 %v3395_v2  ;;  %v3379_v22 = vor.u32 %v3717_v51, %v3378_v32  ;;  %v6039_v51 = vld [vmem:[#allocation8_spill] sm:$0xff] }
 0x334   : > { %2001 = vmatpush.bf16.msra.mxu3 %v3431_v34  ;;  %v3861_v49 = vpop.eup %3860  ;;  %v3410_v34 = vld [vmem:[%s5957_s4 + $0x94] sm:$0xf] }
 0x335   : > { %v1484_v46 = vmul.f32 %v3861_v49, %v4901_v57  ;;  %v3729_v57 = vld [vmem:[%s5957_s4 + $0xd8] sm:$0xf0] }
 0x336   : > { %v3427_v38 = vor.u32 %v3729_v57, %v3426_v47 }
 0x338   : > { %2002 = vmatpush.bf16.msra.mxu3 %v3427_v38 }
 0x33c   : > { %2003 = vmatpush.bf16.msra.mxu3 %v3423_v3  ;;  %v3705_v3 = vld [vmem:[%s5956_s3 + $0x58] sm:$0xf0] }
 0x374   : > { %v1447_v26 = vpop.xlane.xlu1 %1446 }
 0x375   : > { %3862 = vrcp.f32 %v1447_v26  ;;  %v3725_v26 = vld [vmem:[%s5957_s4 + $0x98] sm:$0xf0] }
 0x376   : > { %v3411_v49 = vor.u32 %v3725_v26, %v3410_v34  ;;  %v3354_v26 = vld [vmem:[%s5956_s3 + $0xb4] sm:$0xf] }
 0x37b   : > { %v3863_v43 = vpop.eup %3862 }
 0x37c   : > { %v1485_v29 = vmul.f32 %v3863_v43, %v4908_v9  ;;  %v1449_v48 = vpop.xlane.xlu2 %1448  ;;  %v3390_v9 = vld [vmem:[%s5957_s4 + $0x44] sm:$0xf] }
 0x37d   : > { %v3391_v27 = vor.u32 %v3720_v62, %v3390_v9  ;;  %3864 = vrcp.f32 %v1449_v48 }
 0x37e   : > { %v1496_v30 = vpack.c.bf16 %v1485_v29, %v1484_v46  ;;  %v3406_v29 = vld [vmem:[%s5957_s4 + $0x84] sm:$0xf] }
 0x37f   : > { %1954 = vmatpush.bf16.msra.mxu2 %v3391_v27  ;;  %v3407_v2 = vor.u32 %v3724_v15, %v3406_v29  ;;  %v5157_v29 = vld [vmem:[%s5961_s8 + $0x1] ss:$0 sm:$0xff]  ;;  %v3318_v15 = vld [vmem:[%s5956_s3 + $0x24] sm:$0xf] }
 0x380   : > { %1528 = vmatmul.bf16.gmra.mxu3 %v1496_v30 }
 0x383   : > { %1955 = vmatpush.bf16.msra.mxu2 %v3387_v39  ;;  %v3865_v21 = vpop.eup %3864  ;;  %v6038_v39 = vld [vmem:[#allocation7_spill] sm:$0xff] }
 0x384   : > { %v1451_v45 = vpop.xlane.xlu0 %1450  ;;  %v1486_v8 = vmul.f32 %v3865_v21, %v4912_v54  ;;  %v3727_v54 = vld [vmem:[%s5957_s4 + $0xb8] sm:$0xf0]  ;;  %v3366_v21 = vld [vmem:[%s5956_s3 + $0xe4] sm:$0xf] }
 0x385   : > { %3866 = vrcp.f32 %v1451_v45  ;;  %v3419_v20 = vor.u32 %v3727_v54, %v3418_v4 }
 0x387   : > { %1956 = vmatpush.bf16.msra.mxu2 %v3383_v44  ;;  %2004 = vmatpush.bf16.msra.mxu3 %v3419_v20  ;;  %v3704_v20 = vld [vmem:[%s5956_s3 + $0x48] sm:$0xf0] }
 0x38b   : > { %v3867_v5 = vpop.eup %3866  ;;  %1957 = vmatpush.bf16.msra.mxu2 %v3379_v22  ;;  %2005 = vmatpush.bf16.msra.mxu3 %v3415_v56  ;;  %v3713_v22 = vld [vmem:[%s5956_s3 + $0xd8] sm:$0xf0] }
 0x38c   : > { %v1487_v37 = vmul.f32 %v3867_v5, %v4918_v14  ;;  %v1453_v14 = vpop.xlane.xlu1 %1452  ;;  %v3714_v5 = vld [vmem:[%s5956_s3 + $0xe8] sm:$0xf0]  ;;  %v3703_v56 = vld [vmem:[%s5956_s3 + $0x38] sm:$0xf0] }
 0x38d   : > { %3868 = vrcp.f32 %v1453_v14  ;;  %v3367_v55 = vor.u32 %v3714_v5, %v3366_v21  ;;  %v3326_v14 = vld [vmem:[%s5956_s3 + $0x44] sm:$0xf]  ;;  %v6040_v21 = vld [vmem:[#allocation9_spill] sm:$0xff] }
 0x38e   : > { %v1497_v16 = vpack.c.bf16 %v1487_v37, %v1486_v8  ;;  %v3330_v37 = vld [vmem:[%s5956_s3 + $0x54] sm:$0xf]  ;;  %v3327_v10 = vor.u32 %v3704_v20, %v3326_v14 }
 0x38f   : > { %1958 = vmatpush.bf16.msra.mxu2 %v3375_v41  ;;  %2006 = vmatpush.bf16.msra.mxu3 %v3411_v49  ;;  %v3331_v32 = vor.u32 %v3705_v3, %v3330_v37  ;;  %v3358_v41 = vld [vmem:[%s5956_s3 + $0xc4] sm:$0xf]  ;;  %v3711_v49 = vld [vmem:[%s5956_s3 + $0xb8] sm:$0xf0] }
 0x390   : > { %1533 = vmatmul.bf16.gmra.mxu3 %v1497_v16  ;;  %v3362_v16 = vld [vmem:[%s5956_s3 + $0xd4] sm:$0xf]  ;;  %v3359_v28 = vor.u32 %v3712_v23, %v3358_v41 }
 0x391   : > { %v3363_v54 = vor.u32 %v3713_v22, %v3362_v16  ;;  %v6042_v16 = vld [vmem:[#allocation11_spill] sm:$0xff] }
 0x392   : > { %1959 = vmatmul.bf16.vlgmr.msra.gmra.mxu2 %v4224_v52 }
 0x393   : > { %v3869_v43 = vpop.eup %3868  ;;  %2007 = vmatpush.bf16.msra.mxu3 %v3407_v2  ;;  %v3350_v2 = vld [vmem:[%s5956_s3 + $0xa4] sm:$0xf] }
 0x394   : > { %v1455_v63 = vpop.xlane.xlu2 %1454  ;;  %v1488_v17 = vmul.f32 %v3869_v43, %v4922_v11  ;;  %v5046_v11 = vpop.f32.mrf.mxu3 }
 0x395   : > { %3870 = vrcp.f32 %v1455_v63  ;;  %v3322_v63 = vld [vmem:[%s5956_s3 + $0x34] sm:$0xf] }
 0x396   : > { %v3323_v34 = vor.u32 %v3703_v56, %v3322_v63  ;;  %v6045_v63 = vld [vmem:[#allocation14_spill] sm:$0xff] }
 0x39b   : > { %v3871_v46 = vpop.eup %3870 }
 0x39c   : > { %v1489_v30 = vmul.f32 %v3871_v46, %v4928_v36  ;;  %v1457_v47 = vpop.xlane.xlu0 %1456  ;;  %v5049_v36 = vpop.f32.mrf.mxu3  ;;  %v3355_v46 = vor.u32 %v3711_v49, %v3354_v26 }
 0x39d   : > { %3872 = vrcp.f32 %v1457_v47 }
 0x39e   : > { %v1498_v48 = vpack.c.bf16 %v1489_v30, %v1488_v17  ;;  %v3702_v17 = vld [vmem:[%s5956_s3 + $0x28] sm:$0xf0] }
 0x39f   : > { %v3319_v30 = vor.u32 %v3702_v17, %v3318_v15 }
 0x3a0   : > { %1538 = vmatmul.bf16.gmra.mxu3 %v1498_v48  ;;  %v3710_v48 = vld [vmem:[%s5956_s3 + $0xa8] sm:$0xf0] }
 0x3a2   : > { %1964 = vmatmul.bf16.gmra.mxu2 %v4234_v58 }
 0x3a3   : > { %v3873_v57 = vpop.eup %3872 }
 0x3a4   : > { %v1459_v52 = vpop.xlane.xlu1 %1458  ;;  %v1490_v38 = vmul.f32 %v3873_v57, %v4932_v25  ;;  %v5053_v45 = vpop.f32.mrf.mxu3 }
 0x3a5   : > { %3874 = vrcp.f32 %v1459_v52  ;;  %v3351_v52 = vor.u32 %v3710_v48, %v3350_v2 }
 0x3ab   : > { %v3875_v9 = vpop.eup %3874 }
 0x3ac   : > { %v1491_v62 = vmul.f32 %v3875_v9, %v4937_v61  ;;  %v5056_v58 = vpop.f32.mrf.mxu3  ;;  %v3314_v9 = vld [vmem:[%s5956_s3 + $0x14] sm:$0xf] }
 0x3ae   : > { %v1499_v27 = vpack.c.bf16 %v1491_v62, %v1490_v38  ;;  %v3701_v38 = vld [vmem:[%s5956_s3 + $0x18] sm:$0xf0] }
 0x3af   : > { %v3315_v62 = vor.u32 %v3701_v38, %v3314_v9  ;;  %v6048_v9 = vld [vmem:[#allocation17_spill] sm:$0xff] }
 0x3b0   : > { %1543 = vmatmul.bf16.gmra.mxu3 %v1499_v27  ;;  %v3346_v27 = vld [vmem:[%s5956_s3 + $0x94] sm:$0xf] }
 0x3b2   : > { %1969 = vmatmul.bf16.gmra.mxu2 %v4244_v0 }
 0x3b4   : > { %v5059_v25 = vpop.f32.mrf.mxu3 }
 0x3bc   : > { %v5062_v61 = vpop.f32.mrf.mxu3 }
 0x3c0   : > { %2008 = vmatmul.bf16.vlgmr.msra.gmra.mxu3 %v4226_v53 }
 0x3c2   : > { %1974 = vmatmul.bf16.gmra.mxu2 %v4254_v6 }
 0x3c4   : > { %v5066_v53 = vpop.f32.mrf.mxu3 }
 0x3cc   : > { %v5069_v0 = vpop.f32.mrf.mxu3 }
 0x3d0   : > { %2013 = vmatmul.bf16.gmra.mxu3 %v4236_v59 }
 0x3d2   : > { %1979 = vmatmul.bf16.gmra.mxu2 %v4264_v12 }
 0x3e0   : > { %2018 = vmatmul.bf16.gmra.mxu3 %v4246_v1  ;;  %v3338_v1 = vld [vmem:[%s5956_s3 + $0x74] sm:$0xf] }
 0x3e2   : > { %1984 = vmatmul.bf16.gmra.mxu2 %v4274_v18 }
 0x3f0   : > { %2023 = vmatmul.bf16.gmra.mxu3 %v4256_v7  ;;  %v3707_v7 = vld [vmem:[%s5956_s3 + $0x78] sm:$0xf0] }
 0x3f1   : > { %v3339_v12 = vor.u32 %v3707_v7, %v3338_v1  ;;  %v3709_v1 = vld [vmem:[%s5956_s3 + $0x98] sm:$0xf0] }
 0x3f2   : > { %1989 = vmatmul.bf16.gmra.mxu2 %v4284_v24 }
 0x3f3   : > { %1705 = vmatpush.bf16.msra.mxu0 %v3339_v12  ;;  %v3347_v12 = vor.u32 %v3709_v1, %v3346_v27 }
 0x3f7   : > { %1706 = vmatpush.bf16.msra.mxu0 %v3335_v60  ;;  %v3708_v60 = vld [vmem:[%s5956_s3 + $0x88] sm:$0xf0] }
 0x3fb   : > { %1707 = vmatpush.bf16.msra.mxu0 %v3331_v32 }
 0x3ff   : > { %1708 = vmatpush.bf16.msra.mxu0 %v3327_v10 }
 0x400   : > { %2028 = vmatmul.bf16.gmra.mxu3 %v4266_v13  ;;  %v3370_v13 = vld [vmem:[%s5956_s3 + $0xf4] sm:$0xf] }
 0x402   : > { %1994 = vmatmul.bf16.gmra.mxu2 %v4300_v33 }
 0x403   : > { %v5072_v59 = vpop.f32.mrf.mxu3  ;;  %1709 = vmatpush.bf16.msra.mxu0 %v3323_v34 }
 0x407   : > { %1710 = vmatpush.bf16.msra.mxu0 %v3319_v30  ;;  %v6047_v30 = vld [vmem:[#allocation16_spill] sm:$0xff] }
 0x40b   : > { %v5075_v6 = vpop.f32.mrf.mxu3  ;;  %1711 = vmatpush.bf16.msra.mxu0 %v3315_v62  ;;  %v6049_v62 = vld [vmem:[#allocation18_spill] sm:$0xff] }
 0x410   : > { %2033 = vmatmul.bf16.gmra.mxu3 %v4276_v19  ;;  %v3715_v19 = vld [vmem:[%s5956_s3 + $0xf8] sm:$0xf0] }
 0x411   : > { %v3371_v24 = vor.u32 %v3715_v19, %v3370_v13  ;;  %v3310_v19 = vld [vmem:[%s5956_s3 + $0x4] sm:$0xf] }
 0x413   : > { %v5084_v18 = vpop.f32.mrf.mxu3  ;;  %1754 = vmatpush.bf16.msra.mxu1 %v3371_v24  ;;  %v3700_v24 = vld [vmem:[%s5956_s3 + $0x8] sm:$0xf0] }
 0x414   : > { %v3311_v35 = vor.u32 %v3700_v24, %v3310_v19  ;;  %v6051_v24 = vld [vmem:[#allocation20_spill] sm:$0xff] }
 0x415   : > { %v1960_v42 = vpop.f32.mrf.mxu2 }
 0x416   : > { %v1961_v57 = vadd.f32 %v5157_v29, %v1960_v42  ;;  %1712 = vmatpush.bf16.msra.mxu0 %v3311_v35 }
 0x417   : > { %1755 = vmatpush.bf16.msra.mxu1 %v3367_v55  ;;  %v6041_v55 = vld [vmem:[#allocation10_spill] sm:$0xff] }
 0x419   : > { %1713 = vmatmul.bf16.vlgmr.msra.gmra.mxu0 %v6040_v21 }
 0x41b   : > { %v5092_v33 = vpop.f32.mrf.mxu3  ;;  %1756 = vmatpush.bf16.msra.mxu1 %v3363_v54  ;;  %v6043_v54 = vld [vmem:[#allocation12_spill] sm:$0xff] }
 0x41d   : > { %v5111_v8 = vpop.f32.mrf.mxu2 }
 0x41f   : > { %1757 = vmatpush.bf16.msra.mxu1 %v3359_v28 }
 0x420   : > { %2038 = vmatmul.bf16.gmra.mxu3 %v6038_v39  ;;  %v3343_v39 = vor.u32 %v3708_v60, %v3342_v50  ;;  %v6052_v60 = vld [vmem:[#allocation21_spill] sm:$0xff] }
 0x423   : > { %v5101_v44 = vpop.f32.mrf.mxu3  ;;  %1758 = vmatpush.bf16.msra.mxu1 %v3355_v46  ;;  %v6046_v46 = vld [vmem:[#allocation15_spill] sm:$0xff] }
 0x425   : > { %v1965_v31 = vpop.f32.mrf.mxu2 }
 0x426   : > { %v1966_v37 = vadd.f32 %v5157_v29, %v1965_v31  ;;  %v6044_v31 = vld [vmem:[#allocation13_spill] sm:$0xff] }
 0x427   : > { %1759 = vmatpush.bf16.msra.mxu1 %v3351_v52 }
 0x429   : > { %1718 = vmatmul.bf16.gmra.mxu0 %v6042_v16  ;;  %v3466_v16 = vld [vmem:[%s5958_s5 + $0x74] sm:$0xf] }
 0x42b   : > { %v5109_v40 = vpop.f32.mrf.mxu3  ;;  %1760 = vmatpush.bf16.msra.mxu1 %v3347_v12  ;;  %v6050_v12 = vld [vmem:[#allocation19_spill] sm:$0xff] }
 0x42d   : > { %v5171_v47 = vpop.f32.mrf.mxu2 }
 0x42f   : > { %1761 = vmatpush.bf16.msra.mxu1 %v3343_v39 }
 0x430   : > { %2043 = vmatmul.bf16.gmra.mxu3 %v6039_v51 }
 0x432   : > { %1762 = vmatmul.bf16.vlgmr.msra.gmra.mxu1 %v6041_v55 }
 0x433   : > { %v5126_v4 = vpop.f32.mrf.mxu3 }
 0x435   : > { %v1970_v42 = vpop.f32.mrf.mxu2 }
 0x436   : > { %v1971_v20 = vadd.f32 %v5157_v29, %v1970_v42  ;;  %v6053_v42 = vld [vmem:[#allocation22_spill] sm:$0xff] }
 0x439   : > { %1723 = vmatmul.bf16.gmra.mxu0 %v6044_v31  ;;  %v3462_v31 = vld [vmem:[%s5958_s5 + $0x64] sm:$0xf] }
 0x43b   : > { %v5152_v43 = vpop.f32.mrf.mxu3 }
 0x43d   : > { %v5205_v32 = vpop.f32.mrf.mxu2 }
 0x442   : > { %1767 = vmatmul.bf16.gmra.mxu1 %v6043_v54  ;;  %v3739_v54 = vld [vmem:[%s5958_s5 + $0x78] sm:$0xf0] }
 0x443   : > { %v2009_v7 = vpop.f32.mrf.mxu3 }
 0x444   : > { %v5186_v13 = vadd.f32 %v2009_v7, %v1961_v57 }
 0x445   : > { %v1975_v14 = vpop.f32.mrf.mxu2 }
 0x446   : > { %v1976_v56 = vadd.f32 %v5157_v29, %v1975_v14  ;;  %v3498_v14 = vld [vmem:[%s5958_s5 + $0xf4] sm:$0xf] }
 0x449   : > { %1728 = vmatmul.bf16.gmra.mxu0 %v6046_v46  ;;  %v3746_v46 = vld [vmem:[%s5958_s5 + $0xe8] sm:$0xf0] }
 0x44b   : > { %v5201_v5 = vpop.f32.mrf.mxu3 }
 0x44d   : > { %v5216_v23 = vpop.f32.mrf.mxu2 }
 0x452   : > { %1772 = vmatmul.bf16.gmra.mxu1 %v6045_v63  ;;  %v3738_v63 = vld [vmem:[%s5958_s5 + $0x68] sm:$0xf0] }
 0x453   : > { %v2014_v3 = vpop.f32.mrf.mxu3 }
 0x454   : > { %v5207_v51 = vadd.f32 %v2014_v3, %v1966_v37 }
 0x455   : > { %v1980_v34 = vpop.f32.mrf.mxu2 }
 0x456   : > { %v1981_v2 = vadd.f32 %v5157_v29, %v1980_v34 }
 0x459   : > { %1733 = vmatmul.bf16.gmra.mxu0 %v6048_v9 }
 0x45b   : > { %v5210_v22 = vpop.f32.mrf.mxu3 }
 0x45d   : > { %v5228_v17 = vpop.f32.mrf.mxu2 }
 0x462   : > { %1777 = vmatmul.bf16.gmra.mxu1 %v6047_v30  ;;  %v6054_v30 = vld [vmem:[#allocation23_spill] sm:$0xff] }
 0x463   : > { %v2019_v10 = vpop.f32.mrf.mxu3 }
 0x464   : > { %v5214_v41 = vadd.f32 %v2019_v10, %v1971_v20  ;;  %v3467_v20 = vor.u32 %v3739_v54, %v3466_v16  ;;  %v3747_v10 = vld [vmem:[%s5958_s5 + $0xf8] sm:$0xf0]  ;;  %v3736_v54 = vld [vmem:[%s5958_s5 + $0x48] sm:$0xf0] }
 0x465   : > { %v5234_v57 = vpop.f32.mrf.mxu2  ;;  %v3499_v34 = vor.u32 %v3747_v10, %v3498_v14  ;;  %v3486_v10 = vld [vmem:[%s5958_s5 + $0xc4] sm:$0xf] }
 0x466   : > { %2181 = vmatpush.bf16.msrb.mxu0 %v3467_v20 }
 0x467   : > { %2230 = vmatpush.bf16.msrb.mxu1 %v3499_v34 }
 0x469   : > { %1738 = vmatmul.bf16.gmra.mxu0 %v6050_v12 }
 0x46b   : > { %v5219_v28 = vpop.f32.mrf.mxu3 }
 0x46d   : > { %v1987_v27 = vpop.f32.mrf.mxu2 }
 0x472   : > { %1782 = vmatmul.bf16.gmra.mxu1 %v6049_v62 }
 0x473   : > { %v2024_v26 = vpop.f32.mrf.mxu3 }
 0x474   : > { %v5223_v49 = vadd.f32 %v2024_v26, %v1976_v56  ;;  %v3494_v26 = vld [vmem:[%s5958_s5 + $0xe4] sm:$0xf] }
 0x475   : > { %v1990_v7 = vpop.f32.mrf.mxu2  ;;  %v3495_v12 = vor.u32 %v3746_v46, %v3494_v26 }
 0x477   : > { %2231 = vmatpush.bf16.msrb.mxu1 %v3495_v12 }
 0x479   : > { %1743 = vmatmul.bf16.gmra.mxu0 %v6052_v60 }
 0x47b   : > { %v5226_v15 = vpop.f32.mrf.mxu3 }
 0x47d   : > { %v1992_v35 = vpop.f32.mrf.mxu2 }
 0x482   : > { %1787 = vmatmul.bf16.gmra.mxu1 %v6051_v24  ;;  %v6055_v24 = vld [vmem:[#allocation24_spill] sm:$0xff] }
 0x483   : > { %v2029_v48 = vpop.f32.mrf.mxu3 }
 0x484   : > { %v5232_v52 = vadd.f32 %v2029_v48, %v1981_v2  ;;  %v3463_v48 = vor.u32 %v3738_v63, %v3462_v31  ;;  %v3744_v31 = vld [vmem:[%s5958_s5 + $0xc8] sm:$0xf0] }
 0x485   : > { %v1995_v21 = vpop.f32.mrf.mxu2  ;;  %v3487_v34 = vor.u32 %v3744_v31, %v3486_v10  ;;  %v3732_v10 = vld [vmem:[%s5958_s5 + $0x8] sm:$0xf0] }
 0x486   : > { %v1996_v3 = vadd.f32 %v5157_v29, %v1995_v21  ;;  %2182 = vmatpush.bf16.msrb.mxu0 %v3463_v48  ;;  %v1993_v21 = vadd.f32 %v5157_v29, %v1992_v35  ;;  %v3454_v35 = vld [vmem:[%s5958_s5 + $0x44] sm:$0xf]  ;;  %v3482_v48 = vld [vmem:[%s5958_s5 + $0xb4] sm:$0xf] }
 0x487   : > { %v3455_v63 = vor.u32 %v3736_v54, %v3454_v35  ;;  %v3442_v35 = vld [vmem:[%s5958_s5 + $0x14] sm:$0xf]  ;;  %v3733_v54 = vld [vmem:[%s5958_s5 + $0x18] sm:$0xf0] }
 0x489   : > { %1748 = vmatmul.bf16.gmra.mxu0 %v6054_v30  ;;  %v1988_v30 = vadd.f32 %v5157_v29, %v1987_v27  ;;  %v3446_v27 = vld [vmem:[%s5958_s5 + $0x24] sm:$0xf] }
 0x48b   : > { %v5237_v38 = vpop.f32.mrf.mxu3 }
 0x48d   : > { %v1997_v37 = vpop.f32.mrf.mxu2 }
 0x48e   : > { %v1998_v56 = vadd.f32 %v5157_v29, %v1997_v37  ;;  %v3458_v37 = vld [vmem:[%s5958_s5 + $0x54] sm:$0xf] }
 0x492   : > { %1792 = vmatmul.bf16.gmra.mxu1 %v6053_v42  ;;  %v1991_v42 = vadd.f32 %v5157_v29, %v1990_v7  ;;  %v3745_v7 = vld [vmem:[%s5958_s5 + $0xd8] sm:$0xf0] }
 0x493   : > { %v5240_v1 = vpop.f32.mrf.mxu3 }
 0x496   : > { %v5302_v46 = vpop.f32.mrf.mxu0 }
 0x49b   : > { %v5243_v19 = vpop.f32.mrf.mxu3 }
 0x49c   : > { %v2037_v12 = vadd.f32 %v5243_v19, %v1988_v30 }
 0x4a2   : > { %1797 = vmatmul.bf16.gmra.mxu1 %v6055_v24 }
 0x4a3   : > { %v2039_v50 = vpop.f32.mrf.mxu3 }
 0x4ab   : > { %v2041_v39 = vpop.f32.mrf.mxu3 }
 0x4ac   : > { %v2042_v14 = vadd.f32 %v2041_v39, %v1993_v21  ;;  %v1986_v39 = vadd.f32 %v5157_v29, %v5234_v57  ;;  %v3743_v57 = vld [vmem:[%s5958_s5 + $0xb8] sm:$0xf0]  ;;  %v3742_v21 = vld [vmem:[%s5958_s5 + $0xa8] sm:$0xf0] }
 0x4ad   : > { %v3483_v24 = vor.u32 %v3743_v57, %v3482_v48  ;;  %v6056_v57 = vld [vmem:[#allocation25_spill] sm:$0xff] }
 0x4b3   : > { %v2044_v55 = vpop.f32.mrf.mxu3 }
 0x4b4   : > { %v2045_v9 = vadd.f32 %v2044_v55, %v1996_v3  ;;  %v3737_v55 = vld [vmem:[%s5958_s5 + $0x58] sm:$0xf0]  ;;  %v3490_v3 = vld [vmem:[%s5958_s5 + $0xd4] sm:$0xf] }
 0x4b5   : > { %v3459_v16 = vor.u32 %v3737_v55, %v3458_v37  ;;  %v3491_v20 = vor.u32 %v3745_v7, %v3490_v3  ;;  %v2035_v55 = vadd.f32 %v5240_v1, %v1986_v39  ;;  %v1983_v7 = vadd.f32 %v5157_v29, %v5228_v17  ;;  %v3474_v1 = vld [vmem:[%s5958_s5 + $0x94] sm:$0xf]  ;;  %v3438_v17 = vld [vmem:[%s5958_s5 + $0x4] sm:$0xf] }
 0x4b6   : > { %v3439_v39 = vor.u32 %v3732_v10, %v3438_v17  ;;  %v6060_v10 = vld [vmem:[#allocation29_spill] sm:$0xff] }
 0x4b7   : > { %2183 = vmatpush.bf16.msrb.mxu0 %v3459_v16  ;;  %2232 = vmatpush.bf16.msrb.mxu1 %v3491_v20  ;;  %v2300_v19 = vpack.c.bf16 %v2037_v12, %v2035_v55  ;;  %v1716_v16 = vpop.f32.mrf.mxu0  ;;  %v3741_v20 = vld [vmem:[%s5958_s5 + $0x98] sm:$0xf0] }
 0x4bb   : > { %v2046_v2 = vpop.f32.mrf.mxu3  ;;  %2184 = vmatpush.bf16.msrb.mxu0 %v3455_v63  ;;  %2233 = vmatpush.bf16.msrb.mxu1 %v3487_v34  ;;  %v2032_v63 = vadd.f32 %v5237_v38, %v1983_v7  ;;  %v3470_v34 = vld [vmem:[%s5958_s5 + $0x84] sm:$0xf]  ;;  %v1978_v38 = vadd.f32 %v5157_v29, %v5216_v23 }
 0x4bc   : > { %v2047_v62 = vadd.f32 %v2046_v2, %v1998_v56  ;;  %v2040_v56 = vadd.f32 %v2039_v50, %v1991_v42  ;;  %v3450_v2 = vld [vmem:[%s5958_s5 + $0x34] sm:$0xf]  ;;  %v3735_v50 = vld [vmem:[%s5958_s5 + $0x38] sm:$0xf0]  ;;  %v3478_v42 = vld [vmem:[%s5958_s5 + $0xa4] sm:$0xf] }
 0x4bd   : > { %v3479_v3 = vor.u32 %v3742_v21, %v3478_v42 }
 0x4be   : > { %v2302_v60 = vpack.c.bf16 %v2047_v62, %v2045_v9  ;;  %v2301_v26 = vpack.c.bf16 %v2042_v14, %v2040_v56  ;;  %v3451_v9 = vor.u32 %v3735_v50, %v3450_v2  ;;  %v5322_v62 = vpop.f32.mrf.mxu1  ;;  %v3443_v14 = vor.u32 %v3733_v54, %v3442_v35 }
 0x4bf   : > { %2234 = vmatpush.bf16.msrb.mxu1 %v3483_v24  ;;  %v3475_v56 = vor.u32 %v3741_v20, %v3474_v1  ;;  %v2299_v2 = vpack.c.bf16 %v2032_v63, %v5232_v52  ;;  %v1719_v50 = vpop.f32.mrf.mxu0  ;;  %v1973_v52 = vadd.f32 %v5157_v29, %v5205_v32  ;;  %v5381_v32 = vld [vmem:[%s5960_s7 + $0x1] ss:$0 sm:$0xff] }
 0x4c0   : > { %2303 = vmatpush.bf16.xpose.msrb.mxu2 %v2302_v60  ;;  %v3734_v60 = vld [vmem:[%s5958_s5 + $0x28] sm:$0xf0]  ;;  %2185 = vmatpush.bf16.msrb.mxu0 %v3451_v9  ;;  %v2027_v9 = vadd.f32 %v5226_v15, %v1978_v38  ;;  %v1968_v15 = vadd.f32 %v5157_v29, %v5171_v47  ;;  %v1715_v47 = vadd.f32 %v5381_v32, %v5302_v46 }
 0x4c1   : > { %v3447_v37 = vor.u32 %v3734_v60, %v3446_v27  ;;  %v6057_v27 = vld [vmem:[#allocation26_spill] sm:$0xff]  ;;  %v2022_v42 = vadd.f32 %v5219_v28, %v1973_v52 }
 0x4c2   : > { %v2298_v12 = vpack.c.bf16 %v2027_v9, %v5223_v49  ;;  %v2017_v55 = vadd.f32 %v5210_v22, %v1968_v15  ;;  %v6059_v49 = vld [vmem:[#allocation28_spill] sm:$0xff]  ;;  %v1717_v22 = vadd.f32 %v5381_v32, %v1716_v16  ;;  %v1764_v54 = vadd.f32 %v5322_v62, %v1715_v47 }
 0x4c3   : > { %2235 = vmatpush.bf16.msrb.mxu1 %v3479_v3  ;;  %v2297_v23 = vpack.c.bf16 %v2022_v42, %v5214_v41  ;;  %v6058_v3 = vld [vmem:[#allocation27_spill] sm:$0xff]  ;;  %v1720_v16 = vadd.f32 %v5381_v32, %v1719_v50  ;;  %v6065_v42 = vld [vmem:[#allocation34_spill] sm:$0xff] }
 0x4c4   : > { %2186 = vmatpush.bf16.msrb.mxu0 %v3447_v37  ;;  %v2296_v28 = vpack.c.bf16 %v2017_v55, %v5207_v51  ;;  %v1803_v51 = vmul.f32 0.088388346, %v1764_v54 }
 0x4c6   : > { %v1765_v31 = vpop.f32.mrf.mxu1 }
 0x4c7   : > { %2236 = vmatpush.bf16.msrb.mxu1 %v3475_v56  ;;  %v1721_v24 = vpop.f32.mrf.mxu0  ;;  %v1766_v1 = vadd.f32 %v1765_v31, %v1717_v22  ;;  %v6066_v22 = vld [vmem:[#allocation35_spill] sm:$0xff] }
 0x4c8   : > { %2304 = vmatpush.bf16.xpose.msrb.mxu2 %v2301_v26  ;;  %v3740_v26 = vld [vmem:[%s5958_s5 + $0x88] sm:$0xf0]  ;;  %2187 = vmatpush.bf16.msrb.mxu0 %v3443_v14 }
 0x4c9   : > { %v3471_v30 = vor.u32 %v3740_v26, %v3470_v34  ;;  %v1804_v17 = vmul.f32 0.088388346, %v1766_v1 }
 0x4cb   : > { %2237 = vmatpush.bf16.msrb.mxu1 %v3471_v30  ;;  %v6063_v30 = vld [vmem:[#allocation32_spill] sm:$0xff] }
 0x4cc   : > { %2188 = vmatpush.bf16.msrb.mxu0 %v3439_v39  ;;  %v6062_v39 = vld [vmem:[#allocation31_spill] sm:$0xff] }
 0x4ce   : > { %v1768_v48 = vpop.f32.mrf.mxu1  ;;  %2238 = vmatmul.bf16.vlgmr.msrb.gmra.mxu1 %v6057_v27 }
 0x4cf   : > { %2189 = vmatmul.bf16.vlgmr.msrb.gmra.mxu0 %v6056_v57  ;;  %v1724_v21 = vpop.f32.mrf.mxu0  ;;  %v1769_v62 = vadd.f32 %v1768_v48, %v1720_v16 }
 0x4d0   : > { %2305 = vmatpush.bf16.xpose.msrb.mxu2 %v2300_v19  ;;  %v1963_v19 = vadd.f32 %v5157_v29, %v5111_v8  ;;  %v6061_v8 = vld [vmem:[#allocation30_spill] sm:$0xff]  ;;  %v2287_v29 = vpack.c.bf16 %v1804_v17, %v1803_v51  ;;  %v1725_v9 = vadd.f32 %v5381_v32, %v1724_v21 }
 0x4d2   : > { %v2012_v7 = vadd.f32 %v5201_v5, %v1963_v19  ;;  %v1722_v5 = vadd.f32 %v5381_v32, %v1721_v24 }
 0x4d4   : > { %v2295_v14 = vpack.c.bf16 %v2012_v7, %v5186_v13  ;;  %v1805_v13 = vmul.f32 0.088388346, %v1769_v62  ;;  %v6067_v7 = vld [vmem:[#allocation36_spill] sm:$0xff]  ;;  %v3622_v62 = vld [vmem:[%s5959_s6 + $0x70] sm:$0xf] }
 0x4d6   : > { %v1770_v60 = vpop.f32.mrf.mxu1 }
 0x4d7   : > { %v1726_v41 = vpop.f32.mrf.mxu0  ;;  %v1771_v31 = vadd.f32 %v1770_v60, %v1722_v5  ;;  %v6064_v60 = vld [vmem:[#allocation33_spill] sm:$0xff]  ;;  %v6069_v5 = vld [vmem:[#allocation38_spill] sm:$0xff] }
 0x4d8   : > { %2306 = vmatpush.bf16.xpose.msrb.mxu2 %v2299_v2  ;;  %v1727_v50 = vadd.f32 %v5381_v32, %v1726_v41 }
 0x4d9   : > { %v1806_v34 = vmul.f32 0.088388346, %v1771_v31  ;;  %v3699_v31 = vld [vmem:[%s5959_s6 + $0x74] sm:$0xf0] }
 0x4db   : > { %v2288_v2 = vpack.c.bf16 %v1806_v34, %v1805_v13  ;;  %v3623_v34 = vor.u32 %v3699_v31, %v3622_v62 }
 0x4de   : > { %v1773_v37 = vpop.f32.mrf.mxu1  ;;  %2243 = vmatmul.bf16.gmra.mxu1 %v6059_v49 }
 0x4df   : > { %2194 = vmatmul.bf16.gmra.mxu0 %v6058_v3  ;;  %v1729_v20 = vpop.f32.mrf.mxu0  ;;  %v1774_v27 = vadd.f32 %v1773_v37, %v1725_v9 }
 0x4e0   : > { %2307 = vmatpush.bf16.xpose.msrb.mxu2 %v2298_v12  ;;  %v1730_v3 = vadd.f32 %v5381_v32, %v1729_v20 }
 0x4e1   : > { %v1807_v24 = vmul.f32 0.088388346, %v1774_v27 }
 0x4e6   : > { %v1775_v35 = vpop.f32.mrf.mxu1 }
 0x4e7   : > { %v1731_v63 = vpop.f32.mrf.mxu0  ;;  %v1776_v12 = vadd.f32 %v1775_v35, %v1727_v50 }
 0x4e8   : > { %2308 = vmatpush.bf16.xpose.msrb.mxu2 %v2297_v23  ;;  %v1732_v21 = vadd.f32 %v5381_v32, %v1731_v63 }
 0x4e9   : > { %v1808_v52 = vmul.f32 0.088388346, %v1776_v12 }
 0x4eb   : > { %v2289_v23 = vpack.c.bf16 %v1808_v52, %v1807_v24  ;;  %v3693_v24 = vld [vmem:[%s5959_s6 + $0x44] sm:$0xf0] }
 0x4ee   : > { %2248 = vmatmul.bf16.gmra.mxu1 %v6061_v8  ;;  %v1778_v46 = vpop.f32.mrf.mxu1 }
 0x4ef   : > { %2199 = vmatmul.bf16.gmra.mxu0 %v6060_v10  ;;  %v1734_v26 = vpop.f32.mrf.mxu0  ;;  %v1779_v49 = vadd.f32 %v1778_v46, %v1730_v3  ;;  %v3590_v3 = vld [vmem:[%s5959_s6 + $0x30] sm:$0xf] }
 0x4f0   : > { %2309 = vmatpush.bf16.xpose.msrb.mxu2 %v2296_v28  ;;  %v1735_v54 = vadd.f32 %v5381_v32, %v1734_v26  ;;  %v3614_v26 = vld [vmem:[%s5959_s6 + $0x60] sm:$0xf] }
 0x4f1   : > { %v1809_v19 = vmul.f32 0.088388346, %v1779_v49 }
 0x4f6   : > { %v1780_v56 = vpop.f32.mrf.mxu1 }
 0x4f7   : > { %v1736_v57 = vpop.f32.mrf.mxu0  ;;  %v1781_v28 = vadd.f32 %v1780_v56, %v1732_v21  ;;  %v3691_v21 = vld [vmem:[%s5959_s6 + $0x34] sm:$0xf0] }
 0x4f8   : > { %2310 = vmatpush.bf16.xpose.msrb.mxu2 %v2295_v14  ;;  %v1737_v1 = vadd.f32 %v5381_v32, %v1736_v57 }
 0x4f9   : > { %v1810_v47 = vmul.f32 0.088388346, %v1781_v28 }
 0x4fb   : > { %v2290_v35 = vpack.c.bf16 %v1810_v47, %v1809_v19  ;;  %v3582_v19 = vld [vmem:[%s5959_s6 + $0x20] sm:$0xf]  ;;  %v3689_v47 = vld [vmem:[%s5959_s6 + $0x24] sm:$0xf0] }
 0x4fe   : > { %2253 = vmatmul.bf16.gmra.mxu1 %v6063_v30  ;;  %v1783_v38 = vpop.f32.mrf.mxu1 }
 0x4ff   : > { %2311 = vmatmul.bf16.vlgmr.msrb.gmra.mxu2 %v2287_v29  ;;  %2204 = vmatmul.bf16.gmra.mxu0 %v6062_v39  ;;  %v1739_v15 = vpop.f32.mrf.mxu0  ;;  %v1784_v51 = vadd.f32 %v1783_v38, %v1735_v54  ;;  %v6068_v29 = vld [vmem:[#allocation37_spill] sm:$0xff]  ;;  %v3697_v39 = vld [vmem:[%s5959_s6 + $0x64] sm:$0xf0]  ;;  %v3695_v38 = vld [vmem:[%s5959_s6 + $0x54] sm:$0xf0] }
 0x500   : > { %v1740_v56 = vadd.f32 %v5381_v32, %v1739_v15  ;;  %2835 = vmatpush.bf16.msra.mxu2 %v3623_v34  ;;  %v3615_v30 = vor.u32 %v3697_v39, %v3614_v26  ;;  %v3687_v54 = vld [vmem:[%s5959_s6 + $0x14] sm:$0xf0] }
 0x501   : > { %v1811_v10 = vmul.f32 0.088388346, %v1784_v51 }
 0x504   : > { %2836 = vmatpush.bf16.msra.mxu2 %v3615_v30 }
 0x506   : > { %v1785_v48 = vpop.f32.mrf.mxu1 }
 0x507   : > { %v1741_v41 = vpop.f32.mrf.mxu0  ;;  %v1786_v17 = vadd.f32 %v1785_v48, %v1737_v1  ;;  %v3598_v48 = vld [vmem:[%s5959_s6 + $0x40] sm:$0xf] }
 0x508   : > { %v1742_v13 = vadd.f32 %v5381_v32, %v1741_v41 }
 0x509   : > { %v1812_v8 = vmul.f32 0.088388346, %v1786_v17  ;;  %v5461_v17 = vld [vmem:[%s5962_s9 + $0x1] ss:$0 sm:$0xff] }
 0x50b   : > { %v2291_v46 = vpack.c.bf16 %v1812_v8, %v1811_v10  ;;  %v3566_v10 = vld [vmem:[%s5959_s6] sm:$0xf]  ;;  %v3685_v8 = vld [vmem:[%s5959_s6 + $0x4] sm:$0xf0] }
 0x50e   : > { %2258 = vmatmul.bf16.gmra.mxu1 %v6065_v42  ;;  %v1788_v55 = vpop.f32.mrf.mxu1  ;;  %v3599_v42 = vor.u32 %v3693_v24, %v3598_v48 }
 0x50f   : > { %2316 = vmatmul.bf16.gmra.mxu2 %v2288_v2  ;;  %2209 = vmatmul.bf16.gmra.mxu0 %v6064_v60  ;;  %v1744_v14 = vpop.f32.mrf.mxu0  ;;  %v3606_v2 = vld [vmem:[%s5959_s6 + $0x50] sm:$0xf]  ;;  %v1789_v9 = vadd.f32 %v1788_v55, %v1740_v56  ;;  %v6071_v55 = vld [vmem:[#allocation40_spill] sm:$0xff] }
 0x510   : > { %v3607_v27 = vor.u32 %v3695_v38, %v3606_v2  ;;  %v1745_v49 = vadd.f32 %v5381_v32, %v1744_v14 }
 0x511   : > { %v1813_v52 = vmul.f32 0.088388346, %v1789_v9 }
 0x512   : > { %2837 = vmatpush.bf16.msra.mxu2 %v3607_v27 }
 0x516   : > { %v1790_v37 = vpop.f32.mrf.mxu1  ;;  %2838 = vmatpush.bf16.msra.mxu2 %v3599_v42 }
 0x517   : > { %v1746_v16 = vpop.f32.mrf.mxu0  ;;  %v1791_v50 = vadd.f32 %v1790_v37, %v1742_v13  ;;  %v3591_v37 = vor.u32 %v3691_v21, %v3590_v3 }
 0x518   : > { %v1747_v28 = vadd.f32 %v5381_v32, %v1746_v16 }
 0x519   : > { %v1814_v60 = vmul.f32 0.088388346, %v1791_v50 }
 0x51a   : > { %2839 = vmatpush.bf16.msra.mxu2 %v3591_v37 }
 0x51b   : > { %v2292_v15 = vpack.c.bf16 %v1814_v60, %v1813_v52 }
 0x51e   : > { %2263 = vmatmul.bf16.gmra.mxu1 %v6067_v7  ;;  %v1793_v20 = vpop.f32.mrf.mxu1  ;;  %v3583_v7 = vor.u32 %v3689_v47, %v3582_v19 }
 0x51f   : > { %2321 = vmatmul.bf16.gmra.mxu2 %v2289_v23  ;;  %2214 = vmatmul.bf16.gmra.mxu0 %v6066_v22  ;;  %v1749_v57 = vpop.f32.mrf.mxu0  ;;  %v6070_v23 = vld [vmem:[#allocation39_spill] sm:$0xff]  ;;  %v1794_v1 = vadd.f32 %v1793_v20, %v1745_v49 }
 0x520   : > { %2840 = vmatpush.bf16.msra.mxu2 %v3583_v7  ;;  %v1750_v56 = vadd.f32 %v5381_v32, %v1749_v57 }
 0x526   : > { %v1795_v63 = vpop.f32.mrf.mxu1 }
 0x527   : > { %v1751_v41 = vpop.f32.mrf.mxu0  ;;  %v1796_v14 = vadd.f32 %v1795_v63, %v1747_v28  ;;  %v3567_v63 = vor.u32 %v3685_v8, %v3566_v10 }
 0x528   : > { %v1752_v13 = vadd.f32 %v5381_v32, %v1751_v41 }
 0x52e   : > { %2268 = vmatmul.bf16.gmra.mxu1 %v6069_v5  ;;  %v1798_v12 = vpop.f32.mrf.mxu1 }
 0x52f   : > { %2326 = vmatmul.bf16.gmra.mxu2 %v2290_v35  ;;  %2219 = vmatmul.bf16.gmra.mxu0 %v6068_v29  ;;  %v3574_v35 = vld [vmem:[%s5959_s6 + $0x10] sm:$0xf]  ;;  %v1815_v29 = vmul.f32 0.088388346, %v1794_v1  ;;  %v1799_v39 = vadd.f32 %v1798_v12, %v1750_v56 }
 0x530   : > { %v3575_v51 = vor.u32 %v3687_v54, %v3574_v35 }
 0x531   : > { %v1817_v2 = vmul.f32 0.088388346, %v1799_v39 }
 0x532   : > { %2841 = vmatpush.bf16.msra.mxu2 %v3575_v51 }
 0x536   : > { %v1800_v22 = vpop.f32.mrf.mxu1  ;;  %2842 = vmatpush.bf16.msra.mxu2 %v3567_v63 }
 0x537   : > { %v1801_v30 = vadd.f32 %v1800_v22, %v1752_v13 }
 0x539   : > { %v1818_v38 = vmul.f32 0.088388346, %v1801_v30 }
 0x53b   : > { %v2294_v24 = vpack.c.bf16 %v1818_v38, %v1817_v2  ;;  %v5555_v2 = vpack.c.bf16 %v5092_v33, %v5084_v18 }
 0x53e   : > { %2273 = vmatmul.bf16.gmra.mxu1 %v6071_v55 }
 0x53f   : > { %2331 = vmatmul.bf16.gmra.mxu2 %v2291_v46  ;;  %2224 = vmatmul.bf16.gmra.mxu0 %v6070_v23  ;;  %v1816_v46 = vmul.f32 0.088388346, %v1796_v14  ;;  %v5490_v23 = vpack.c.bf16 %v5049_v36, %v5046_v11  ;;  %v5508_v11 = vpack.c.bf16 %v5056_v58, %v5053_v45  ;;  %v5524_v45 = vpack.c.bf16 %v5062_v61, %v5059_v25 }
 0x541   : > { %v2293_v31 = vpack.c.bf16 %v1816_v46, %v1815_v29  ;;  %v5535_v46 = vpack.c.bf16 %v5069_v0, %v5066_v53 }
 0x54b   : > { %v2239_v5 = vpop.f32.mrf.mxu1 }
 0x54c   : > { %v2190_v16 = vpop.f32.mrf.mxu0 }
 0x54d   : > { %v2191_v20 = vadd.f32 %v5461_v17, %v2190_v16 }
 0x54f   : > { %2336 = vmatmul.bf16.gmra.mxu2 %v2292_v15  ;;  %v5470_v62 = vadd.f32 %v2239_v5, %v2191_v20 }
 0x553   : > { %v5476_v26 = vpop.f32.mrf.mxu1 }
 0x554   : > { %v5474_v34 = vpop.f32.mrf.mxu0 }
 0x55b   : > { %v2244_v27 = vpop.f32.mrf.mxu1 }
 0x55c   : > { %v2195_v9 = vpop.f32.mrf.mxu0 }
 0x55d   : > { %v2196_v50 = vadd.f32 %v5461_v17, %v2195_v9 }
 0x55f   : > { %2341 = vmatmul.bf16.gmra.mxu2 %v2293_v31  ;;  %v5479_v48 = vadd.f32 %v2244_v27, %v2196_v50  ;;  %v5546_v31 = vpack.c.bf16 %v5075_v6, %v5072_v59 }
 0x563   : > { %v5483_v52 = vpop.f32.mrf.mxu1 }
 0x564   : > { %v5481_v57 = vpop.f32.mrf.mxu0 }
 0x56b   : > { %v2249_v42 = vpop.f32.mrf.mxu1 }
 0x56c   : > { %v2200_v32 = vpop.f32.mrf.mxu0 }
 0x56d   : > { %v2201_v60 = vadd.f32 %v5461_v17, %v2200_v32 }
 0x56f   : > { %2346 = vmatmul.bf16.gmra.mxu2 %v2294_v24  ;;  %v5486_v12 = vadd.f32 %v2249_v42, %v2201_v60 }
 0x573   : > { %v5495_v55 = vpop.f32.mrf.mxu1 }
 0x574   : > { %v5493_v15 = vpop.f32.mrf.mxu0 }
 0x57b   : > { %v2254_v28 = vpop.f32.mrf.mxu1 }
 0x57c   : > { %v2205_v21 = vpop.f32.mrf.mxu0 }
 0x57d   : > { %v2206_v49 = vadd.f32 %v5461_v17, %v2205_v21 }
 0x57f   : > { %2843 = vmatmul.bf16.vlgmr.msra.gmra.mxu2 %v5490_v23  ;;  %v5503_v37 = vadd.f32 %v2254_v28, %v2206_v49 }
 0x582   : > { %v5497_v3 = vpop.f32.mrf.mxu2 }
 0x583   : > { %2352 = vmax.xlane.f32.xlu2 %v5497_v3  ;;  %v5511_v19 = vpop.f32.mrf.mxu1 }
 0x584   : > { %v2207_v36 = vpop.f32.mrf.mxu0 }
 0x58a   : > { %v5501_v41 = vpop.f32.mrf.mxu2 }
 0x58b   : > { %2354 = vmax.xlane.f32.xlu0 %v5501_v41  ;;  %v2259_v35 = vpop.f32.mrf.mxu1 }
 0x58c   : > { %v2210_v22 = vpop.f32.mrf.mxu0 }
 0x58d   : > { %v2211_v7 = vadd.f32 %v5461_v17, %v2210_v22 }
 0x58f   : > { %2848 = vmatmul.bf16.gmra.mxu2 %v5508_v11  ;;  %v5519_v1 = vadd.f32 %v2259_v35, %v2211_v7  ;;  %v2208_v7 = vadd.f32 %v5461_v17, %v2207_v36  ;;  %v2198_v36 = vadd.f32 %v5461_v17, %v5481_v57  ;;  %v5586_v57 = vpack.c.bf16 %v5152_v43, %v5126_v4 }
 0x592   : > { %v5513_v47 = vpop.f32.mrf.mxu2 }
 0x593   : > { %2356 = vmax.xlane.f32.xlu1 %v5513_v47  ;;  %v2261_v14 = vpop.f32.mrf.mxu1 }
 0x594   : > { %v2212_v58 = vpop.f32.mrf.mxu0 }
 0x595   : > { %v2213_v33 = vadd.f32 %v5461_v17, %v2212_v58 }
 0x597   : > { %v2262_v35 = vadd.f32 %v2261_v14, %v2213_v33 }
 0x599   : > { %v2283_v58 = vpack.c.bf16 %v2262_v35, %v5519_v1 }
 0x59a   : > { %v5517_v54 = vpop.f32.mrf.mxu2 }
 0x59b   : > { %2358 = vmax.xlane.f32.xlu2 %v5517_v54  ;;  %v2264_v8 = vpop.f32.mrf.mxu1 }
 0x59c   : > { %v2215_v10 = vpop.f32.mrf.mxu0 }
 0x59d   : > { %v2216_v24 = vadd.f32 %v5461_v17, %v2215_v10  ;;  %v5567_v10 = vpack.c.bf16 %v5109_v40, %v5101_v44  ;;  %v2193_v44 = vadd.f32 %v5461_v17, %v5474_v34  ;;  %v2247_v40 = vadd.f32 %v5483_v52, %v2198_v36 }
 0x59f   : > { %2853 = vmatmul.bf16.gmra.mxu2 %v5524_v45  ;;  %v2265_v49 = vadd.f32 %v2264_v8, %v2216_v24  ;;  %v2280_v1 = vpack.c.bf16 %v2247_v40, %v5479_v48 }
 0x5a2   : > { %v5527_v51 = vpop.f32.mrf.mxu2 }
 0x5a3   : > { %2360 = vmax.xlane.f32.xlu0 %v5527_v51  ;;  %v2266_v61 = vpop.f32.mrf.mxu1 }
 0x5a4   : > { %v2217_v25 = vpop.f32.mrf.mxu0 }
 0x5a5   : > { %v2218_v32 = vadd.f32 %v5461_v17, %v2217_v25  ;;  %v2203_v25 = vadd.f32 %v5461_v17, %v5493_v15 }
 0x5a7   : > { %v2267_v28 = vadd.f32 %v2266_v61, %v2218_v32  ;;  %v2252_v14 = vadd.f32 %v5495_v55, %v2203_v25 }
 0x5a9   : > { %v2281_v15 = vpack.c.bf16 %v2252_v14, %v5486_v12 }
 0x5aa   : > { %v5530_v29 = vpop.f32.mrf.mxu2 }
 0x5ab   : > { %2362 = vmax.xlane.f32.xlu1 %v5530_v29  ;;  %v2269_v5 = vpop.f32.mrf.mxu1 }
 0x5ac   : > { %v2220_v20 = vpop.f32.mrf.mxu0 }
 0x5ad   : > { %v2221_v38 = vadd.f32 %v5461_v17, %v2220_v20  ;;  %v2284_v20 = vpack.c.bf16 %v2267_v28, %v2265_v49 }
 0x5af   : > { %2858 = vmatmul.bf16.gmra.mxu2 %v5535_v46  ;;  %v2270_v60 = vadd.f32 %v2269_v5, %v2221_v38  ;;  %v2257_v5 = vadd.f32 %v5511_v19, %v2208_v7  ;;  %v2242_v19 = vadd.f32 %v5476_v26, %v2193_v44 }
 0x5b1   : > { %v2282_v8 = vpack.c.bf16 %v2257_v5, %v5503_v37  ;;  %v2279_v55 = vpack.c.bf16 %v2242_v19, %v5470_v62 }
 0x5b2   : > { %v5538_v16 = vpop.f32.mrf.mxu2 }
 0x5b3   : > { %2364 = vmax.xlane.f32.xlu2 %v5538_v16  ;;  %v2271_v0 = vpop.f32.mrf.mxu1 }
 0x5b4   : > { %v2222_v53 = vpop.f32.mrf.mxu0 }
 0x5b5   : > { %v2223_v59 = vadd.f32 %v5461_v17, %v2222_v53 }
 0x5b7   : > { %v2272_v42 = vadd.f32 %v2271_v0, %v2223_v59 }
 0x5b9   : > { %v2285_v22 = vpack.c.bf16 %v2272_v42, %v2270_v60 }
 0x5ba   : > { %v5541_v63 = vpop.f32.mrf.mxu2 }
 0x5bb   : > { %2366 = vmax.xlane.f32.xlu0 %v5541_v63  ;;  %v2274_v39 = vpop.f32.mrf.mxu1 }
 0x5bc   : > { %v2225_v13 = vpop.f32.mrf.mxu0 }
 0x5bd   : > { %v2226_v30 = vadd.f32 %v5461_v17, %v2225_v13 }
 0x5bf   : > { %2863 = vmatmul.bf16.gmra.mxu2 %v5546_v31  ;;  %v2275_v9 = vadd.f32 %v2274_v39, %v2226_v30 }
 0x5c2   : > { %v5549_v56 = vpop.f32.mrf.mxu2 }
 0x5c3   : > { %2368 = vmax.xlane.f32.xlu0 %v5549_v56  ;;  %v2276_v27 = vpop.f32.mrf.mxu1 }
 0x5c4   : > { %v2227_v6 = vpop.f32.mrf.mxu0 }
 0x5c5   : > { %v2228_v50 = vadd.f32 %v5461_v17, %v2227_v6 }
 0x5c7   : > { %v2277_v21 = vadd.f32 %v2276_v27, %v2228_v50 }
 0x5c9   : > { %v2286_v18 = vpack.c.bf16 %v2277_v21, %v2275_v9 }
 0x5ca   : > { %v5591_v12 = vpop.f32.mrf.mxu2 }
 0x5cb   : > { %2504 = vmatpush.bf16.msrb.mxu3 %v2286_v18 }
 0x5cf   : > { %2868 = vmatmul.bf16.gmra.mxu2 %v5555_v2  ;;  %2505 = vmatpush.bf16.msrb.mxu3 %v2285_v22 }
 0x5d2   : > { %v5597_v62 = vpop.f32.mrf.mxu2 }
 0x5d3   : > { %2506 = vmatpush.bf16.msrb.mxu3 %v2284_v20 }
 0x5d7   : > { %2507 = vmatpush.bf16.msrb.mxu3 %v2283_v58 }
 0x5da   : > { %v5607_v39 = vpop.f32.mrf.mxu2 }
 0x5db   : > { %2508 = vmatpush.bf16.msrb.mxu3 %v2282_v8 }
 0x5df   : > { %2873 = vmatmul.bf16.gmra.mxu2 %v5567_v10  ;;  %2509 = vmatpush.bf16.msrb.mxu3 %v2281_v15 }
 0x5e3   : > { %2510 = vmatpush.bf16.msrb.mxu3 %v2280_v1 }
 0x5e7   : > { %2511 = vmatpush.bf16.msrb.mxu3 %v2279_v55 }
 0x5ef   : > { %2878 = vmatmul.bf16.gmra.mxu2 %v5586_v57 }
 0x5f6   : > { %v2353_v17 = vpop.xlane.xlu2 %2352 }
 0x5f7   : > { %v2384_v34 = vsub.f32 %v5497_v3, %v2353_v17 }
 0x5f9   : > { %v2400_v52 = vmul.f32 1.442695, %v2384_v34 }
 0x5fb   : > { %3876 = vpow2.f32 %v2400_v52 }
 0x5fe   : > { %v2355_v26 = vpop.xlane.xlu0 %2354 }
 0x5ff   : > { %v2385_v48 = vsub.f32 %v5501_v41, %v2355_v26 }
 0x601   : > { %v5594_v37 = vpop.eup %3876  ;;  %v2402_v4 = vmul.f32 1.442695, %v2385_v48 }
 0x602   : > { %2432 = vadd.xlane.f32.xlu1 %v5594_v37 }
 0x603   : > { %3878 = vpow2.f32 %v2402_v4 }
 0x606   : > { %v2357_v43 = vpop.xlane.xlu1 %2356 }
 0x607   : > { %v2386_v61 = vsub.f32 %v5513_v47, %v2357_v43 }
 0x609   : > { %v5600_v53 = vpop.eup %3878  ;;  %v2404_v3 = vmul.f32 1.442695, %v2386_v61 }
 0x60a   : > { %2434 = vadd.xlane.f32.xlu2 %v5600_v53  ;;  %2370 = vmax.xlane.f32.xlu1 %v5591_v12 }
 0x60b   : > { %3880 = vpow2.f32 %v2404_v3 }
 0x60e   : > { %v2359_v41 = vpop.xlane.xlu2 %2358 }
 0x60f   : > { %v2387_v0 = vsub.f32 %v5517_v54, %v2359_v41  ;;  %v5616_v54 = vpop.f32.mrf.mxu2 }
 0x611   : > { %v5605_v13 = vpop.eup %3880  ;;  %v2406_v30 = vmul.f32 1.442695, %v2387_v0 }
 0x612   : > { %2436 = vadd.xlane.f32.xlu2 %v5605_v13  ;;  %2372 = vmax.xlane.f32.xlu1 %v5597_v62 }
 0x613   : > { %3882 = vpow2.f32 %v2406_v30 }
 0x616   : > { %v2361_v47 = vpop.xlane.xlu0 %2360 }
 0x617   : > { %v2388_v38 = vsub.f32 %v5527_v51, %v2361_v47  ;;  %v5623_v51 = vpop.f32.mrf.mxu2  ;;  %v3558_v47 = vld [vmem:[%s5959_s6 + $0xf0] sm:$0xf] }
 0x619   : > { %v5612_v59 = vpop.eup %3882  ;;  %v2408_v6 = vmul.f32 1.442695, %v2388_v38  ;;  %v3763_v38 = vld [vmem:[%s5959_s6 + $0xf4] sm:$0xf0] }
 0x61a   : > { %2438 = vadd.xlane.f32.xlu0 %v5612_v59  ;;  %2374 = vmax.xlane.f32.xlu2 %v5607_v39 }
 0x61b   : > { %3884 = vpow2.f32 %v2408_v6  ;;  %v3560_v6 = vld [vmem:[%s5959_s6 + $0xf8] sm:$0xf0] }
 0x61e   : > { %v2363_v9 = vpop.xlane.xlu1 %2362 }
 0x61f   : > { %v2389_v50 = vsub.f32 %v5530_v29, %v2363_v9  ;;  %v5630_v18 = vpop.f32.mrf.mxu2  ;;  %v3761_v9 = vld [vmem:[%s5959_s6 + $0xe4] sm:$0xf0] }
 0x621   : > { %v5619_v27 = vpop.eup %3884  ;;  %v2410_v24 = vmul.f32 1.442695, %v2389_v50 }
 0x622   : > { %2440 = vadd.xlane.f32.xlu0 %v5619_v27  ;;  %2376 = vmax.xlane.f32.xlu2 %v5616_v54 }
 0x623   : > { %3886 = vpow2.f32 %v2410_v24  ;;  %v3760_v24 = vld [vmem:[%s5959_s6 + $0xe4] sm:$0xf] }
 0x626   : > { %v2365_v32 = vpop.xlane.xlu2 %2364 }
 0x627   : > { %v2390_v60 = vsub.f32 %v5538_v16, %v2365_v32  ;;  %v5640_v35 = vpop.f32.mrf.mxu2  ;;  %v3552_v32 = vld [vmem:[%s5959_s6 + $0xe8] sm:$0xf0] }
 0x629   : > { %v5626_v42 = vpop.eup %3886  ;;  %v2412_v21 = vmul.f32 1.442695, %v2390_v60 }
 0x62a   : > { %2442 = vadd.xlane.f32.xlu1 %v5626_v42  ;;  %2378 = vmax.xlane.f32.xlu0 %v5623_v51 }
 0x62b   : > { %3888 = vpow2.f32 %v2412_v21 }
 0x62e   : > { %v2367_v29 = vpop.xlane.xlu0 %2366 }
 0x62f   : > { %v2391_v33 = vsub.f32 %v5541_v63, %v2367_v29 }
 0x631   : > { %v5633_v49 = vpop.eup %3888  ;;  %v2414_v28 = vmul.f32 1.442695, %v2391_v33  ;;  %v3555_v33 = vor.u32 %v3760_v24, %v3552_v32  ;;  %v3520_v24 = vld [vmem:[%s5959_s6 + $0xa8] sm:$0xf0] }
 0x632   : > { %2444 = vadd.xlane.f32.xlu1 %v5633_v49  ;;  %2380 = vmax.xlane.f32.xlu0 %v5630_v18 }
 0x633   : > { %3890 = vpow2.f32 %v2414_v28 }
 0x636   : > { %v2369_v16 = vpop.xlane.xlu0 %2368 }
 0x637   : > { %v2392_v22 = vsub.f32 %v5549_v56, %v2369_v16 }
 0x639   : > { %v5638_v7 = vpop.eup %3890  ;;  %v2416_v20 = vmul.f32 1.442695, %v2392_v22 }
 0x63a   : > { %2446 = vadd.xlane.f32.xlu2 %v5638_v7  ;;  %2382 = vmax.xlane.f32.xlu1 %v5640_v35 }
 0x63b   : > { %3892 = vpow2.f32 %v2416_v20 }
 0x641   : > { %v5644_v63 = vpop.eup %3892 }
 0x642   : > { %2448 = vadd.xlane.f32.xlu2 %v5644_v63 }
 0x675   : > { %v2433_v25 = vpop.xlane.xlu1 %2432 }
 0x676   : > { %3894 = vrcp.f32 %v2433_v25 }
 0x67c   : > { %v3895_v14 = vpop.eup %3894 }
 0x67d   : > { %v2435_v5 = vpop.xlane.xlu2 %2434  ;;  %v2371_v58 = vpop.xlane.xlu1 %2370  ;;  %v2480_v44 = vmul.f32 %v3895_v14, %v5594_v37 }
 0x67e   : > { %3896 = vrcp.f32 %v2435_v5  ;;  %v2393_v56 = vsub.f32 %v5591_v12, %v2371_v58 }
 0x680   : > { %v2418_v36 = vmul.f32 1.442695, %v2393_v56 }
 0x682   : > { %3898 = vpow2.f32 %v2418_v36 }
 0x684   : > { %v3897_v8 = vpop.eup %3896 }
 0x685   : > { %v2481_v40 = vmul.f32 %v3897_v8, %v5600_v53  ;;  %v2437_v15 = vpop.xlane.xlu2 %2436  ;;  %v2373_v19 = vpop.xlane.xlu1 %2372 }
 0x686   : > { %v2394_v1 = vsub.f32 %v5597_v62, %v2373_v19 }
 0x687   : > { %v2496_v55 = vpack.c.bf16 %v2481_v40, %v2480_v44 }
 0x688   : > { %v5651_v17 = vpop.eup %3898  ;;  %v2420_v34 = vmul.f32 1.442695, %v2394_v1 }
 0x689   : > { %2512 = vmatmul.bf16.vlgmr.msrb.gmra.mxu3 %v2496_v55  ;;  %2450 = vadd.xlane.f32.xlu0 %v5651_v17 }
 0x68a   : > { %3900 = vpow2.f32 %v2420_v34 }
 0x68b   : > { %3902 = vrcp.f32 %v2437_v15 }
 0x68d   : > { %v2439_v52 = vpop.xlane.xlu0 %2438  ;;  %v2375_v12 = vpop.xlane.xlu2 %2374 }
 0x68e   : > { %3904 = vrcp.f32 %v2439_v52  ;;  %v2395_v26 = vsub.f32 %v5607_v39, %v2375_v12 }
 0x690   : > { %v5655_v48 = vpop.eup %3900  ;;  %v2422_v37 = vmul.f32 1.442695, %v2395_v26  ;;  %v3759_v26 = vld [vmem:[%s5959_s6 + $0xd4] sm:$0xf0] }
 0x691   : > { %2452 = vadd.xlane.f32.xlu1 %v5655_v48  ;;  %v3903_v4 = vpop.eup %3902 }
 0x692   : > { %3906 = vpow2.f32 %v2422_v37  ;;  %v2482_v53 = vmul.f32 %v3903_v4, %v5605_v13  ;;  %v3762_v13 = vld [vmem:[%s5959_s6 + $0xf4] sm:$0xf]  ;;  %v3534_v4 = vld [vmem:[%s5959_s6 + $0xc0] sm:$0xf] }
 0x693   : > { %v3563_v50 = vor.u32 %v3762_v13, %v3560_v6  ;;  %v3528_v13 = vld [vmem:[%s5959_s6 + $0xb8] sm:$0xf0]  ;;  %v3518_v6 = vld [vmem:[%s5959_s6 + $0xa0] sm:$0xf] }
 0x694   : > { %v3905_v43 = vpop.eup %3904 }
 0x695   : > { %v2441_v62 = vpop.xlane.xlu0 %2440  ;;  %v2377_v61 = vpop.xlane.xlu2 %2376  ;;  %v2483_v3 = vmul.f32 %v3905_v43, %v5612_v59  ;;  %v3559_v59 = vor.u32 %v3763_v38, %v3558_v47  ;;  %2706 = vmatpush.bf16.msra.mxu1 %v3563_v50  ;;  %v3757_v43 = vld [vmem:[%s5959_s6 + $0xc4] sm:$0xf0]  ;;  %v3754_v47 = vld [vmem:[%s5959_s6 + $0xb4] sm:$0xf] }
 0x696   : > { %v2396_v41 = vsub.f32 %v5616_v54, %v2377_v61  ;;  %v3550_v54 = vld [vmem:[%s5959_s6 + $0xe0] sm:$0xf]  ;;  %v3756_v61 = vld [vmem:[%s5959_s6 + $0xc4] sm:$0xf] }
 0x697   : > { %v2497_v0 = vpack.c.bf16 %v2483_v3, %v2482_v53  ;;  %2657 = vmatpush.bf16.msra.mxu0 %v3559_v59  ;;  %v3551_v60 = vor.u32 %v3761_v9, %v3550_v54  ;;  %v3536_v53 = vld [vmem:[%s5959_s6 + $0xc8] sm:$0xf0]  ;;  %v3535_v3 = vor.u32 %v3757_v43, %v3534_v4  ;;  %v3531_v59 = vor.u32 %v3754_v47, %v3528_v13  ;;  %v3753_v54 = vld [vmem:[%s5959_s6 + $0xa4] sm:$0xf0]  ;;  %v3752_v9 = vld [vmem:[%s5959_s6 + $0xa4] sm:$0xf] }
 0x698   : > { %v5661_v30 = vpop.eup %3906  ;;  %v2424_v39 = vmul.f32 1.442695, %v2396_v41  ;;  %v3539_v41 = vor.u32 %v3756_v61, %v3536_v53  ;;  %v3519_v50 = vor.u32 %v3753_v54, %v3518_v6  ;;  %v3523_v32 = vor.u32 %v3752_v9, %v3520_v24  ;;  %v3608_v4 = vld [vmem:[%s5959_s6 + $0x58] sm:$0xf0]  ;;  %v3600_v61 = vld [vmem:[%s5959_s6 + $0x48] sm:$0xf0] }
 0x699   : > { %2517 = vmatmul.bf16.gmra.mxu3 %v2497_v0  ;;  %2454 = vadd.xlane.f32.xlu2 %v5661_v30  ;;  %v3526_v0 = vld [vmem:[%s5959_s6 + $0xb0] sm:$0xf]  ;;  %v3592_v13 = vld [vmem:[%s5959_s6 + $0x38] sm:$0xf0]  ;;  %v3686_v24 = vld [vmem:[%s5959_s6 + $0x14] sm:$0xf] }
 0x69a   : > { %3908 = vpow2.f32 %v2424_v39  ;;  %2707 = vmatpush.bf16.msra.mxu1 %v3555_v33  ;;  %v3755_v39 = vld [vmem:[%s5959_s6 + $0xb4] sm:$0xf0] }
 0x69b   : > { %3910 = vrcp.f32 %v2441_v62  ;;  %2658 = vmatpush.bf16.msra.mxu0 %v3551_v60  ;;  %v3527_v38 = vor.u32 %v3755_v39, %v3526_v0  ;;  %v3510_v60 = vld [vmem:[%s5959_s6 + $0x90] sm:$0xf] }
 0x69d   : > { %v2443_v21 = vpop.xlane.xlu1 %2442  ;;  %v2379_v29 = vpop.xlane.xlu0 %2378 }
 0x69e   : > { %3912 = vrcp.f32 %v2443_v21  ;;  %v2397_v28 = vsub.f32 %v5623_v51, %v2379_v29  ;;  %v3751_v21 = vld [vmem:[%s5959_s6 + $0x94] sm:$0xf0]  ;;  %v3750_v29 = vld [vmem:[%s5959_s6 + $0x94] sm:$0xf] }
 0x69f   : > { %v3511_v33 = vor.u32 %v3751_v21, %v3510_v60 }
 0x6a0   : > { %v5689_v16 = vpop.eup %3908  ;;  %v2426_v22 = vmul.f32 1.442695, %v2397_v28  ;;  %v3512_v28 = vld [vmem:[%s5959_s6 + $0x98] sm:$0xf0] }
 0x6a1   : > { %2456 = vadd.xlane.f32.xlu0 %v5689_v16  ;;  %v3911_v20 = vpop.eup %3910 }
 0x6a2   : > { %3914 = vpow2.f32 %v2426_v22  ;;  %v2484_v56 = vmul.f32 %v3911_v20, %v5619_v27  ;;  %v3698_v22 = vld [vmem:[%s5959_s6 + $0x74] sm:$0xf]  ;;  %v3624_v20 = vld [vmem:[%s5959_s6 + $0x78] sm:$0xf0] }
 0x6a4   : > { %v3913_v25 = vpop.eup %3912 }
 0x6a5   : > { %v2445_v5 = vpop.xlane.xlu1 %2444  ;;  %v2381_v58 = vpop.xlane.xlu0 %2380  ;;  %v2485_v36 = vmul.f32 %v3913_v25, %v5626_v42  ;;  %v3515_v25 = vor.u32 %v3750_v29, %v3512_v28  ;;  %v3568_v28 = vld [vmem:[%s5959_s6 + $0x8] sm:$0xf0] }
 0x6a6   : > { %v2398_v14 = vsub.f32 %v5630_v18, %v2381_v58  ;;  %v3502_v58 = vld [vmem:[%s5959_s6 + $0x80] sm:$0xf] }
 0x6a7   : > { %v2498_v8 = vpack.c.bf16 %v2485_v36, %v2484_v56  ;;  %v3749_v56 = vld [vmem:[%s5959_s6 + $0x84] sm:$0xf0]  ;;  %v3748_v36 = vld [vmem:[%s5959_s6 + $0x84] sm:$0xf] }
 0x6a8   : > { %v5695_v51 = vpop.eup %3914  ;;  %v2428_v44 = vmul.f32 1.442695, %v2398_v14  ;;  %v3503_v14 = vor.u32 %v3749_v56, %v3502_v58 }
 0x6a9   : > { %2522 = vmatmul.bf16.gmra.mxu3 %v2498_v8  ;;  %2458 = vadd.xlane.f32.xlu1 %v5695_v51  ;;  %v3504_v8 = vld [vmem:[%s5959_s6 + $0x88] sm:$0xf0] }
 0x6aa   : > { %3916 = vpow2.f32 %v2428_v44  ;;  %v3507_v44 = vor.u32 %v3748_v36, %v3504_v8 }
 0x6ab   : > { %3918 = vrcp.f32 %v2445_v5  ;;  %v3627_v5 = vor.u32 %v3698_v22, %v3624_v20 }
 0x6ad   : > { %v2447_v40 = vpop.xlane.xlu2 %2446  ;;  %v2383_v15 = vpop.xlane.xlu1 %2382  ;;  %2884 = vmatpush.bf16.msra.mxu3 %v3627_v5 }
 0x6ae   : > { %3920 = vrcp.f32 %v2447_v40  ;;  %v2399_v19 = vsub.f32 %v5640_v35, %v2383_v15  ;;  %v3542_v35 = vld [vmem:[%s5959_s6 + $0xd0] sm:$0xf] }
 0x6af   : > { %v3543_v37 = vor.u32 %v3759_v26, %v3542_v35 }
 0x6b0   : > { %v5699_v1 = vpop.eup %3916  ;;  %v2430_v27 = vmul.f32 1.442695, %v2399_v19  ;;  %v3696_v19 = vld [vmem:[%s5959_s6 + $0x64] sm:$0xf] }
 0x6b1   : > { %2460 = vadd.xlane.f32.xlu2 %v5699_v1  ;;  %v3919_v42 = vpop.eup %3918  ;;  %2659 = vmatpush.bf16.msra.mxu0 %v3543_v37 }
 0x6b2   : > { %3922 = vpow2.f32 %v2430_v27  ;;  %v2486_v55 = vmul.f32 %v3919_v42, %v5633_v49  ;;  %v3758_v49 = vld [vmem:[%s5959_s6 + $0xd4] sm:$0xf]  ;;  %v3616_v27 = vld [vmem:[%s5959_s6 + $0x68] sm:$0xf0] }
 0x6b3   : > { %v3619_v42 = vor.u32 %v3696_v19, %v3616_v27 }
 0x6b4   : > { %v3921_v18 = vpop.eup %3920 }
 0x6b5   : > { %v2487_v34 = vmul.f32 %v3921_v18, %v5638_v7  ;;  %v3544_v7 = vld [vmem:[%s5959_s6 + $0xd8] sm:$0xf0]  ;;  %2660 = vmatpush.bf16.msra.mxu0 %v3535_v3  ;;  %v2449_v40 = vpop.xlane.xlu2 %2448  ;;  %2885 = vmatpush.bf16.msra.mxu3 %v3619_v42 }
 0x6b6   : > { %v3547_v62 = vor.u32 %v3758_v49, %v3544_v7  ;;  %3924 = vrcp.f32 %v2449_v40  ;;  %v3694_v7 = vld [vmem:[%s5959_s6 + $0x54] sm:$0xf] }
 0x6b7   : > { %v2499_v52 = vpack.c.bf16 %v2487_v34, %v2486_v55  ;;  %v3611_v43 = vor.u32 %v3694_v7, %v3608_v4 }
 0x6b8   : > { %v5704_v12 = vpop.eup %3922  ;;  %2708 = vmatpush.bf16.msra.mxu1 %v3547_v62 }
 0x6b9   : > { %2527 = vmatmul.bf16.gmra.mxu3 %v2499_v52  ;;  %2462 = vadd.xlane.f32.xlu0 %v5704_v12 }
 0x6ba   : > { %2661 = vmatpush.bf16.msra.mxu0 %v3527_v38  ;;  %2886 = vmatpush.bf16.msra.mxu3 %v3611_v43  ;;  %v3690_v38 = vld [vmem:[%s5959_s6 + $0x34] sm:$0xf] }
 0x6bb   : > { %v3595_v6 = vor.u32 %v3690_v38, %v3592_v13 }
 0x6bc   : > { %2709 = vmatpush.bf16.msra.mxu1 %v3539_v41  ;;  %v3925_v18 = vpop.eup %3924 }
 0x6bd   : > { %v2488_v34 = vmul.f32 %v3925_v18, %v5644_v63 }
 0x6be   : > { %2662 = vmatpush.bf16.msra.mxu0 %v3519_v50 }
 0x6c0   : > { %2710 = vmatpush.bf16.msra.mxu1 %v3531_v59 }
 0x6c2   : > { %2663 = vmatpush.bf16.msra.mxu0 %v3511_v33  ;;  %v3684_v33 = vld [vmem:[%s5959_s6 + $0x4] sm:$0xf] }
 0x6c3   : > { %v3571_v5 = vor.u32 %v3684_v33, %v3568_v28 }
 0x6c4   : > { %2711 = vmatpush.bf16.msra.mxu1 %v3523_v32  ;;  %v3576_v32 = vld [vmem:[%s5959_s6 + $0x18] sm:$0xf0] }
 0x6c5   : > { %v3579_v60 = vor.u32 %v3686_v24, %v3576_v32 }
 0x6c6   : > { %2664 = vmatpush.bf16.msra.mxu0 %v3503_v14 }
 0x6c8   : > { %2712 = vmatpush.bf16.msra.mxu1 %v3515_v25 }
 0x6cc   : > { %2713 = vmatpush.bf16.msra.mxu1 %v3507_v44 }
 0x6fc   : > { %v2451_v15 = vpop.xlane.xlu0 %2450 }
 0x6fd   : > { %3926 = vrcp.f32 %v2451_v15 }
 0x703   : > { %v3927_v55 = vpop.eup %3926 }
 0x704   : > { %v2489_v52 = vmul.f32 %v3927_v55, %v5651_v17  ;;  %v2453_v26 = vpop.xlane.xlu1 %2452  ;;  %v3692_v17 = vld [vmem:[%s5959_s6 + $0x44] sm:$0xf] }
 0x705   : > { %3928 = vrcp.f32 %v2453_v26  ;;  %v3603_v0 = vor.u32 %v3692_v17, %v3600_v61 }
 0x706   : > { %v2500_v35 = vpack.c.bf16 %v2489_v52, %v2488_v34  ;;  %v2933_v52 = vld [vmem:[%s5963_s10] sm:$0x3] }
 0x707   : > { %2887 = vmatpush.bf16.msra.mxu3 %v3603_v0  ;;  %v5867_v28 = vperm.slane %v2933_v52, 1 }
 0x708   : > { %2532 = vmatmul.bf16.gmra.mxu3 %v2500_v35 }
 0x70b   : > { %v3929_v63 = vpop.eup %3928  ;;  %2888 = vmatpush.bf16.msra.mxu3 %v3595_v6 }
 0x70c   : > { %v2513_v49 = vpop.f32.mrf.mxu3  ;;  %v2455_v37 = vpop.xlane.xlu2 %2454  ;;  %v2490_v3 = vmul.f32 %v3929_v63, %v5655_v48  ;;  %v3688_v48 = vld [vmem:[%s5959_s6 + $0x24] sm:$0xf] }
 0x70d   : > { %3930 = vrcp.f32 %v2455_v37 }
 0x713   : > { %v3931_v62 = vpop.eup %3930 }
 0x714   : > { %v2515_v53 = vpop.f32.mrf.mxu3  ;;  %v2491_v41 = vmul.f32 %v3931_v62, %v5661_v30  ;;  %v2457_v59 = vpop.xlane.xlu0 %2456  ;;  %v3584_v30 = vld [vmem:[%s5959_s6 + $0x28] sm:$0xf0] }
 0x715   : > { %v2553_v39 = vpack.c.bf16 %v2515_v53, %v2513_v49  ;;  %3932 = vrcp.f32 %v2457_v59  ;;  %v3587_v50 = vor.u32 %v3688_v48, %v3584_v30 }
 0x716   : > { %v2501_v47 = vpack.c.bf16 %v2491_v41, %v2490_v3 }
 0x717   : > { %2665 = vmatmul.bf16.vlgmr.msra.gmra.mxu0 %v2553_v39  ;;  %2714 = vmatmul.bf16.vlgmr.msra.gmra.mxu1 %v2553_v39 }
 0x718   : > { %2537 = vmatmul.bf16.gmra.mxu3 %v2501_v47 }
 0x719   : > { %2889 = vmatpush.bf16.msra.mxu3 %v3587_v50 }
 0x71b   : > { %v3933_v21 = vpop.eup %3932 }
 0x71c   : > { %v2518_v54 = vpop.f32.mrf.mxu3  ;;  %v2459_v9 = vpop.xlane.xlu1 %2458  ;;  %v2492_v20 = vmul.f32 %v3933_v21, %v5689_v16 }
 0x71d   : > { %3934 = vrcp.f32 %v2459_v9  ;;  %2890 = vmatpush.bf16.msra.mxu3 %v3579_v60 }
 0x721   : > { %2891 = vmatpush.bf16.msra.mxu3 %v3571_v5 }
 0x723   : > { %v3935_v29 = vpop.eup %3934 }
 0x724   : > { %v2520_v22 = vpop.f32.mrf.mxu3  ;;  %v2493_v25 = vmul.f32 %v3935_v29, %v5695_v51  ;;  %v2461_v36 = vpop.xlane.xlu2 %2460 }
 0x725   : > { %v2554_v58 = vpack.c.bf16 %v2520_v22, %v2518_v54  ;;  %3936 = vrcp.f32 %v2461_v36 }
 0x726   : > { %v2502_v56 = vpack.c.bf16 %v2493_v25, %v2492_v20 }
 0x727   : > { %2670 = vmatmul.bf16.gmra.mxu0 %v2554_v58  ;;  %2719 = vmatmul.bf16.gmra.mxu1 %v2554_v58 }
 0x728   : > { %2542 = vmatmul.bf16.gmra.mxu3 %v2502_v56 }
 0x72b   : > { %v3937_v44 = vpop.eup %3936 }
 0x72c   : > { %v2523_v14 = vpop.f32.mrf.mxu3  ;;  %v2463_v8 = vpop.xlane.xlu0 %2462  ;;  %v2494_v19 = vmul.f32 %v3937_v44, %v5699_v1 }
 0x72d   : > { %3938 = vrcp.f32 %v2463_v8  ;;  %v2844_v1 = vpop.f32.mrf.mxu2 }
 0x733   : > { %v3939_v40 = vpop.eup %3938 }
 0x734   : > { %v2525_v15 = vpop.f32.mrf.mxu3  ;;  %v2495_v16 = vmul.f32 %v3939_v40, %v5704_v12 }
 0x735   : > { %v2555_v51 = vpack.c.bf16 %v2525_v15, %v2523_v14  ;;  %v2846_v34 = vpop.f32.mrf.mxu2 }
 0x736   : > { %v2503_v27 = vpack.c.bf16 %v2495_v16, %v2494_v19 }
 0x737   : > { %2675 = vmatmul.bf16.gmra.mxu0 %v2555_v51  ;;  %2724 = vmatmul.bf16.gmra.mxu1 %v2555_v51 }
 0x738   : > { %2547 = vmatmul.bf16.gmra.mxu3 %v2503_v27 }
 0x73c   : > { %v2528_v42 = vpop.f32.mrf.mxu3 }
 0x744   : > { %v2530_v18 = vpop.f32.mrf.mxu3 }
 0x745   : > { %v2556_v55 = vpack.c.bf16 %v2530_v18, %v2528_v42 }
 0x747   : > { %2680 = vmatmul.bf16.gmra.mxu0 %v2556_v55  ;;  %2729 = vmatmul.bf16.gmra.mxu1 %v2556_v55 }
 0x748   : > { %2892 = vmatmul.bf16.vlgmr.msra.gmra.mxu3 %v5490_v23  ;;  %v5846_v23 = vperm.slane %v2933_v52, 0 }
 0x758   : > { %2897 = vmatmul.bf16.gmra.mxu3 %v5508_v11 }
 0x768   : > { %2902 = vmatmul.bf16.gmra.mxu3 %v5524_v45 }
 0x778   : > { %2907 = vmatmul.bf16.gmra.mxu3 %v5535_v46 }
 0x788   : > { %2912 = vmatmul.bf16.gmra.mxu3 %v5546_v31  ;;  %v2849_v31 = vpop.f32.mrf.mxu2 }
 0x78b   : > { %v2533_v12 = vpop.f32.mrf.mxu3 }
 0x790   : > { %v2851_v63 = vpop.f32.mrf.mxu2 }
 0x793   : > { %v2535_v35 = vpop.f32.mrf.mxu3 }
 0x794   : > { %v2557_v11 = vpack.c.bf16 %v2535_v35, %v2533_v12  ;;  %v2666_v26 = vpop.f32.mrf.mxu0  ;;  %v2715_v54 = vpop.f32.mrf.mxu1 }
 0x795   : > { %v2845_v45 = vadd.f32 %v2844_v1, %v2666_v26 }
 0x796   : > { %2685 = vmatmul.bf16.gmra.mxu0 %v2557_v11  ;;  %2734 = vmatmul.bf16.gmra.mxu1 %v2557_v11 }
 0x797   : > { %v2939_v46 = vadd.f32 %v5846_v23, %v2845_v45 }
 0x798   : > { %2917 = vmatmul.bf16.gmra.mxu3 %v5555_v2  ;;  %v2854_v0 = vpop.f32.mrf.mxu2 }
 0x799   : > { %2971 = vst [vmem:[%s5850_s12] sm:$0xff] %v2939_v46 }
 0x79b   : > { %v2538_v49 = vpop.f32.mrf.mxu3 }
 0x79c   : > { %v2668_v37 = vpop.f32.mrf.mxu0  ;;  %v2717_v33 = vpop.f32.mrf.mxu1 }
 0x79d   : > { %v2847_v7 = vadd.f32 %v2846_v34, %v2668_v37 }
 0x79f   : > { %v2941_v4 = vadd.f32 %v5846_v23, %v2847_v7 }
 0x7a0   : > { %v2856_v48 = vpop.f32.mrf.mxu2 }
 0x7a1   : > { %2973 = vst [vmem:[%s5850_s12 + $0x10] sm:$0xff] %v2941_v4 }
 0x7a3   : > { %v2540_v43 = vpop.f32.mrf.mxu3 }
 0x7a4   : > { %v2558_v62 = vpack.c.bf16 %v2540_v43, %v2538_v49  ;;  %v2671_v17 = vpop.f32.mrf.mxu0  ;;  %v2720_v14 = vpop.f32.mrf.mxu1 }
 0x7a5   : > { %v2850_v61 = vadd.f32 %v2849_v31, %v2671_v17 }
 0x7a6   : > { %2690 = vmatmul.bf16.gmra.mxu0 %v2558_v62  ;;  %2739 = vmatmul.bf16.gmra.mxu1 %v2558_v62 }
 0x7a7   : > { %v2943_v2 = vadd.f32 %v5846_v23, %v2850_v61 }
 0x7a8   : > { %2922 = vmatmul.bf16.gmra.mxu3 %v5567_v10  ;;  %v2859_v24 = vpop.f32.mrf.mxu2 }
 0x7a9   : > { %2975 = vst [vmem:[%s5850_s12 + $0x20] sm:$0xff] %v2943_v2 }
 0x7ab   : > { %v2543_v53 = vpop.f32.mrf.mxu3 }
 0x7ac   : > { %v2673_v3 = vpop.f32.mrf.mxu0  ;;  %v2722_v15 = vpop.f32.mrf.mxu1 }
 0x7ad   : > { %v2852_v41 = vadd.f32 %v2851_v63, %v2673_v3 }
 0x7af   : > { %v2945_v39 = vadd.f32 %v5846_v23, %v2852_v41 }
 0x7b0   : > { %v2861_v20 = vpop.f32.mrf.mxu2 }
 0x7b1   : > { %2977 = vst [vmem:[%s5850_s12 + $0x30] sm:$0xff] %v2945_v39 }
 0x7b3   : > { %v2545_v47 = vpop.f32.mrf.mxu3 }
 0x7b4   : > { %v2559_v38 = vpack.c.bf16 %v2545_v47, %v2543_v53  ;;  %v2676_v13 = vpop.f32.mrf.mxu0  ;;  %v2725_v18 = vpop.f32.mrf.mxu1 }
 0x7b5   : > { %v2855_v59 = vadd.f32 %v2854_v0, %v2676_v13 }
 0x7b6   : > { %2695 = vmatmul.bf16.gmra.mxu0 %v2559_v38  ;;  %2744 = vmatmul.bf16.gmra.mxu1 %v2559_v38 }
 0x7b7   : > { %v2947_v6 = vadd.f32 %v5846_v23, %v2855_v59 }
 0x7b8   : > { %2927 = vmatmul.bf16.gmra.mxu3 %v5586_v57  ;;  %v2864_v4 = vpop.f32.mrf.mxu2 }
 0x7b9   : > { %2979 = vst [vmem:[%s5850_s12 + $0x40] sm:$0xff] %v2947_v6 }
 0x7bb   : > { %v2548_v10 = vpop.f32.mrf.mxu3 }
 0x7bc   : > { %v2678_v30 = vpop.f32.mrf.mxu0  ;;  %v2727_v52 = vpop.f32.mrf.mxu1 }
 0x7bd   : > { %v2857_v9 = vadd.f32 %v2856_v48, %v2678_v30 }
 0x7bf   : > { %v2949_v50 = vadd.f32 %v5846_v23, %v2857_v9 }
 0x7c0   : > { %v2866_v17 = vpop.f32.mrf.mxu2 }
 0x7c1   : > { %2981 = vst [vmem:[%s5850_s12 + $0x50] sm:$0xff] %v2949_v50 }
 0x7c3   : > { %v2550_v32 = vpop.f32.mrf.mxu3 }
 0x7c4   : > { %v2560_v60 = vpack.c.bf16 %v2550_v32, %v2548_v10  ;;  %v2681_v21 = vpop.f32.mrf.mxu0  ;;  %v2730_v45 = vpop.f32.mrf.mxu1 }
 0x7c5   : > { %v2860_v29 = vadd.f32 %v2859_v24, %v2681_v21 }
 0x7c6   : > { %2700 = vmatmul.bf16.gmra.mxu0 %v2560_v60  ;;  %2749 = vmatmul.bf16.gmra.mxu1 %v2560_v60 }
 0x7c7   : > { %v2951_v57 = vadd.f32 %v5846_v23, %v2860_v29 }
 0x7c8   : > { %v2869_v47 = vpop.f32.mrf.mxu2 }
 0x7c9   : > { %2983 = vst [vmem:[%s5850_s12 + $0x60] sm:$0xff] %v2951_v57 }
 0x7cb   : > { %v2893_v22 = vpop.f32.mrf.mxu3 }
 0x7cc   : > { %v2894_v25 = vadd.f32 %v2893_v22, %v2715_v54  ;;  %v2683_v5 = vpop.f32.mrf.mxu0  ;;  %v2732_v37 = vpop.f32.mrf.mxu1 }
 0x7cd   : > { %v2862_v58 = vadd.f32 %v2861_v20, %v2683_v5 }
 0x7ce   : > { %v2940_v56 = vadd.f32 %v5867_v28, %v2894_v25 }
 0x7cf   : > { %v2953_v36 = vadd.f32 %v5846_v23, %v2862_v58 }
 0x7d0   : > { %2972 = vst [vmem:[%s5850_s12 + $0x8] sm:$0xff] %v2940_v56  ;;  %v2871_v54 = vpop.f32.mrf.mxu2 }
 0x7d1   : > { %2985 = vst [vmem:[%s5850_s12 + $0x70] sm:$0xff] %v2953_v36 }
 0x7d3   : > { %v2895_v8 = vpop.f32.mrf.mxu3 }
 0x7d4   : > { %v2896_v44 = vadd.f32 %v2895_v8, %v2717_v33 }
 0x7d6   : > { %v2942_v40 = vadd.f32 %v5867_v28, %v2896_v44 }
 0x7d8   : > { %2974 = vst [vmem:[%s5850_s12 + $0x18] sm:$0xff] %v2942_v40  ;;  %v2874_v22 = vpop.f32.mrf.mxu2 }
 0x7db   : > { %v2898_v19 = vpop.f32.mrf.mxu3 }
 0x7dc   : > { %v2899_v16 = vadd.f32 %v2898_v19, %v2720_v14 }
 0x7de   : > { %v2944_v51 = vadd.f32 %v5867_v28, %v2899_v16 }
 0x7e0   : > { %2976 = vst [vmem:[%s5850_s12 + $0x28] sm:$0xff] %v2944_v51  ;;  %v2876_v40 = vpop.f32.mrf.mxu2 }
 0x7e3   : > { %v2900_v27 = vpop.f32.mrf.mxu3 }
 0x7e4   : > { %v2901_v42 = vadd.f32 %v2900_v27, %v2722_v15 }
 0x7e6   : > { %v2946_v55 = vadd.f32 %v5867_v28, %v2901_v42 }
 0x7e8   : > { %2978 = vst [vmem:[%s5850_s12 + $0x38] sm:$0xff] %v2946_v55 }
 0x7eb   : > { %v2903_v1 = vpop.f32.mrf.mxu3 }
 0x7ec   : > { %v2904_v12 = vadd.f32 %v2903_v1, %v2725_v18 }
 0x7ee   : > { %v2948_v34 = vadd.f32 %v5867_v28, %v2904_v12  ;;  %v2879_v12 = vpop.f32.mrf.mxu2 }
 0x7f0   : > { %2980 = vst [vmem:[%s5850_s12 + $0x48] sm:$0xff] %v2948_v34 }
 0x7f3   : > { %v2905_v35 = vpop.f32.mrf.mxu3 }
 0x7f4   : > { %v2906_v11 = vadd.f32 %v2905_v35, %v2727_v52 }
 0x7f6   : > { %v2950_v26 = vadd.f32 %v5867_v28, %v2906_v11 }
 0x7f8   : > { %2982 = vst [vmem:[%s5850_s12 + $0x58] sm:$0xff] %v2950_v26 }
 0x7fb   : > { %v2908_v46 = vpop.f32.mrf.mxu3 }
 0x7fc   : > { %v2909_v31 = vadd.f32 %v2908_v46, %v2730_v45 }
 0x7fe   : > { %v2952_v49 = vadd.f32 %v5867_v28, %v2909_v31  ;;  %v2881_v31 = vpop.f32.mrf.mxu2 }
 0x800   : > { %2984 = vst [vmem:[%s5850_s12 + $0x68] sm:$0xff] %v2952_v49 }
 0x803   : > { %v2910_v7 = vpop.f32.mrf.mxu3 }
 0x804   : > { %v2911_v43 = vadd.f32 %v2910_v7, %v2732_v37 }
 0x806   : > { %v2954_v63 = vadd.f32 %v5867_v28, %v2911_v43 }
 0x808   : > { %2986 = vst [vmem:[%s5850_s12 + $0x78] sm:$0xff] %v2954_v63 }
 0x80b   : > { %v2913_v62 = vpop.f32.mrf.mxu3 }
 0x813   : > { %v2686_v61 = vpop.f32.mrf.mxu0  ;;  %v2735_v2 = vpop.f32.mrf.mxu1 }
 0x814   : > { %v2865_v53 = vadd.f32 %v2864_v4, %v2686_v61  ;;  %v2914_v3 = vadd.f32 %v2913_v62, %v2735_v2  ;;  %v2915_v41 = vpop.f32.mrf.mxu3 }
 0x816   : > { %v2955_v0 = vadd.f32 %v5846_v23, %v2865_v53  ;;  %v2956_v39 = vadd.f32 %v5867_v28, %v2914_v3 }
 0x818   : > { %2987 = vst [vmem:[%s5850_s12 + $0x80] sm:$0xff] %v2955_v0 }
 0x819   : > { %2988 = vst [vmem:[%s5850_s12 + $0x88] sm:$0xff] %v2956_v39 }
 0x81b   : > { %v2688_v38 = vpop.f32.mrf.mxu0  ;;  %v2737_v13 = vpop.f32.mrf.mxu1 }
 0x81c   : > { %v2867_v59 = vadd.f32 %v2866_v17, %v2688_v38  ;;  %v2916_v6 = vadd.f32 %v2915_v41, %v2737_v13  ;;  %v2918_v48 = vpop.f32.mrf.mxu3 }
 0x81e   : > { %v2957_v10 = vadd.f32 %v5846_v23, %v2867_v59  ;;  %v2958_v30 = vadd.f32 %v5867_v28, %v2916_v6 }
 0x820   : > { %2989 = vst [vmem:[%s5850_s12 + $0x90] sm:$0xff] %v2957_v10 }
 0x821   : > { %2990 = vst [vmem:[%s5850_s12 + $0x98] sm:$0xff] %v2958_v30 }
 0x823   : > { %v2691_v9 = vpop.f32.mrf.mxu0  ;;  %v2740_v50 = vpop.f32.mrf.mxu1 }
 0x824   : > { %v2870_v24 = vadd.f32 %v2869_v47, %v2691_v9  ;;  %v2919_v32 = vadd.f32 %v2918_v48, %v2740_v50  ;;  %v2920_v60 = vpop.f32.mrf.mxu3 }
 0x826   : > { %v2959_v21 = vadd.f32 %v5846_v23, %v2870_v24  ;;  %v2960_v29 = vadd.f32 %v5867_v28, %v2919_v32 }
 0x828   : > { %2991 = vst [vmem:[%s5850_s12 + $0xa0] sm:$0xff] %v2959_v21 }
 0x829   : > { %2992 = vst [vmem:[%s5850_s12 + $0xa8] sm:$0xff] %v2960_v29 }
 0x82b   : > { %v2693_v33 = vpop.f32.mrf.mxu0  ;;  %v2742_v57 = vpop.f32.mrf.mxu1 }
 0x82c   : > { %v2872_v20 = vadd.f32 %v2871_v54, %v2693_v33  ;;  %v2921_v25 = vadd.f32 %v2920_v60, %v2742_v57  ;;  %v2923_v5 = vpop.f32.mrf.mxu3 }
 0x82e   : > { %v2961_v58 = vadd.f32 %v5846_v23, %v2872_v20  ;;  %v2962_v56 = vadd.f32 %v5867_v28, %v2921_v25 }
 0x830   : > { %2993 = vst [vmem:[%s5850_s12 + $0xb0] sm:$0xff] %v2961_v58 }
 0x831   : > { %2994 = vst [vmem:[%s5850_s12 + $0xb8] sm:$0xff] %v2962_v56 }
 0x833   : > { %v2696_v36 = vpop.f32.mrf.mxu0  ;;  %v2745_v14 = vpop.f32.mrf.mxu1 }
 0x834   : > { %v2875_v8 = vadd.f32 %v2874_v22, %v2696_v36  ;;  %v2924_v44 = vadd.f32 %v2923_v5, %v2745_v14  ;;  %v2925_v16 = vpop.f32.mrf.mxu3 }
 0x836   : > { %v2963_v15 = vadd.f32 %v5846_v23, %v2875_v8  ;;  %v2964_v19 = vadd.f32 %v5867_v28, %v2924_v44 }
 0x838   : > { %2995 = vst [vmem:[%s5850_s12 + $0xc0] sm:$0xff] %v2963_v15 }
 0x839   : > { %2996 = vst [vmem:[%s5850_s12 + $0xc8] sm:$0xff] %v2964_v19 }
 0x83b   : > { %v2698_v51 = vpop.f32.mrf.mxu0  ;;  %v2747_v27 = vpop.f32.mrf.mxu1 }
 0x83c   : > { %v2877_v42 = vadd.f32 %v2876_v40, %v2698_v51  ;;  %v2926_v18 = vadd.f32 %v2925_v16, %v2747_v27  ;;  %v2928_v34 = vpop.f32.mrf.mxu3 }
 0x83e   : > { %v2965_v55 = vadd.f32 %v5846_v23, %v2877_v42  ;;  %v2966_v1 = vadd.f32 %v5867_v28, %v2926_v18 }
 0x840   : > { %2997 = vst [vmem:[%s5850_s12 + $0xd0] sm:$0xff] %v2965_v55 }
 0x841   : > { %2998 = vst [vmem:[%s5850_s12 + $0xd8] sm:$0xff] %v2966_v1 }
 0x843   : > { %v2701_v52 = vpop.f32.mrf.mxu0  ;;  %v2750_v35 = vpop.f32.mrf.mxu1 }
 0x844   : > { %v2880_v11 = vadd.f32 %v2879_v12, %v2701_v52  ;;  %v2929_v26 = vadd.f32 %v2928_v34, %v2750_v35  ;;  %v2930_v49 = vpop.f32.mrf.mxu3 }
 0x846   : > { %v2967_v45 = vadd.f32 %v5846_v23, %v2880_v11  ;;  %v2968_v46 = vadd.f32 %v5867_v28, %v2929_v26 }
 0x848   : > { %2999 = vst [vmem:[%s5850_s12 + $0xe0] sm:$0xff] %v2967_v45 }
 0x849   : > { %3000 = vst [vmem:[%s5850_s12 + $0xe8] sm:$0xff] %v2968_v46 }
 0x84b   : > { %v2703_v37 = vpop.f32.mrf.mxu0  ;;  %v2752_v7 = vpop.f32.mrf.mxu1 }
 0x84c   : > { %v2882_v4 = vadd.f32 %v2881_v31, %v2703_v37  ;;  %v2931_v43 = vadd.f32 %v2930_v49, %v2752_v7 }
 0x84e   : > { %v2969_v63 = vadd.f32 %v5846_v23, %v2882_v4  ;;  %v2970_v62 = vadd.f32 %v5867_v28, %v2931_v43 }
 0x850   : > { %3001 = vst [vmem:[%s5850_s12 + $0xf0] sm:$0xff] %v2969_v63 }
 0x851   : > { %3002 = vst [vmem:[%s5850_s12 + $0xf8] sm:$0xff] %v2970_v62 }
 0x852   : > { %3967 = shalt.err (!%p3964_p3)
}
 0x853   : > { %s4004_s13 = smov 256   ;;  %s4005_s12 = smov 16  }
 0x854   : > { %3765 = dma.vmem_to_hbm [thread:$0]  (%p4104_p5), %s3017_s24, 4096, %s3019_s21, %s3004_s29, %s4004_s13, %s4004_s13, %s4005_s12  }
 0x855 PF: > { %p3771_p4 = scmp.ge.s32.totalorder %s4002_s20, 2  ;;  %s3033_s26 = sand.u32 1, %s3990_s17  }
 0x856   : > { %s3034_s15 = scalar_lea.sflag [#allocation3], %s3033_s26 }
 0x857   : > { %p3768_p7 = pnand %p3771_p4, %p4108_p6 }
 0x859   : > { %p3769_p8 = pneg %p3768_p7 }
 0x85b   : > { %3985 = dma.done.wait (%p3769_p8), %s3034_s15, 4096  }
 0x85c   : > { %3987 = vsyncadd (%p3769_p8), %s3034_s15, 4294963200  ;;  %s6072_s30 = sld [smem:[#allocation5_spill]]  ;;  %p21_p9 = scmp.ge.s32.totalorder %s4091_s23, 4  }
 0x85d   : > { %s6073_s19 = sld [smem:[#allocation6_spill]]  ;;  %s6074_s17 = smov %s3994_s18 }
 0x85e   : > { %s6076_s20 = smov %s4091_s23  ;;  %23 = sbr.rel (!%p21_p9) target bundleno = 3 (0x3), region = 105 }
 0x862   : > { %s6075_s18 = smov %s6072_s30 }
 0x863   :  { %3040 = vsyncpa [#allocation3], 1 }
 0x864   :  { %3042 = vsyncpa [#allocation3 + $0x1], 1 }

</bundles_post_ra>
